<compile_context>
chip_gen: v5e
topology: v5e:2x2
jax: 0.10.0
libtpu: 0.0.40
codegen_flags: <defaults>
</compile_context>

<pallas_src>
import functools

import jax
import jax.numpy as jnp
from jax import lax
from jax.experimental import pallas as pl
from jax.experimental.pallas import tpu as pltpu

EPS = 1e-5  # PyTorch InstanceNorm2d default


def _make_kernel(Cc, Cs, F, H, W, B):
    C0 = Cc + Cs          # channels into conv1 (= params['num_channels'])
    C1 = C0 + F           # channels into conv2
    C2 = C0 + 2 * F       # channels into conv3 (1x1)
    P = H * W             # flattened spatial size (lane axis)
    inv_P = 1.0 / P

    def kernel(vals_ref, idx_ref, skip_ref, mask_ref,
               w1_ref, b1_ref, w2_ref, b2_ref, w3_ref, b3_ref, a_ref,
               out_ref, act_ref, tap_ref):
        a = a_ref[0]                          # shared PReLU slope (SMEM scalar)
        mask = mask_ref[...]                  # (25, P) tap-validity mask (hoisted)
        pos = lax.broadcasted_iota(jnp.int32, (Cc, P), 1)   # flat spatial index
        w1 = w1_ref[...]; b1 = b1_ref[...]
        w2 = w2_ref[...]; b2 = b2_ref[...]
        w3 = w3_ref[...]; b3 = b3_ref[...]

        def norm_act(x):
            # per-channel InstanceNorm (simultaneous sum / sum-of-squares) + PReLU
            s = jnp.sum(x, axis=1, keepdims=True)
            ss = jnp.sum(x * x, axis=1, keepdims=True)
            m = s * inv_P
            var = ss * inv_P - m * m
            y = (x - m) * lax.rsqrt(var + EPS)
            return jnp.where(y >= 0, y, a * y)

        def stack_taps(act, n, row0):
            # act: (n, P) activated channels.  Write 25 shifted+masked taps
            # (tap-major, n rows per tap) as bf16 starting at scratch row `row0`.
            for t in range(25):
                kh, kw = t // 5, t % 5
                d = (kh - 2) * W + (kw - 2)
                sh = pltpu.roll(act, (-d) % P, axis=1) if d != 0 else act
                r0 = row0 + t * n
                tap_ref[r0:r0 + n, :] = (sh * mask[t:t + 1, :]).astype(jnp.bfloat16)

        for b in range(B):   # small bounded fold (B <= 4) of images per grid step
            # ---- MaxUnpool2d (window-local): pooled values/indices were
            # nearest-upsampled in the wrapper; keep a value only where its
            # recorded flat index equals the current position.
            # NOTE: assumes indices come from MaxPool2d(2,2) (inside own window).
            unpool = jnp.where(idx_ref[0, b] == pos, vals_ref[0, b], 0.0)

            # act_ref holds prelu(inst_norm(.)) of every dense-block channel:
            # rows = [skip | unpool | o3 | o7].  norm2/norm3 on already-seen
            # channels are identical to what is stored, so they are NOT recomputed.
            act_ref[0:Cs, :] = norm_act(skip_ref[0, b])
            act_ref[Cs:C0, :] = norm_act(unpool)

            # conv1: stack 25*C0 taps (bf16) -> one MXU matmul, K = 25*C0.
            stack_taps(act_ref[0:C0, :], C0, 0)
            o3 = jnp.dot(w1, tap_ref[0:25 * C0, :],
                         preferred_element_type=jnp.float32) + b1

            act_ref[C0:C1, :] = norm_act(o3)

            # conv2 reuses conv1's 25*C0 stacked rows; only the F new channels
            # get rolled/masked/stored.  One MXU matmul, K = 25*C1.
            stack_taps(act_ref[C0:C1, :], F, 25 * C0)
            o7 = jnp.dot(w2, tap_ref[0:25 * C1, :],
                         preferred_element_type=jnp.float32) + b2

            act_ref[C1:C2, :] = norm_act(o7)

            # conv3 is 1x1: plain f32 matmul over the activated concat buffer.
            out_ref[0, b] = jnp.dot(w3, act_ref[...],
                                    preferred_element_type=jnp.float32) + b3

    return kernel


def _images_per_step(N):
    """Bounded fold: keep >=2 (ideally >=4) grid steps, cap per-step work."""
    return max(1, min(4, -(-N // 4)))


@functools.partial(jax.jit, static_argnames=("images_per_step",))
def decoder_block_forward(x_pool, indices, skip, w1, b1, w2, b2, w3, b3, prelu_a,
                          images_per_step=None):
    """Pallas implementation of DecoderBlock.forward(input, out_block, indices)."""
    N, Cc, Hp, Wp = x_pool.shape
    _, Cs, H, W = skip.shape
    F = w1.shape[0]
    C0, C1, C2 = Cc + Cs, Cc + Cs + F, Cc + Cs + 2 * F
    P = H * W
    fh, fw = H // Hp, W // Wp
    assert H == fh * Hp and W == fw * Wp

    B = images_per_step if images_per_step is not None else _images_per_step(N)
    S = -(-N // B)
    Np = S * B
    if Np != N:
        pad = ((0, Np - N), (0, 0), (0, 0), (0, 0))
        x_pool = jnp.pad(x_pool, pad)
        indices = jnp.pad(indices, pad)
        skip = jnp.pad(skip, pad)

    # ---- glue: layout plumbing only ----
    # nearest-neighbour upsample of pooled values / indices to the full grid
    vals_up = jnp.repeat(jnp.repeat(x_pool, fh, axis=2), fw, axis=3)
    idx_up = jnp.repeat(jnp.repeat(indices, fh, axis=2), fw, axis=3)
    vals_up = vals_up.reshape(S, B, Cc, P).astype(jnp.float32)
    idx_up = idx_up.reshape(S, B, Cc, P).astype(jnp.int32)
    skip_r = skip.reshape(S, B, Cs, P).astype(jnp.float32)

    # per-tap boundary-validity mask (compile-time constant under jit)
    rows = jnp.arange(P, dtype=jnp.int32) // W
    cols = jnp.arange(P, dtype=jnp.int32) % W
    mask_rows = []
    for kh in range(5):
        for kw in range(5):
            dh, dw = kh - 2, kw - 2
            mask_rows.append((rows + dh >= 0) & (rows + dh < H) &
                             (cols + dw >= 0) & (cols + dw < W))
    tap_mask = jnp.stack(mask_rows).astype(jnp.float32)            # (25, P)

    # conv1 weight: K order = (tap, channel) over C0 channels, bf16.
    w1f = jnp.transpose(w1, (0, 2, 3, 1)).reshape(F, 25 * C0).astype(jnp.bfloat16)
    # conv2 weight: two-segment layout matching the reused tap stack —
    # first 25*C0 columns address conv1's stack (tap, c<C0), remaining 25*F
    # columns address the freshly stacked new channels (tap, f).
    w2a = jnp.transpose(w2[:, :C0], (0, 2, 3, 1)).reshape(F, 25 * C0)
    w2b = jnp.transpose(w2[:, C0:], (0, 2, 3, 1)).reshape(F, 25 * F)
    w2f = jnp.concatenate([w2a, w2b], axis=1).astype(jnp.bfloat16)
    w3f = w3.reshape(F, C2).astype(jnp.float32)
    b1c = b1.reshape(F, 1).astype(jnp.float32)
    b2c = b2.reshape(F, 1).astype(jnp.float32)
    b3c = b3.reshape(F, 1).astype(jnp.float32)
    a = prelu_a.reshape(1).astype(jnp.float32)

    kernel = _make_kernel(Cc, Cs, F, H, W, B)

    # explicit VMEM budget: 2x-buffered in/out blocks + weights + scratch, 2x margin
    blk_in_bytes = 4 * B * P * (Cc + Cc + Cs)
    blk_out_bytes = 4 * B * P * F
    wgt_bytes = 2 * F * 25 * (C0 + C1) + 4 * (F * C2 + 3 * F + 25 * P)
    scratch_bytes = 4 * C2 * P + 2 * 25 * C1 * P
    est = 2 * (blk_in_bytes + blk_out_bytes) + wgt_bytes + scratch_bytes
    vmem_limit = int(min(64 * 2**20, max(16 * 2**20, 2 * est)))

    out = pl.pallas_call(
        kernel,
        out_shape=jax.ShapeDtypeStruct((S, B, F, P), jnp.float32),
        grid=(S,),
        in_specs=[
            pl.BlockSpec((1, B, Cc, P), lambda s: (s, 0, 0, 0)),   # upsampled pooled values
            pl.BlockSpec((1, B, Cc, P), lambda s: (s, 0, 0, 0)),   # upsampled unpool indices
            pl.BlockSpec((1, B, Cs, P), lambda s: (s, 0, 0, 0)),   # skip (out_block)
            pl.BlockSpec((25, P), lambda s: (0, 0)),               # tap validity mask
            pl.BlockSpec((F, 25 * C0), lambda s: (0, 0)),          # conv1 weight (bf16)
            pl.BlockSpec((F, 1), lambda s: (0, 0)),                # conv1 bias
            pl.BlockSpec((F, 25 * C1), lambda s: (0, 0)),          # conv2 weight (bf16, 2-seg)
            pl.BlockSpec((F, 1), lambda s: (0, 0)),                # conv2 bias
            pl.BlockSpec((F, C2), lambda s: (0, 0)),               # conv3 (1x1) weight
            pl.BlockSpec((F, 1), lambda s: (0, 0)),                # conv3 bias
            pl.BlockSpec(memory_space=pltpu.MemorySpace.SMEM),     # PReLU slope scalar
        ],
        out_specs=pl.BlockSpec((1, B, F, P), lambda s: (s, 0, 0, 0)),
        scratch_shapes=[
            pltpu.VMEM((C2, P), jnp.float32),            # activated-channel buffer
            pltpu.VMEM((25 * C1, P), jnp.bfloat16),      # stacked conv taps (conv2 reuses conv1 rows)
        ],
        compiler_params=pltpu.CompilerParams(
            dimension_semantics=("parallel",),
            vmem_limit_bytes=vmem_limit),
    )(vals_up, idx_up, skip_r, tap_mask, w1f, b1c, w2f, b2c, w3f, b3c, a)

    return out.reshape(Np, F, H, W)[:N]


# ---------------- pure-JAX reference (for silent correctness check) ----------------
def _reference_forward(x_pool, indices, skip, w1, b1, w2, b2, w3, b3, prelu_a):
    N, Cc, Hp, Wp = x_pool.shape
    _, Cs, H, W = skip.shape
    P = H * W

    def unpool_one(v, i):
        return jnp.zeros((P,), v.dtype).at[i].set(v)

    unpool = jax.vmap(unpool_one)(x_pool.reshape(N * Cc, -1),
                                  indices.reshape(N * Cc, -1)).reshape(N, Cc, H, W)
    x = jnp.concatenate([skip, unpool], axis=1)

    def inorm(t):
        m = jnp.mean(t, axis=(2, 3), keepdims=True)
        v = jnp.mean((t - m) ** 2, axis=(2, 3), keepdims=True)
        return (t - m) / jnp.sqrt(v + EPS)

    def prelu(t):
        return jnp.where(t >= 0, t, prelu_a[0] * t)

    def conv(t, w, b, pad):
        y = lax.conv_general_dilated(t, w, (1, 1), [(pad, pad), (pad, pad)],
                                     dimension_numbers=('NCHW', 'OIHW', 'NCHW'),
                                     precision=lax.Precision.HIGHEST)
        return y + b.reshape(1, -1, 1, 1)

    o3 = conv(prelu(inorm(x)), w1, b1, 2)
    o4 = jnp.concatenate([x, o3], axis=1)
    o7 = conv(prelu(inorm(o4)), w2, b2, 2)
    o8 = jnp.concatenate([x, o3, o7], axis=1)
    return conv(prelu(inorm(o8)), w3, b3, 0)


if __name__ == "__main__":
    # Small shapes consistent with the module:
    # pooled decoder input (N, Cc, Hp, Wp); skip connection (N, Cs, 2*Hp, 2*Wp)
    # params: num_channels = Cc + Cs = 8, num_filters = 8, kernel 5x5, pool 2/2
    N, Cc, Hp, Wp = 2, 4, 8, 8
    Cs, F = 4, 8
    H, W = 2 * Hp, 2 * Wp

    key = jax.random.PRNGKey(0)
    ks = jax.random.split(key, 12)

    x_pool = jax.random.normal(ks[0], (N, Cc, Hp, Wp), jnp.float32)
    skip = jax.random.normal(ks[1], (N, Cs, H, W), jnp.float32)

    # MaxPool2d(2,2)-style indices: flat index into (H*W), one per 2x2 window
    r = jax.random.randint(ks[2], (N, Cc, Hp, Wp), 0, 2)
    c = jax.random.randint(ks[3], (N, Cc, Hp, Wp), 0, 2)
    ii = jnp.arange(Hp).reshape(1, 1, Hp, 1)
    jj = jnp.arange(Wp).reshape(1, 1, 1, Wp)
    indices = ((2 * ii + r) * W + (2 * jj + c)).astype(jnp.int32)

    # Deterministic parameter init (shapes from DenseBlock.__init__)
    C0, C1, C2 = Cc + Cs, Cc + Cs + F, Cc + Cs + 2 * F
    w1 = 0.1 * jax.random.normal(ks[4], (F, C0, 5, 5), jnp.float32)
    b1 = 0.1 * jax.random.normal(ks[5], (F,), jnp.float32)
    w2 = 0.1 * jax.random.normal(ks[6], (F, C1, 5, 5), jnp.float32)
    b2 = 0.1 * jax.random.normal(ks[7], (F,), jnp.float32)
    w3 = 0.1 * jax.random.normal(ks[8], (F, C2, 1, 1), jnp.float32)
    b3 = 0.1 * jax.random.normal(ks[9], (F,), jnp.float32)
    prelu_a = jnp.array([0.25], jnp.float32)   # PyTorch PReLU default init
    # (the PyTorch module shares a single nn.PReLU across all three activations)

    out = decoder_block_forward(x_pool, indices, skip,
                                w1, b1, w2, b2, w3, b3, prelu_a)
    out = jax.block_until_ready(out)
    assert out.shape == (N, F, H, W)

    ref = _reference_forward(x_pool, indices, skip, w1, b1, w2, b2, w3, b3, prelu_a)
    err = float(jnp.max(jnp.abs(out - ref)))
    if err > 5e-2:
        raise SystemExit(f"mismatch vs reference: max abs err = {err}")

    print("KERNEL_OK")
</pallas_src>

<mosaic_0001>
module attributes {stable_mosaic.version = 11 : i64} {
  func.func @kernel(%arg0: i32, %arg1: memref<1x1x4x256xf32, #tpu.memory_space<vmem>>, %arg2: memref<1x1x4x256xi32, #tpu.memory_space<vmem>>, %arg3: memref<1x1x4x256xf32, #tpu.memory_space<vmem>>, %arg4: memref<25x256xf32, #tpu.memory_space<vmem>>, %arg5: memref<8x200xbf16, #tpu.memory_space<vmem>>, %arg6: memref<8x1xf32, #tpu.memory_space<vmem>>, %arg7: memref<8x400xbf16, #tpu.memory_space<vmem>>, %arg8: memref<8x1xf32, #tpu.memory_space<vmem>>, %arg9: memref<8x24xf32, #tpu.memory_space<vmem>>, %arg10: memref<8x1xf32, #tpu.memory_space<vmem>>, %arg11: memref<1xf32, #tpu.memory_space<smem>>, %arg12: memref<1x1x8x256xf32, #tpu.memory_space<vmem>>, %arg13: memref<24x256xf32, #tpu.memory_space<vmem>>, %arg14: memref<400x256xbf16, #tpu.memory_space<vmem>>) attributes {dimension_semantics = [#tpu.dimension_semantics<parallel>], iteration_bounds = array<i64: 2>, scalar_prefetch = 0 : i64, scratch_operands = 2 : i64, tpu.core_type = #tpu.core_type<tc>, window_params = [{transform_indices = @transform_0, window_bounds = array<i64: 1, 1, 4, 256>}, {transform_indices = @transform_1, window_bounds = array<i64: 1, 1, 4, 256>}, {transform_indices = @transform_2, window_bounds = array<i64: 1, 1, 4, 256>}, {pipeline_mode = #tpu.pipeline_mode<synchronous>, transform_indices = @transform_3, window_bounds = array<i64: 25, 256>}, {pipeline_mode = #tpu.pipeline_mode<synchronous>, transform_indices = @transform_4, window_bounds = array<i64: 8, 200>}, {pipeline_mode = #tpu.pipeline_mode<synchronous>, transform_indices = @transform_5, window_bounds = array<i64: 8, 1>}, {pipeline_mode = #tpu.pipeline_mode<synchronous>, transform_indices = @transform_6, window_bounds = array<i64: 8, 400>}, {pipeline_mode = #tpu.pipeline_mode<synchronous>, transform_indices = @transform_7, window_bounds = array<i64: 8, 1>}, {pipeline_mode = #tpu.pipeline_mode<synchronous>, transform_indices = @transform_8, window_bounds = array<i64: 8, 24>}, {pipeline_mode = #tpu.pipeline_mode<synchronous>, transform_indices = @transform_9, window_bounds = array<i64: 8, 1>}, {transform_indices = @transform_10, window_bounds = array<i64: 1>}, {transform_indices = @transform_11, window_bounds = array<i64: 1, 1, 8, 256>}]} {
    %c0 = arith.constant 0 : index
    %0 = memref.load %arg11[%c0] : memref<1xf32, #tpu.memory_space<smem>>
    %c0_0 = arith.constant 0 : index
    %c0_1 = arith.constant 0 : index
    %1 = vector.load %arg4[%c0_0, %c0_1] : memref<25x256xf32, #tpu.memory_space<vmem>>, vector<25x256xf32>
    %2 = tpu.iota {dimensions = array<i32: 1>} : vector<4x256xi32>
    %c0_2 = arith.constant 0 : index
    %c0_3 = arith.constant 0 : index
    %3 = vector.load %arg5[%c0_2, %c0_3] : memref<8x200xbf16, #tpu.memory_space<vmem>>, vector<8x200xbf16>
    %c0_4 = arith.constant 0 : index
    %c0_5 = arith.constant 0 : index
    %4 = vector.load %arg6[%c0_4, %c0_5] : memref<8x1xf32, #tpu.memory_space<vmem>>, vector<8x1xf32>
    %c0_6 = arith.constant 0 : index
    %c0_7 = arith.constant 0 : index
    %5 = vector.load %arg7[%c0_6, %c0_7] : memref<8x400xbf16, #tpu.memory_space<vmem>>, vector<8x400xbf16>
    %c0_8 = arith.constant 0 : index
    %c0_9 = arith.constant 0 : index
    %6 = vector.load %arg8[%c0_8, %c0_9] : memref<8x1xf32, #tpu.memory_space<vmem>>, vector<8x1xf32>
    %c0_10 = arith.constant 0 : index
    %c0_11 = arith.constant 0 : index
    %7 = vector.load %arg9[%c0_10, %c0_11] : memref<8x24xf32, #tpu.memory_space<vmem>>, vector<8x24xf32>
    %c0_12 = arith.constant 0 : index
    %c0_13 = arith.constant 0 : index
    %8 = vector.load %arg10[%c0_12, %c0_13] : memref<8x1xf32, #tpu.memory_space<vmem>>, vector<8x1xf32>
    %c0_14 = arith.constant 0 : index
    %c0_15 = arith.constant 0 : index
    %c0_16 = arith.constant 0 : index
    %c0_17 = arith.constant 0 : index
    %9 = vector.load %arg2[%c0_14, %c0_15, %c0_16, %c0_17] : memref<1x1x4x256xi32, #tpu.memory_space<vmem>>, vector<1x1x4x256xi32>
    %10 = vector.shape_cast %9 : vector<1x1x4x256xi32> to vector<4x256xi32>
    %11 = arith.cmpi eq, %10, %2 : vector<4x256xi32>
    %c0_18 = arith.constant 0 : index
    %c0_19 = arith.constant 0 : index
    %c0_20 = arith.constant 0 : index
    %c0_21 = arith.constant 0 : index
    %12 = vector.load %arg1[%c0_18, %c0_19, %c0_20, %c0_21] : memref<1x1x4x256xf32, #tpu.memory_space<vmem>>, vector<1x1x4x256xf32>
    %13 = vector.shape_cast %12 : vector<1x1x4x256xf32> to vector<4x256xf32>
    %cst = arith.constant 0.000000e+00 : f32
    %14 = vector.broadcast %cst : f32 to vector<4x256xf32>
    %15 = arith.select %11, %13, %14 : vector<4x256xi1>, vector<4x256xf32>
    %c0_22 = arith.constant 0 : index
    %c0_23 = arith.constant 0 : index
    %c0_24 = arith.constant 0 : index
    %c0_25 = arith.constant 0 : index
    %16 = vector.load %arg3[%c0_22, %c0_23, %c0_24, %c0_25] : memref<1x1x4x256xf32, #tpu.memory_space<vmem>>, vector<1x1x4x256xf32>
    %17 = vector.shape_cast %16 : vector<1x1x4x256xf32> to vector<4x256xf32>
    %cst_26 = arith.constant dense<0.000000e+00> : vector<4xf32>
    %18 = vector.multi_reduction <add>, %17, %cst_26 [1] : vector<4x256xf32> to vector<4xf32>
    %19 = vector.shape_cast %18 : vector<4xf32> to vector<4x1xf32>
    %20 = arith.mulf %17, %17 : vector<4x256xf32>
    %cst_27 = arith.constant dense<0.000000e+00> : vector<4xf32>
    %21 = vector.multi_reduction <add>, %20, %cst_27 [1] : vector<4x256xf32> to vector<4xf32>
    %22 = vector.shape_cast %21 : vector<4xf32> to vector<4x1xf32>
    %cst_28 = arith.constant 3.906250e-03 : f32
    %23 = vector.broadcast %cst_28 : f32 to vector<4x1xf32>
    %24 = arith.mulf %19, %23 : vector<4x1xf32>
    %cst_29 = arith.constant 3.906250e-03 : f32
    %25 = vector.broadcast %cst_29 : f32 to vector<4x1xf32>
    %26 = arith.mulf %22, %25 : vector<4x1xf32>
    %27 = arith.mulf %24, %24 : vector<4x1xf32>
    %28 = arith.subf %26, %27 : vector<4x1xf32>
    %29 = vector.broadcast %24 : vector<4x1xf32> to vector<4x256xf32>
    %30 = arith.subf %17, %29 : vector<4x256xf32>
    %cst_30 = arith.constant 9.99999974E-6 : f32
    %31 = vector.broadcast %cst_30 : f32 to vector<4x1xf32>
    %32 = arith.addf %28, %31 : vector<4x1xf32>
    %33 = math.rsqrt %32 : vector<4x1xf32>
    %34 = vector.broadcast %33 : vector<4x1xf32> to vector<4x256xf32>
    %35 = arith.mulf %30, %34 : vector<4x256xf32>
    %cst_31 = arith.constant 0.000000e+00 : f32
    %36 = vector.broadcast %cst_31 : f32 to vector<4x256xf32>
    %37 = arith.cmpf oge, %35, %36 : vector<4x256xf32>
    %38 = vector.broadcast %0 : f32 to vector<4x256xf32>
    %39 = arith.mulf %38, %35 : vector<4x256xf32>
    %40 = arith.select %37, %35, %39 : vector<4x256xi1>, vector<4x256xf32>
    %c0_32 = arith.constant 0 : index
    %c0_33 = arith.constant 0 : index
    %41 = vector.load %arg13[%c0_32, %c0_33] : memref<24x256xf32, #tpu.memory_space<vmem>>, vector<4x256xf32>
    tpu.vector_store %arg13[%c0_32, %c0_33], %40 {strides = array<i32>} : memref<24x256xf32, #tpu.memory_space<vmem>>, vector<4x256xf32>,
    %cst_34 = arith.constant dense<0.000000e+00> : vector<4xf32>
    %42 = vector.multi_reduction <add>, %15, %cst_34 [1] : vector<4x256xf32> to vector<4xf32>
    %43 = vector.shape_cast %42 : vector<4xf32> to vector<4x1xf32>
    %44 = arith.mulf %15, %15 : vector<4x256xf32>
    %cst_35 = arith.constant dense<0.000000e+00> : vector<4xf32>
    %45 = vector.multi_reduction <add>, %44, %cst_35 [1] : vector<4x256xf32> to vector<4xf32>
    %46 = vector.shape_cast %45 : vector<4xf32> to vector<4x1xf32>
    %cst_36 = arith.constant 3.906250e-03 : f32
    %47 = vector.broadcast %cst_36 : f32 to vector<4x1xf32>
    %48 = arith.mulf %43, %47 : vector<4x1xf32>
    %cst_37 = arith.constant 3.906250e-03 : f32
    %49 = vector.broadcast %cst_37 : f32 to vector<4x1xf32>
    %50 = arith.mulf %46, %49 : vector<4x1xf32>
    %51 = arith.mulf %48, %48 : vector<4x1xf32>
    %52 = arith.subf %50, %51 : vector<4x1xf32>
    %53 = vector.broadcast %48 : vector<4x1xf32> to vector<4x256xf32>
    %54 = arith.subf %15, %53 : vector<4x256xf32>
    %cst_38 = arith.constant 9.99999974E-6 : f32
    %55 = vector.broadcast %cst_38 : f32 to vector<4x1xf32>
    %56 = arith.addf %52, %55 : vector<4x1xf32>
    %57 = math.rsqrt %56 : vector<4x1xf32>
    %58 = vector.broadcast %57 : vector<4x1xf32> to vector<4x256xf32>
    %59 = arith.mulf %54, %58 : vector<4x256xf32>
    %cst_39 = arith.constant 0.000000e+00 : f32
    %60 = vector.broadcast %cst_39 : f32 to vector<4x256xf32>
    %61 = arith.cmpf oge, %59, %60 : vector<4x256xf32>
    %62 = vector.broadcast %0 : f32 to vector<4x256xf32>
    %63 = arith.mulf %62, %59 : vector<4x256xf32>
    %64 = arith.select %61, %59, %63 : vector<4x256xi1>, vector<4x256xf32>
    %c4 = arith.constant 4 : index
    %c0_40 = arith.constant 0 : index
    %65 = vector.load %arg13[%c4, %c0_40] : memref<24x256xf32, #tpu.memory_space<vmem>>, vector<4x256xf32>
    tpu.vector_store %arg13[%c4, %c0_40], %64 {strides = array<i32>} : memref<24x256xf32, #tpu.memory_space<vmem>>, vector<4x256xf32>,
    %c0_41 = arith.constant 0 : index
    %c0_42 = arith.constant 0 : index
    %66 = vector.load %arg13[%c0_41, %c0_42] : memref<24x256xf32, #tpu.memory_space<vmem>>, vector<8x256xf32>
    %c34_i32 = arith.constant 34 : i32
    %67 = tpu.dynamic_rotate %66 by %c34_i32 dim 1 : vector<8x256xf32>, i32 -> vector<8x256xf32>
    %68 = vector.extract_strided_slice %1 {offsets = [0, 0], sizes = [1, 256], strides = [1, 1]} : vector<25x256xf32> to vector<1x256xf32>
    %69 = vector.broadcast %68 : vector<1x256xf32> to vector<8x256xf32>
    %70 = arith.mulf %67, %69 : vector<8x256xf32>
    %71 = arith.truncf %70 : vector<8x256xf32> to vector<8x256xbf16>
    %c0_43 = arith.constant 0 : index
    %c0_44 = arith.constant 0 : index
    %72 = vector.load %arg14[%c0_43, %c0_44] : memref<400x256xbf16, #tpu.memory_space<vmem>>, vector<8x256xbf16>
    tpu.vector_store %arg14[%c0_43, %c0_44], %71 {strides = array<i32>} : memref<400x256xbf16, #tpu.memory_space<vmem>>, vector<8x256xbf16>,
    %c33_i32 = arith.constant 33 : i32
    %73 = tpu.dynamic_rotate %66 by %c33_i32 dim 1 : vector<8x256xf32>, i32 -> vector<8x256xf32>
    %74 = vector.extract_strided_slice %1 {offsets = [1, 0], sizes = [1, 256], strides = [1, 1]} : vector<25x256xf32> to vector<1x256xf32>
    %75 = vector.broadcast %74 : vector<1x256xf32> to vector<8x256xf32>
    %76 = arith.mulf %73, %75 : vector<8x256xf32>
    %77 = arith.truncf %76 : vector<8x256xf32> to vector<8x256xbf16>
    %c8 = arith.constant 8 : index
    %c0_45 = arith.constant 0 : index
    %78 = vector.load %arg14[%c8, %c0_45] : memref<400x256xbf16, #tpu.memory_space<vmem>>, vector<8x256xbf16>
    tpu.vector_store %arg14[%c8, %c0_45], %77 {strides = array<i32>} : memref<400x256xbf16, #tpu.memory_space<vmem>>, vector<8x256xbf16>,
    %c32_i32 = arith.constant 32 : i32
    %79 = tpu.dynamic_rotate %66 by %c32_i32 dim 1 : vector<8x256xf32>, i32 -> vector<8x256xf32>
    %80 = vector.extract_strided_slice %1 {offsets = [2, 0], sizes = [1, 256], strides = [1, 1]} : vector<25x256xf32> to vector<1x256xf32>
    %81 = vector.broadcast %80 : vector<1x256xf32> to vector<8x256xf32>
    %82 = arith.mulf %79, %81 : vector<8x256xf32>
    %83 = arith.truncf %82 : vector<8x256xf32> to vector<8x256xbf16>
    %c16 = arith.constant 16 : index
    %c0_46 = arith.constant 0 : index
    %84 = vector.load %arg14[%c16, %c0_46] : memref<400x256xbf16, #tpu.memory_space<vmem>>, vector<8x256xbf16>
    tpu.vector_store %arg14[%c16, %c0_46], %83 {strides = array<i32>} : memref<400x256xbf16, #tpu.memory_space<vmem>>, vector<8x256xbf16>,
    %c31_i32 = arith.constant 31 : i32
    %85 = tpu.dynamic_rotate %66 by %c31_i32 dim 1 : vector<8x256xf32>, i32 -> vector<8x256xf32>
    %86 = vector.extract_strided_slice %1 {offsets = [3, 0], sizes = [1, 256], strides = [1, 1]} : vector<25x256xf32> to vector<1x256xf32>
    %87 = vector.broadcast %86 : vector<1x256xf32> to vector<8x256xf32>
    %88 = arith.mulf %85, %87 : vector<8x256xf32>
    %89 = arith.truncf %88 : vector<8x256xf32> to vector<8x256xbf16>
    %c24 = arith.constant 24 : index
    %c0_47 = arith.constant 0 : index
    %90 = vector.load %arg14[%c24, %c0_47] : memref<400x256xbf16, #tpu.memory_space<vmem>>, vector<8x256xbf16>
    tpu.vector_store %arg14[%c24, %c0_47], %89 {strides = array<i32>} : memref<400x256xbf16, #tpu.memory_space<vmem>>, vector<8x256xbf16>,
    %c30_i32 = arith.constant 30 : i32
    %91 = tpu.dynamic_rotate %66 by %c30_i32 dim 1 : vector<8x256xf32>, i32 -> vector<8x256xf32>
    %92 = vector.extract_strided_slice %1 {offsets = [4, 0], sizes = [1, 256], strides = [1, 1]} : vector<25x256xf32> to vector<1x256xf32>
    %93 = vector.broadcast %92 : vector<1x256xf32> to vector<8x256xf32>
    %94 = arith.mulf %91, %93 : vector<8x256xf32>
    %95 = arith.truncf %94 : vector<8x256xf32> to vector<8x256xbf16>
    %c32 = arith.constant 32 : index
    %c0_48 = arith.constant 0 : index
    %96 = vector.load %arg14[%c32, %c0_48] : memref<400x256xbf16, #tpu.memory_space<vmem>>, vector<8x256xbf16>
    tpu.vector_store %arg14[%c32, %c0_48], %95 {strides = array<i32>} : memref<400x256xbf16, #tpu.memory_space<vmem>>, vector<8x256xbf16>,
    %c18_i32 = arith.constant 18 : i32
    %97 = tpu.dynamic_rotate %66 by %c18_i32 dim 1 : vector<8x256xf32>, i32 -> vector<8x256xf32>
    %98 = vector.extract_strided_slice %1 {offsets = [5, 0], sizes = [1, 256], strides = [1, 1]} : vector<25x256xf32> to vector<1x256xf32>
    %99 = vector.broadcast %98 : vector<1x256xf32> to vector<8x256xf32>
    %100 = arith.mulf %97, %99 : vector<8x256xf32>
    %101 = arith.truncf %100 : vector<8x256xf32> to vector<8x256xbf16>
    %c40 = arith.constant 40 : index
    %c0_49 = arith.constant 0 : index
    %102 = vector.load %arg14[%c40, %c0_49] : memref<400x256xbf16, #tpu.memory_space<vmem>>, vector<8x256xbf16>
    tpu.vector_store %arg14[%c40, %c0_49], %101 {strides = array<i32>} : memref<400x256xbf16, #tpu.memory_space<vmem>>, vector<8x256xbf16>,
    %c17_i32 = arith.constant 17 : i32
    %103 = tpu.dynamic_rotate %66 by %c17_i32 dim 1 : vector<8x256xf32>, i32 -> vector<8x256xf32>
    %104 = vector.extract_strided_slice %1 {offsets = [6, 0], sizes = [1, 256], strides = [1, 1]} : vector<25x256xf32> to vector<1x256xf32>
    %105 = vector.broadcast %104 : vector<1x256xf32> to vector<8x256xf32>
    %106 = arith.mulf %103, %105 : vector<8x256xf32>
    %107 = arith.truncf %106 : vector<8x256xf32> to vector<8x256xbf16>
    %c48 = arith.constant 48 : index
    %c0_50 = arith.constant 0 : index
    %108 = vector.load %arg14[%c48, %c0_50] : memref<400x256xbf16, #tpu.memory_space<vmem>>, vector<8x256xbf16>
    tpu.vector_store %arg14[%c48, %c0_50], %107 {strides = array<i32>} : memref<400x256xbf16, #tpu.memory_space<vmem>>, vector<8x256xbf16>,
    %c16_i32 = arith.constant 16 : i32
    %109 = tpu.dynamic_rotate %66 by %c16_i32 dim 1 : vector<8x256xf32>, i32 -> vector<8x256xf32>
    %110 = vector.extract_strided_slice %1 {offsets = [7, 0], sizes = [1, 256], strides = [1, 1]} : vector<25x256xf32> to vector<1x256xf32>
    %111 = vector.broadcast %110 : vector<1x256xf32> to vector<8x256xf32>
    %112 = arith.mulf %109, %111 : vector<8x256xf32>
    %113 = arith.truncf %112 : vector<8x256xf32> to vector<8x256xbf16>
    %c56 = arith.constant 56 : index
    %c0_51 = arith.constant 0 : index
    %114 = vector.load %arg14[%c56, %c0_51] : memref<400x256xbf16, #tpu.memory_space<vmem>>, vector<8x256xbf16>
    tpu.vector_store %arg14[%c56, %c0_51], %113 {strides = array<i32>} : memref<400x256xbf16, #tpu.memory_space<vmem>>, vector<8x256xbf16>,
    %c15_i32 = arith.constant 15 : i32
    %115 = tpu.dynamic_rotate %66 by %c15_i32 dim 1 : vector<8x256xf32>, i32 -> vector<8x256xf32>
    %116 = vector.extract_strided_slice %1 {offsets = [8, 0], sizes = [1, 256], strides = [1, 1]} : vector<25x256xf32> to vector<1x256xf32>
    %117 = vector.broadcast %116 : vector<1x256xf32> to vector<8x256xf32>
    %118 = arith.mulf %115, %117 : vector<8x256xf32>
    %119 = arith.truncf %118 : vector<8x256xf32> to vector<8x256xbf16>
    %c64 = arith.constant 64 : index
    %c0_52 = arith.constant 0 : index
    %120 = vector.load %arg14[%c64, %c0_52] : memref<400x256xbf16, #tpu.memory_space<vmem>>, vector<8x256xbf16>
    tpu.vector_store %arg14[%c64, %c0_52], %119 {strides = array<i32>} : memref<400x256xbf16, #tpu.memory_space<vmem>>, vector<8x256xbf16>,
    %c14_i32 = arith.constant 14 : i32
    %121 = tpu.dynamic_rotate %66 by %c14_i32 dim 1 : vector<8x256xf32>, i32 -> vector<8x256xf32>
    %122 = vector.extract_strided_slice %1 {offsets = [9, 0], sizes = [1, 256], strides = [1, 1]} : vector<25x256xf32> to vector<1x256xf32>
    %123 = vector.broadcast %122 : vector<1x256xf32> to vector<8x256xf32>
    %124 = arith.mulf %121, %123 : vector<8x256xf32>
    %125 = arith.truncf %124 : vector<8x256xf32> to vector<8x256xbf16>
    %c72 = arith.constant 72 : index
    %c0_53 = arith.constant 0 : index
    %126 = vector.load %arg14[%c72, %c0_53] : memref<400x256xbf16, #tpu.memory_space<vmem>>, vector<8x256xbf16>
    tpu.vector_store %arg14[%c72, %c0_53], %125 {strides = array<i32>} : memref<400x256xbf16, #tpu.memory_space<vmem>>, vector<8x256xbf16>,
    %c2_i32 = arith.constant 2 : i32
    %127 = tpu.dynamic_rotate %66 by %c2_i32 dim 1 : vector<8x256xf32>, i32 -> vector<8x256xf32>
    %128 = vector.extract_strided_slice %1 {offsets = [10, 0], sizes = [1, 256], strides = [1, 1]} : vector<25x256xf32> to vector<1x256xf32>
    %129 = vector.broadcast %128 : vector<1x256xf32> to vector<8x256xf32>
    %130 = arith.mulf %127, %129 : vector<8x256xf32>
    %131 = arith.truncf %130 : vector<8x256xf32> to vector<8x256xbf16>
    %c80 = arith.constant 80 : index
    %c0_54 = arith.constant 0 : index
    %132 = vector.load %arg14[%c80, %c0_54] : memref<400x256xbf16, #tpu.memory_space<vmem>>, vector<8x256xbf16>
    tpu.vector_store %arg14[%c80, %c0_54], %131 {strides = array<i32>} : memref<400x256xbf16, #tpu.memory_space<vmem>>, vector<8x256xbf16>,
    %c1_i32 = arith.constant 1 : i32
    %133 = tpu.dynamic_rotate %66 by %c1_i32 dim 1 : vector<8x256xf32>, i32 -> vector<8x256xf32>
    %134 = vector.extract_strided_slice %1 {offsets = [11, 0], sizes = [1, 256], strides = [1, 1]} : vector<25x256xf32> to vector<1x256xf32>
    %135 = vector.broadcast %134 : vector<1x256xf32> to vector<8x256xf32>
    %136 = arith.mulf %133, %135 : vector<8x256xf32>
    %137 = arith.truncf %136 : vector<8x256xf32> to vector<8x256xbf16>
    %c88 = arith.constant 88 : index
    %c0_55 = arith.constant 0 : index
    %138 = vector.load %arg14[%c88, %c0_55] : memref<400x256xbf16, #tpu.memory_space<vmem>>, vector<8x256xbf16>
    tpu.vector_store %arg14[%c88, %c0_55], %137 {strides = array<i32>} : memref<400x256xbf16, #tpu.memory_space<vmem>>, vector<8x256xbf16>,
    %139 = vector.extract_strided_slice %1 {offsets = [12, 0], sizes = [1, 256], strides = [1, 1]} : vector<25x256xf32> to vector<1x256xf32>
    %140 = vector.broadcast %139 : vector<1x256xf32> to vector<8x256xf32>
    %141 = arith.mulf %66, %140 : vector<8x256xf32>
    %142 = arith.truncf %141 : vector<8x256xf32> to vector<8x256xbf16>
    %c96 = arith.constant 96 : index
    %c0_56 = arith.constant 0 : index
    %143 = vector.load %arg14[%c96, %c0_56] : memref<400x256xbf16, #tpu.memory_space<vmem>>, vector<8x256xbf16>
    tpu.vector_store %arg14[%c96, %c0_56], %142 {strides = array<i32>} : memref<400x256xbf16, #tpu.memory_space<vmem>>, vector<8x256xbf16>,
    %c255_i32 = arith.constant 255 : i32
    %144 = tpu.dynamic_rotate %66 by %c255_i32 dim 1 : vector<8x256xf32>, i32 -> vector<8x256xf32>
    %145 = vector.extract_strided_slice %1 {offsets = [13, 0], sizes = [1, 256], strides = [1, 1]} : vector<25x256xf32> to vector<1x256xf32>
    %146 = vector.broadcast %145 : vector<1x256xf32> to vector<8x256xf32>
    %147 = arith.mulf %144, %146 : vector<8x256xf32>
    %148 = arith.truncf %147 : vector<8x256xf32> to vector<8x256xbf16>
    %c104 = arith.constant 104 : index
    %c0_57 = arith.constant 0 : index
    %149 = vector.load %arg14[%c104, %c0_57] : memref<400x256xbf16, #tpu.memory_space<vmem>>, vector<8x256xbf16>
    tpu.vector_store %arg14[%c104, %c0_57], %148 {strides = array<i32>} : memref<400x256xbf16, #tpu.memory_space<vmem>>, vector<8x256xbf16>,
    %c254_i32 = arith.constant 254 : i32
    %150 = tpu.dynamic_rotate %66 by %c254_i32 dim 1 : vector<8x256xf32>, i32 -> vector<8x256xf32>
    %151 = vector.extract_strided_slice %1 {offsets = [14, 0], sizes = [1, 256], strides = [1, 1]} : vector<25x256xf32> to vector<1x256xf32>
    %152 = vector.broadcast %151 : vector<1x256xf32> to vector<8x256xf32>
    %153 = arith.mulf %150, %152 : vector<8x256xf32>
    %154 = arith.truncf %153 : vector<8x256xf32> to vector<8x256xbf16>
    %c112 = arith.constant 112 : index
    %c0_58 = arith.constant 0 : index
    %155 = vector.load %arg14[%c112, %c0_58] : memref<400x256xbf16, #tpu.memory_space<vmem>>, vector<8x256xbf16>
    tpu.vector_store %arg14[%c112, %c0_58], %154 {strides = array<i32>} : memref<400x256xbf16, #tpu.memory_space<vmem>>, vector<8x256xbf16>,
    %c242_i32 = arith.constant 242 : i32
    %156 = tpu.dynamic_rotate %66 by %c242_i32 dim 1 : vector<8x256xf32>, i32 -> vector<8x256xf32>
    %157 = vector.extract_strided_slice %1 {offsets = [15, 0], sizes = [1, 256], strides = [1, 1]} : vector<25x256xf32> to vector<1x256xf32>
    %158 = vector.broadcast %157 : vector<1x256xf32> to vector<8x256xf32>
    %159 = arith.mulf %156, %158 : vector<8x256xf32>
    %160 = arith.truncf %159 : vector<8x256xf32> to vector<8x256xbf16>
    %c120 = arith.constant 120 : index
    %c0_59 = arith.constant 0 : index
    %161 = vector.load %arg14[%c120, %c0_59] : memref<400x256xbf16, #tpu.memory_space<vmem>>, vector<8x256xbf16>
    tpu.vector_store %arg14[%c120, %c0_59], %160 {strides = array<i32>} : memref<400x256xbf16, #tpu.memory_space<vmem>>, vector<8x256xbf16>,
    %c241_i32 = arith.constant 241 : i32
    %162 = tpu.dynamic_rotate %66 by %c241_i32 dim 1 : vector<8x256xf32>, i32 -> vector<8x256xf32>
    %163 = vector.extract_strided_slice %1 {offsets = [16, 0], sizes = [1, 256], strides = [1, 1]} : vector<25x256xf32> to vector<1x256xf32>
    %164 = vector.broadcast %163 : vector<1x256xf32> to vector<8x256xf32>
    %165 = arith.mulf %162, %164 : vector<8x256xf32>
    %166 = arith.truncf %165 : vector<8x256xf32> to vector<8x256xbf16>
    %c128 = arith.constant 128 : index
    %c0_60 = arith.constant 0 : index
    %167 = vector.load %arg14[%c128, %c0_60] : memref<400x256xbf16, #tpu.memory_space<vmem>>, vector<8x256xbf16>
    tpu.vector_store %arg14[%c128, %c0_60], %166 {strides = array<i32>} : memref<400x256xbf16, #tpu.memory_space<vmem>>, vector<8x256xbf16>,
    %c240_i32 = arith.constant 240 : i32
    %168 = tpu.dynamic_rotate %66 by %c240_i32 dim 1 : vector<8x256xf32>, i32 -> vector<8x256xf32>
    %169 = vector.extract_strided_slice %1 {offsets = [17, 0], sizes = [1, 256], strides = [1, 1]} : vector<25x256xf32> to vector<1x256xf32>
    %170 = vector.broadcast %169 : vector<1x256xf32> to vector<8x256xf32>
    %171 = arith.mulf %168, %170 : vector<8x256xf32>
    %172 = arith.truncf %171 : vector<8x256xf32> to vector<8x256xbf16>
    %c136 = arith.constant 136 : index
    %c0_61 = arith.constant 0 : index
    %173 = vector.load %arg14[%c136, %c0_61] : memref<400x256xbf16, #tpu.memory_space<vmem>>, vector<8x256xbf16>
    tpu.vector_store %arg14[%c136, %c0_61], %172 {strides = array<i32>} : memref<400x256xbf16, #tpu.memory_space<vmem>>, vector<8x256xbf16>,
    %c239_i32 = arith.constant 239 : i32
    %174 = tpu.dynamic_rotate %66 by %c239_i32 dim 1 : vector<8x256xf32>, i32 -> vector<8x256xf32>
    %175 = vector.extract_strided_slice %1 {offsets = [18, 0], sizes = [1, 256], strides = [1, 1]} : vector<25x256xf32> to vector<1x256xf32>
    %176 = vector.broadcast %175 : vector<1x256xf32> to vector<8x256xf32>
    %177 = arith.mulf %174, %176 : vector<8x256xf32>
    %178 = arith.truncf %177 : vector<8x256xf32> to vector<8x256xbf16>
    %c144 = arith.constant 144 : index
    %c0_62 = arith.constant 0 : index
    %179 = vector.load %arg14[%c144, %c0_62] : memref<400x256xbf16, #tpu.memory_space<vmem>>, vector<8x256xbf16>
    tpu.vector_store %arg14[%c144, %c0_62], %178 {strides = array<i32>} : memref<400x256xbf16, #tpu.memory_space<vmem>>, vector<8x256xbf16>,
    %c238_i32 = arith.constant 238 : i32
    %180 = tpu.dynamic_rotate %66 by %c238_i32 dim 1 : vector<8x256xf32>, i32 -> vector<8x256xf32>
    %181 = vector.extract_strided_slice %1 {offsets = [19, 0], sizes = [1, 256], strides = [1, 1]} : vector<25x256xf32> to vector<1x256xf32>
    %182 = vector.broadcast %181 : vector<1x256xf32> to vector<8x256xf32>
    %183 = arith.mulf %180, %182 : vector<8x256xf32>
    %184 = arith.truncf %183 : vector<8x256xf32> to vector<8x256xbf16>
    %c152 = arith.constant 152 : index
    %c0_63 = arith.constant 0 : index
    %185 = vector.load %arg14[%c152, %c0_63] : memref<400x256xbf16, #tpu.memory_space<vmem>>, vector<8x256xbf16>
    tpu.vector_store %arg14[%c152, %c0_63], %184 {strides = array<i32>} : memref<400x256xbf16, #tpu.memory_space<vmem>>, vector<8x256xbf16>,
    %c226_i32 = arith.constant 226 : i32
    %186 = tpu.dynamic_rotate %66 by %c226_i32 dim 1 : vector<8x256xf32>, i32 -> vector<8x256xf32>
    %187 = vector.extract_strided_slice %1 {offsets = [20, 0], sizes = [1, 256], strides = [1, 1]} : vector<25x256xf32> to vector<1x256xf32>
    %188 = vector.broadcast %187 : vector<1x256xf32> to vector<8x256xf32>
    %189 = arith.mulf %186, %188 : vector<8x256xf32>
    %190 = arith.truncf %189 : vector<8x256xf32> to vector<8x256xbf16>
    %c160 = arith.constant 160 : index
    %c0_64 = arith.constant 0 : index
    %191 = vector.load %arg14[%c160, %c0_64] : memref<400x256xbf16, #tpu.memory_space<vmem>>, vector<8x256xbf16>
    tpu.vector_store %arg14[%c160, %c0_64], %190 {strides = array<i32>} : memref<400x256xbf16, #tpu.memory_space<vmem>>, vector<8x256xbf16>,
    %c225_i32 = arith.constant 225 : i32
    %192 = tpu.dynamic_rotate %66 by %c225_i32 dim 1 : vector<8x256xf32>, i32 -> vector<8x256xf32>
    %193 = vector.extract_strided_slice %1 {offsets = [21, 0], sizes = [1, 256], strides = [1, 1]} : vector<25x256xf32> to vector<1x256xf32>
    %194 = vector.broadcast %193 : vector<1x256xf32> to vector<8x256xf32>
    %195 = arith.mulf %192, %194 : vector<8x256xf32>
    %196 = arith.truncf %195 : vector<8x256xf32> to vector<8x256xbf16>
    %c168 = arith.constant 168 : index
    %c0_65 = arith.constant 0 : index
    %197 = vector.load %arg14[%c168, %c0_65] : memref<400x256xbf16, #tpu.memory_space<vmem>>, vector<8x256xbf16>
    tpu.vector_store %arg14[%c168, %c0_65], %196 {strides = array<i32>} : memref<400x256xbf16, #tpu.memory_space<vmem>>, vector<8x256xbf16>,
    %c224_i32 = arith.constant 224 : i32
    %198 = tpu.dynamic_rotate %66 by %c224_i32 dim 1 : vector<8x256xf32>, i32 -> vector<8x256xf32>
    %199 = vector.extract_strided_slice %1 {offsets = [22, 0], sizes = [1, 256], strides = [1, 1]} : vector<25x256xf32> to vector<1x256xf32>
    %200 = vector.broadcast %199 : vector<1x256xf32> to vector<8x256xf32>
    %201 = arith.mulf %198, %200 : vector<8x256xf32>
    %202 = arith.truncf %201 : vector<8x256xf32> to vector<8x256xbf16>
    %c176 = arith.constant 176 : index
    %c0_66 = arith.constant 0 : index
    %203 = vector.load %arg14[%c176, %c0_66] : memref<400x256xbf16, #tpu.memory_space<vmem>>, vector<8x256xbf16>
    tpu.vector_store %arg14[%c176, %c0_66], %202 {strides = array<i32>} : memref<400x256xbf16, #tpu.memory_space<vmem>>, vector<8x256xbf16>,
    %c223_i32 = arith.constant 223 : i32
    %204 = tpu.dynamic_rotate %66 by %c223_i32 dim 1 : vector<8x256xf32>, i32 -> vector<8x256xf32>
    %205 = vector.extract_strided_slice %1 {offsets = [23, 0], sizes = [1, 256], strides = [1, 1]} : vector<25x256xf32> to vector<1x256xf32>
    %206 = vector.broadcast %205 : vector<1x256xf32> to vector<8x256xf32>
    %207 = arith.mulf %204, %206 : vector<8x256xf32>
    %208 = arith.truncf %207 : vector<8x256xf32> to vector<8x256xbf16>
    %c184 = arith.constant 184 : index
    %c0_67 = arith.constant 0 : index
    %209 = vector.load %arg14[%c184, %c0_67] : memref<400x256xbf16, #tpu.memory_space<vmem>>, vector<8x256xbf16>
    tpu.vector_store %arg14[%c184, %c0_67], %208 {strides = array<i32>} : memref<400x256xbf16, #tpu.memory_space<vmem>>, vector<8x256xbf16>,
    %c222_i32 = arith.constant 222 : i32
    %210 = tpu.dynamic_rotate %66 by %c222_i32 dim 1 : vector<8x256xf32>, i32 -> vector<8x256xf32>
    %211 = vector.extract_strided_slice %1 {offsets = [24, 0], sizes = [1, 256], strides = [1, 1]} : vector<25x256xf32> to vector<1x256xf32>
    %212 = vector.broadcast %211 : vector<1x256xf32> to vector<8x256xf32>
    %213 = arith.mulf %210, %212 : vector<8x256xf32>
    %214 = arith.truncf %213 : vector<8x256xf32> to vector<8x256xbf16>
    %c192 = arith.constant 192 : index
    %c0_68 = arith.constant 0 : index
    %215 = vector.load %arg14[%c192, %c0_68] : memref<400x256xbf16, #tpu.memory_space<vmem>>, vector<8x256xbf16>
    tpu.vector_store %arg14[%c192, %c0_68], %214 {strides = array<i32>} : memref<400x256xbf16, #tpu.memory_space<vmem>>, vector<8x256xbf16>,
    %c0_69 = arith.constant 0 : index
    %c0_70 = arith.constant 0 : index
    %216 = vector.load %arg14[%c0_69, %c0_70] : memref<400x256xbf16, #tpu.memory_space<vmem>>, vector<200x256xbf16>
    %cst_71 = arith.constant dense<0.000000e+00> : vector<8x256xf32>
    %217 = tpu.matmul %3, %216, %cst_71 {dimension_numbers = #tpu.dot_dimension_numbers<[1], [0], [0], [1], [0, 0, 1, 1], [], []>} : vector<8x200xbf16>, vector<200x256xbf16>, vector<8x256xf32> -> vector<8x256xf32>
    %218 = vector.broadcast %4 : vector<8x1xf32> to vector<8x256xf32>
    %219 = arith.addf %217, %218 : vector<8x256xf32>
    %cst_72 = arith.constant dense<0.000000e+00> : vector<8xf32>
    %220 = vector.multi_reduction <add>, %219, %cst_72 [1] : vector<8x256xf32> to vector<8xf32>
    %221 = vector.shape_cast %220 : vector<8xf32> to vector<8x1xf32>
    %222 = arith.mulf %219, %219 : vector<8x256xf32>
    %cst_73 = arith.constant dense<0.000000e+00> : vector<8xf32>
    %223 = vector.multi_reduction <add>, %222, %cst_73 [1] : vector<8x256xf32> to vector<8xf32>
    %224 = vector.shape_cast %223 : vector<8xf32> to vector<8x1xf32>
    %cst_74 = arith.constant 3.906250e-03 : f32
    %225 = vector.broadcast %cst_74 : f32 to vector<8x1xf32>
    %226 = arith.mulf %221, %225 : vector<8x1xf32>
    %cst_75 = arith.constant 3.906250e-03 : f32
    %227 = vector.broadcast %cst_75 : f32 to vector<8x1xf32>
    %228 = arith.mulf %224, %227 : vector<8x1xf32>
    %229 = arith.mulf %226, %226 : vector<8x1xf32>
    %230 = arith.subf %228, %229 : vector<8x1xf32>
    %231 = vector.broadcast %226 : vector<8x1xf32> to vector<8x256xf32>
    %232 = arith.subf %219, %231 : vector<8x256xf32>
    %cst_76 = arith.constant 9.99999974E-6 : f32
    %233 = vector.broadcast %cst_76 : f32 to vector<8x1xf32>
    %234 = arith.addf %230, %233 : vector<8x1xf32>
    %235 = math.rsqrt %234 : vector<8x1xf32>
    %236 = vector.broadcast %235 : vector<8x1xf32> to vector<8x256xf32>
    %237 = arith.mulf %232, %236 : vector<8x256xf32>
    %cst_77 = arith.constant 0.000000e+00 : f32
    %238 = vector.broadcast %cst_77 : f32 to vector<8x256xf32>
    %239 = arith.cmpf oge, %237, %238 : vector<8x256xf32>
    %240 = vector.broadcast %0 : f32 to vector<8x256xf32>
    %241 = arith.mulf %240, %237 : vector<8x256xf32>
    %242 = arith.select %239, %237, %241 : vector<8x256xi1>, vector<8x256xf32>
    %c8_78 = arith.constant 8 : index
    %c0_79 = arith.constant 0 : index
    %243 = vector.load %arg13[%c8_78, %c0_79] : memref<24x256xf32, #tpu.memory_space<vmem>>, vector<8x256xf32>
    tpu.vector_store %arg13[%c8_78, %c0_79], %242 {strides = array<i32>} : memref<24x256xf32, #tpu.memory_space<vmem>>, vector<8x256xf32>,
    %c8_80 = arith.constant 8 : index
    %c0_81 = arith.constant 0 : index
    %244 = vector.load %arg13[%c8_80, %c0_81] : memref<24x256xf32, #tpu.memory_space<vmem>>, vector<8x256xf32>
    %c34_i32_82 = arith.constant 34 : i32
    %245 = tpu.dynamic_rotate %244 by %c34_i32_82 dim 1 : vector<8x256xf32>, i32 -> vector<8x256xf32>
    %246 = vector.extract_strided_slice %1 {offsets = [0, 0], sizes = [1, 256], strides = [1, 1]} : vector<25x256xf32> to vector<1x256xf32>
    %247 = vector.broadcast %246 : vector<1x256xf32> to vector<8x256xf32>
    %248 = arith.mulf %245, %247 : vector<8x256xf32>
    %249 = arith.truncf %248 : vector<8x256xf32> to vector<8x256xbf16>
    %c200 = arith.constant 200 : index
    %c0_83 = arith.constant 0 : index
    %250 = vector.load %arg14[%c200, %c0_83] : memref<400x256xbf16, #tpu.memory_space<vmem>>, vector<8x256xbf16>
    tpu.vector_store %arg14[%c200, %c0_83], %249 {strides = array<i32>} : memref<400x256xbf16, #tpu.memory_space<vmem>>, vector<8x256xbf16>,
    %c33_i32_84 = arith.constant 33 : i32
    %251 = tpu.dynamic_rotate %244 by %c33_i32_84 dim 1 : vector<8x256xf32>, i32 -> vector<8x256xf32>
    %252 = vector.extract_strided_slice %1 {offsets = [1, 0], sizes = [1, 256], strides = [1, 1]} : vector<25x256xf32> to vector<1x256xf32>
    %253 = vector.broadcast %252 : vector<1x256xf32> to vector<8x256xf32>
    %254 = arith.mulf %251, %253 : vector<8x256xf32>
    %255 = arith.truncf %254 : vector<8x256xf32> to vector<8x256xbf16>
    %c208 = arith.constant 208 : index
    %c0_85 = arith.constant 0 : index
    %256 = vector.load %arg14[%c208, %c0_85] : memref<400x256xbf16, #tpu.memory_space<vmem>>, vector<8x256xbf16>
    tpu.vector_store %arg14[%c208, %c0_85], %255 {strides = array<i32>} : memref<400x256xbf16, #tpu.memory_space<vmem>>, vector<8x256xbf16>,
    %c32_i32_86 = arith.constant 32 : i32
    %257 = tpu.dynamic_rotate %244 by %c32_i32_86 dim 1 : vector<8x256xf32>, i32 -> vector<8x256xf32>
    %258 = vector.extract_strided_slice %1 {offsets = [2, 0], sizes = [1, 256], strides = [1, 1]} : vector<25x256xf32> to vector<1x256xf32>
    %259 = vector.broadcast %258 : vector<1x256xf32> to vector<8x256xf32>
    %260 = arith.mulf %257, %259 : vector<8x256xf32>
    %261 = arith.truncf %260 : vector<8x256xf32> to vector<8x256xbf16>
    %c216 = arith.constant 216 : index
    %c0_87 = arith.constant 0 : index
    %262 = vector.load %arg14[%c216, %c0_87] : memref<400x256xbf16, #tpu.memory_space<vmem>>, vector<8x256xbf16>
    tpu.vector_store %arg14[%c216, %c0_87], %261 {strides = array<i32>} : memref<400x256xbf16, #tpu.memory_space<vmem>>, vector<8x256xbf16>,
    %c31_i32_88 = arith.constant 31 : i32
    %263 = tpu.dynamic_rotate %244 by %c31_i32_88 dim 1 : vector<8x256xf32>, i32 -> vector<8x256xf32>
    %264 = vector.extract_strided_slice %1 {offsets = [3, 0], sizes = [1, 256], strides = [1, 1]} : vector<25x256xf32> to vector<1x256xf32>
    %265 = vector.broadcast %264 : vector<1x256xf32> to vector<8x256xf32>
    %266 = arith.mulf %263, %265 : vector<8x256xf32>
    %267 = arith.truncf %266 : vector<8x256xf32> to vector<8x256xbf16>
    %c224 = arith.constant 224 : index
    %c0_89 = arith.constant 0 : index
    %268 = vector.load %arg14[%c224, %c0_89] : memref<400x256xbf16, #tpu.memory_space<vmem>>, vector<8x256xbf16>
    tpu.vector_store %arg14[%c224, %c0_89], %267 {strides = array<i32>} : memref<400x256xbf16, #tpu.memory_space<vmem>>, vector<8x256xbf16>,
    %c30_i32_90 = arith.constant 30 : i32
    %269 = tpu.dynamic_rotate %244 by %c30_i32_90 dim 1 : vector<8x256xf32>, i32 -> vector<8x256xf32>
    %270 = vector.extract_strided_slice %1 {offsets = [4, 0], sizes = [1, 256], strides = [1, 1]} : vector<25x256xf32> to vector<1x256xf32>
    %271 = vector.broadcast %270 : vector<1x256xf32> to vector<8x256xf32>
    %272 = arith.mulf %269, %271 : vector<8x256xf32>
    %273 = arith.truncf %272 : vector<8x256xf32> to vector<8x256xbf16>
    %c232 = arith.constant 232 : index
    %c0_91 = arith.constant 0 : index
    %274 = vector.load %arg14[%c232, %c0_91] : memref<400x256xbf16, #tpu.memory_space<vmem>>, vector<8x256xbf16>
    tpu.vector_store %arg14[%c232, %c0_91], %273 {strides = array<i32>} : memref<400x256xbf16, #tpu.memory_space<vmem>>, vector<8x256xbf16>,
    %c18_i32_92 = arith.constant 18 : i32
    %275 = tpu.dynamic_rotate %244 by %c18_i32_92 dim 1 : vector<8x256xf32>, i32 -> vector<8x256xf32>
    %276 = vector.extract_strided_slice %1 {offsets = [5, 0], sizes = [1, 256], strides = [1, 1]} : vector<25x256xf32> to vector<1x256xf32>
    %277 = vector.broadcast %276 : vector<1x256xf32> to vector<8x256xf32>
    %278 = arith.mulf %275, %277 : vector<8x256xf32>
    %279 = arith.truncf %278 : vector<8x256xf32> to vector<8x256xbf16>
    %c240 = arith.constant 240 : index
    %c0_93 = arith.constant 0 : index
    %280 = vector.load %arg14[%c240, %c0_93] : memref<400x256xbf16, #tpu.memory_space<vmem>>, vector<8x256xbf16>
    tpu.vector_store %arg14[%c240, %c0_93], %279 {strides = array<i32>} : memref<400x256xbf16, #tpu.memory_space<vmem>>, vector<8x256xbf16>,
    %c17_i32_94 = arith.constant 17 : i32
    %281 = tpu.dynamic_rotate %244 by %c17_i32_94 dim 1 : vector<8x256xf32>, i32 -> vector<8x256xf32>
    %282 = vector.extract_strided_slice %1 {offsets = [6, 0], sizes = [1, 256], strides = [1, 1]} : vector<25x256xf32> to vector<1x256xf32>
    %283 = vector.broadcast %282 : vector<1x256xf32> to vector<8x256xf32>
    %284 = arith.mulf %281, %283 : vector<8x256xf32>
    %285 = arith.truncf %284 : vector<8x256xf32> to vector<8x256xbf16>
    %c248 = arith.constant 248 : index
    %c0_95 = arith.constant 0 : index
    %286 = vector.load %arg14[%c248, %c0_95] : memref<400x256xbf16, #tpu.memory_space<vmem>>, vector<8x256xbf16>
    tpu.vector_store %arg14[%c248, %c0_95], %285 {strides = array<i32>} : memref<400x256xbf16, #tpu.memory_space<vmem>>, vector<8x256xbf16>,
    %c16_i32_96 = arith.constant 16 : i32
    %287 = tpu.dynamic_rotate %244 by %c16_i32_96 dim 1 : vector<8x256xf32>, i32 -> vector<8x256xf32>
    %288 = vector.extract_strided_slice %1 {offsets = [7, 0], sizes = [1, 256], strides = [1, 1]} : vector<25x256xf32> to vector<1x256xf32>
    %289 = vector.broadcast %288 : vector<1x256xf32> to vector<8x256xf32>
    %290 = arith.mulf %287, %289 : vector<8x256xf32>
    %291 = arith.truncf %290 : vector<8x256xf32> to vector<8x256xbf16>
    %c256 = arith.constant 256 : index
    %c0_97 = arith.constant 0 : index
    %292 = vector.load %arg14[%c256, %c0_97] : memref<400x256xbf16, #tpu.memory_space<vmem>>, vector<8x256xbf16>
    tpu.vector_store %arg14[%c256, %c0_97], %291 {strides = array<i32>} : memref<400x256xbf16, #tpu.memory_space<vmem>>, vector<8x256xbf16>,
    %c15_i32_98 = arith.constant 15 : i32
    %293 = tpu.dynamic_rotate %244 by %c15_i32_98 dim 1 : vector<8x256xf32>, i32 -> vector<8x256xf32>
    %294 = vector.extract_strided_slice %1 {offsets = [8, 0], sizes = [1, 256], strides = [1, 1]} : vector<25x256xf32> to vector<1x256xf32>
    %295 = vector.broadcast %294 : vector<1x256xf32> to vector<8x256xf32>
    %296 = arith.mulf %293, %295 : vector<8x256xf32>
    %297 = arith.truncf %296 : vector<8x256xf32> to vector<8x256xbf16>
    %c264 = arith.constant 264 : index
    %c0_99 = arith.constant 0 : index
    %298 = vector.load %arg14[%c264, %c0_99] : memref<400x256xbf16, #tpu.memory_space<vmem>>, vector<8x256xbf16>
    tpu.vector_store %arg14[%c264, %c0_99], %297 {strides = array<i32>} : memref<400x256xbf16, #tpu.memory_space<vmem>>, vector<8x256xbf16>,
    %c14_i32_100 = arith.constant 14 : i32
    %299 = tpu.dynamic_rotate %244 by %c14_i32_100 dim 1 : vector<8x256xf32>, i32 -> vector<8x256xf32>
    %300 = vector.extract_strided_slice %1 {offsets = [9, 0], sizes = [1, 256], strides = [1, 1]} : vector<25x256xf32> to vector<1x256xf32>
    %301 = vector.broadcast %300 : vector<1x256xf32> to vector<8x256xf32>
    %302 = arith.mulf %299, %301 : vector<8x256xf32>
    %303 = arith.truncf %302 : vector<8x256xf32> to vector<8x256xbf16>
    %c272 = arith.constant 272 : index
    %c0_101 = arith.constant 0 : index
    %304 = vector.load %arg14[%c272, %c0_101] : memref<400x256xbf16, #tpu.memory_space<vmem>>, vector<8x256xbf16>
    tpu.vector_store %arg14[%c272, %c0_101], %303 {strides = array<i32>} : memref<400x256xbf16, #tpu.memory_space<vmem>>, vector<8x256xbf16>,
    %c2_i32_102 = arith.constant 2 : i32
    %305 = tpu.dynamic_rotate %244 by %c2_i32_102 dim 1 : vector<8x256xf32>, i32 -> vector<8x256xf32>
    %306 = vector.extract_strided_slice %1 {offsets = [10, 0], sizes = [1, 256], strides = [1, 1]} : vector<25x256xf32> to vector<1x256xf32>
    %307 = vector.broadcast %306 : vector<1x256xf32> to vector<8x256xf32>
    %308 = arith.mulf %305, %307 : vector<8x256xf32>
    %309 = arith.truncf %308 : vector<8x256xf32> to vector<8x256xbf16>
    %c280 = arith.constant 280 : index
    %c0_103 = arith.constant 0 : index
    %310 = vector.load %arg14[%c280, %c0_103] : memref<400x256xbf16, #tpu.memory_space<vmem>>, vector<8x256xbf16>
    tpu.vector_store %arg14[%c280, %c0_103], %309 {strides = array<i32>} : memref<400x256xbf16, #tpu.memory_space<vmem>>, vector<8x256xbf16>,
    %c1_i32_104 = arith.constant 1 : i32
    %311 = tpu.dynamic_rotate %244 by %c1_i32_104 dim 1 : vector<8x256xf32>, i32 -> vector<8x256xf32>
    %312 = vector.extract_strided_slice %1 {offsets = [11, 0], sizes = [1, 256], strides = [1, 1]} : vector<25x256xf32> to vector<1x256xf32>
    %313 = vector.broadcast %312 : vector<1x256xf32> to vector<8x256xf32>
    %314 = arith.mulf %311, %313 : vector<8x256xf32>
    %315 = arith.truncf %314 : vector<8x256xf32> to vector<8x256xbf16>
    %c288 = arith.constant 288 : index
    %c0_105 = arith.constant 0 : index
    %316 = vector.load %arg14[%c288, %c0_105] : memref<400x256xbf16, #tpu.memory_space<vmem>>, vector<8x256xbf16>
    tpu.vector_store %arg14[%c288, %c0_105], %315 {strides = array<i32>} : memref<400x256xbf16, #tpu.memory_space<vmem>>, vector<8x256xbf16>,
    %317 = vector.extract_strided_slice %1 {offsets = [12, 0], sizes = [1, 256], strides = [1, 1]} : vector<25x256xf32> to vector<1x256xf32>
    %318 = vector.broadcast %317 : vector<1x256xf32> to vector<8x256xf32>
    %319 = arith.mulf %244, %318 : vector<8x256xf32>
    %320 = arith.truncf %319 : vector<8x256xf32> to vector<8x256xbf16>
    %c296 = arith.constant 296 : index
    %c0_106 = arith.constant 0 : index
    %321 = vector.load %arg14[%c296, %c0_106] : memref<400x256xbf16, #tpu.memory_space<vmem>>, vector<8x256xbf16>
    tpu.vector_store %arg14[%c296, %c0_106], %320 {strides = array<i32>} : memref<400x256xbf16, #tpu.memory_space<vmem>>, vector<8x256xbf16>,
    %c255_i32_107 = arith.constant 255 : i32
    %322 = tpu.dynamic_rotate %244 by %c255_i32_107 dim 1 : vector<8x256xf32>, i32 -> vector<8x256xf32>
    %323 = vector.extract_strided_slice %1 {offsets = [13, 0], sizes = [1, 256], strides = [1, 1]} : vector<25x256xf32> to vector<1x256xf32>
    %324 = vector.broadcast %323 : vector<1x256xf32> to vector<8x256xf32>
    %325 = arith.mulf %322, %324 : vector<8x256xf32>
    %326 = arith.truncf %325 : vector<8x256xf32> to vector<8x256xbf16>
    %c304 = arith.constant 304 : index
    %c0_108 = arith.constant 0 : index
    %327 = vector.load %arg14[%c304, %c0_108] : memref<400x256xbf16, #tpu.memory_space<vmem>>, vector<8x256xbf16>
    tpu.vector_store %arg14[%c304, %c0_108], %326 {strides = array<i32>} : memref<400x256xbf16, #tpu.memory_space<vmem>>, vector<8x256xbf16>,
    %c254_i32_109 = arith.constant 254 : i32
    %328 = tpu.dynamic_rotate %244 by %c254_i32_109 dim 1 : vector<8x256xf32>, i32 -> vector<8x256xf32>
    %329 = vector.extract_strided_slice %1 {offsets = [14, 0], sizes = [1, 256], strides = [1, 1]} : vector<25x256xf32> to vector<1x256xf32>
    %330 = vector.broadcast %329 : vector<1x256xf32> to vector<8x256xf32>
    %331 = arith.mulf %328, %330 : vector<8x256xf32>
    %332 = arith.truncf %331 : vector<8x256xf32> to vector<8x256xbf16>
    %c312 = arith.constant 312 : index
    %c0_110 = arith.constant 0 : index
    %333 = vector.load %arg14[%c312, %c0_110] : memref<400x256xbf16, #tpu.memory_space<vmem>>, vector<8x256xbf16>
    tpu.vector_store %arg14[%c312, %c0_110], %332 {strides = array<i32>} : memref<400x256xbf16, #tpu.memory_space<vmem>>, vector<8x256xbf16>,
    %c242_i32_111 = arith.constant 242 : i32
    %334 = tpu.dynamic_rotate %244 by %c242_i32_111 dim 1 : vector<8x256xf32>, i32 -> vector<8x256xf32>
    %335 = vector.extract_strided_slice %1 {offsets = [15, 0], sizes = [1, 256], strides = [1, 1]} : vector<25x256xf32> to vector<1x256xf32>
    %336 = vector.broadcast %335 : vector<1x256xf32> to vector<8x256xf32>
    %337 = arith.mulf %334, %336 : vector<8x256xf32>
    %338 = arith.truncf %337 : vector<8x256xf32> to vector<8x256xbf16>
    %c320 = arith.constant 320 : index
    %c0_112 = arith.constant 0 : index
    %339 = vector.load %arg14[%c320, %c0_112] : memref<400x256xbf16, #tpu.memory_space<vmem>>, vector<8x256xbf16>
    tpu.vector_store %arg14[%c320, %c0_112], %338 {strides = array<i32>} : memref<400x256xbf16, #tpu.memory_space<vmem>>, vector<8x256xbf16>,
    %c241_i32_113 = arith.constant 241 : i32
    %340 = tpu.dynamic_rotate %244 by %c241_i32_113 dim 1 : vector<8x256xf32>, i32 -> vector<8x256xf32>
    %341 = vector.extract_strided_slice %1 {offsets = [16, 0], sizes = [1, 256], strides = [1, 1]} : vector<25x256xf32> to vector<1x256xf32>
    %342 = vector.broadcast %341 : vector<1x256xf32> to vector<8x256xf32>
    %343 = arith.mulf %340, %342 : vector<8x256xf32>
    %344 = arith.truncf %343 : vector<8x256xf32> to vector<8x256xbf16>
    %c328 = arith.constant 328 : index
    %c0_114 = arith.constant 0 : index
    %345 = vector.load %arg14[%c328, %c0_114] : memref<400x256xbf16, #tpu.memory_space<vmem>>, vector<8x256xbf16>
    tpu.vector_store %arg14[%c328, %c0_114], %344 {strides = array<i32>} : memref<400x256xbf16, #tpu.memory_space<vmem>>, vector<8x256xbf16>,
    %c240_i32_115 = arith.constant 240 : i32
    %346 = tpu.dynamic_rotate %244 by %c240_i32_115 dim 1 : vector<8x256xf32>, i32 -> vector<8x256xf32>
    %347 = vector.extract_strided_slice %1 {offsets = [17, 0], sizes = [1, 256], strides = [1, 1]} : vector<25x256xf32> to vector<1x256xf32>
    %348 = vector.broadcast %347 : vector<1x256xf32> to vector<8x256xf32>
    %349 = arith.mulf %346, %348 : vector<8x256xf32>
    %350 = arith.truncf %349 : vector<8x256xf32> to vector<8x256xbf16>
    %c336 = arith.constant 336 : index
    %c0_116 = arith.constant 0 : index
    %351 = vector.load %arg14[%c336, %c0_116] : memref<400x256xbf16, #tpu.memory_space<vmem>>, vector<8x256xbf16>
    tpu.vector_store %arg14[%c336, %c0_116], %350 {strides = array<i32>} : memref<400x256xbf16, #tpu.memory_space<vmem>>, vector<8x256xbf16>,
    %c239_i32_117 = arith.constant 239 : i32
    %352 = tpu.dynamic_rotate %244 by %c239_i32_117 dim 1 : vector<8x256xf32>, i32 -> vector<8x256xf32>
    %353 = vector.extract_strided_slice %1 {offsets = [18, 0], sizes = [1, 256], strides = [1, 1]} : vector<25x256xf32> to vector<1x256xf32>
    %354 = vector.broadcast %353 : vector<1x256xf32> to vector<8x256xf32>
    %355 = arith.mulf %352, %354 : vector<8x256xf32>
    %356 = arith.truncf %355 : vector<8x256xf32> to vector<8x256xbf16>
    %c344 = arith.constant 344 : index
    %c0_118 = arith.constant 0 : index
    %357 = vector.load %arg14[%c344, %c0_118] : memref<400x256xbf16, #tpu.memory_space<vmem>>, vector<8x256xbf16>
    tpu.vector_store %arg14[%c344, %c0_118], %356 {strides = array<i32>} : memref<400x256xbf16, #tpu.memory_space<vmem>>, vector<8x256xbf16>,
    %c238_i32_119 = arith.constant 238 : i32
    %358 = tpu.dynamic_rotate %244 by %c238_i32_119 dim 1 : vector<8x256xf32>, i32 -> vector<8x256xf32>
    %359 = vector.extract_strided_slice %1 {offsets = [19, 0], sizes = [1, 256], strides = [1, 1]} : vector<25x256xf32> to vector<1x256xf32>
    %360 = vector.broadcast %359 : vector<1x256xf32> to vector<8x256xf32>
    %361 = arith.mulf %358, %360 : vector<8x256xf32>
    %362 = arith.truncf %361 : vector<8x256xf32> to vector<8x256xbf16>
    %c352 = arith.constant 352 : index
    %c0_120 = arith.constant 0 : index
    %363 = vector.load %arg14[%c352, %c0_120] : memref<400x256xbf16, #tpu.memory_space<vmem>>, vector<8x256xbf16>
    tpu.vector_store %arg14[%c352, %c0_120], %362 {strides = array<i32>} : memref<400x256xbf16, #tpu.memory_space<vmem>>, vector<8x256xbf16>,
    %c226_i32_121 = arith.constant 226 : i32
    %364 = tpu.dynamic_rotate %244 by %c226_i32_121 dim 1 : vector<8x256xf32>, i32 -> vector<8x256xf32>
    %365 = vector.extract_strided_slice %1 {offsets = [20, 0], sizes = [1, 256], strides = [1, 1]} : vector<25x256xf32> to vector<1x256xf32>
    %366 = vector.broadcast %365 : vector<1x256xf32> to vector<8x256xf32>
    %367 = arith.mulf %364, %366 : vector<8x256xf32>
    %368 = arith.truncf %367 : vector<8x256xf32> to vector<8x256xbf16>
    %c360 = arith.constant 360 : index
    %c0_122 = arith.constant 0 : index
    %369 = vector.load %arg14[%c360, %c0_122] : memref<400x256xbf16, #tpu.memory_space<vmem>>, vector<8x256xbf16>
    tpu.vector_store %arg14[%c360, %c0_122], %368 {strides = array<i32>} : memref<400x256xbf16, #tpu.memory_space<vmem>>, vector<8x256xbf16>,
    %c225_i32_123 = arith.constant 225 : i32
    %370 = tpu.dynamic_rotate %244 by %c225_i32_123 dim 1 : vector<8x256xf32>, i32 -> vector<8x256xf32>
    %371 = vector.extract_strided_slice %1 {offsets = [21, 0], sizes = [1, 256], strides = [1, 1]} : vector<25x256xf32> to vector<1x256xf32>
    %372 = vector.broadcast %371 : vector<1x256xf32> to vector<8x256xf32>
    %373 = arith.mulf %370, %372 : vector<8x256xf32>
    %374 = arith.truncf %373 : vector<8x256xf32> to vector<8x256xbf16>
    %c368 = arith.constant 368 : index
    %c0_124 = arith.constant 0 : index
    %375 = vector.load %arg14[%c368, %c0_124] : memref<400x256xbf16, #tpu.memory_space<vmem>>, vector<8x256xbf16>
    tpu.vector_store %arg14[%c368, %c0_124], %374 {strides = array<i32>} : memref<400x256xbf16, #tpu.memory_space<vmem>>, vector<8x256xbf16>,
    %c224_i32_125 = arith.constant 224 : i32
    %376 = tpu.dynamic_rotate %244 by %c224_i32_125 dim 1 : vector<8x256xf32>, i32 -> vector<8x256xf32>
    %377 = vector.extract_strided_slice %1 {offsets = [22, 0], sizes = [1, 256], strides = [1, 1]} : vector<25x256xf32> to vector<1x256xf32>
    %378 = vector.broadcast %377 : vector<1x256xf32> to vector<8x256xf32>
    %379 = arith.mulf %376, %378 : vector<8x256xf32>
    %380 = arith.truncf %379 : vector<8x256xf32> to vector<8x256xbf16>
    %c376 = arith.constant 376 : index
    %c0_126 = arith.constant 0 : index
    %381 = vector.load %arg14[%c376, %c0_126] : memref<400x256xbf16, #tpu.memory_space<vmem>>, vector<8x256xbf16>
    tpu.vector_store %arg14[%c376, %c0_126], %380 {strides = array<i32>} : memref<400x256xbf16, #tpu.memory_space<vmem>>, vector<8x256xbf16>,
    %c223_i32_127 = arith.constant 223 : i32
    %382 = tpu.dynamic_rotate %244 by %c223_i32_127 dim 1 : vector<8x256xf32>, i32 -> vector<8x256xf32>
    %383 = vector.extract_strided_slice %1 {offsets = [23, 0], sizes = [1, 256], strides = [1, 1]} : vector<25x256xf32> to vector<1x256xf32>
    %384 = vector.broadcast %383 : vector<1x256xf32> to vector<8x256xf32>
    %385 = arith.mulf %382, %384 : vector<8x256xf32>
    %386 = arith.truncf %385 : vector<8x256xf32> to vector<8x256xbf16>
    %c384 = arith.constant 384 : index
    %c0_128 = arith.constant 0 : index
    %387 = vector.load %arg14[%c384, %c0_128] : memref<400x256xbf16, #tpu.memory_space<vmem>>, vector<8x256xbf16>
    tpu.vector_store %arg14[%c384, %c0_128], %386 {strides = array<i32>} : memref<400x256xbf16, #tpu.memory_space<vmem>>, vector<8x256xbf16>,
    %c222_i32_129 = arith.constant 222 : i32
    %388 = tpu.dynamic_rotate %244 by %c222_i32_129 dim 1 : vector<8x256xf32>, i32 -> vector<8x256xf32>
    %389 = vector.extract_strided_slice %1 {offsets = [24, 0], sizes = [1, 256], strides = [1, 1]} : vector<25x256xf32> to vector<1x256xf32>
    %390 = vector.broadcast %389 : vector<1x256xf32> to vector<8x256xf32>
    %391 = arith.mulf %388, %390 : vector<8x256xf32>
    %392 = arith.truncf %391 : vector<8x256xf32> to vector<8x256xbf16>
    %c392 = arith.constant 392 : index
    %c0_130 = arith.constant 0 : index
    %393 = vector.load %arg14[%c392, %c0_130] : memref<400x256xbf16, #tpu.memory_space<vmem>>, vector<8x256xbf16>
    tpu.vector_store %arg14[%c392, %c0_130], %392 {strides = array<i32>} : memref<400x256xbf16, #tpu.memory_space<vmem>>, vector<8x256xbf16>,
    %c0_131 = arith.constant 0 : index
    %c0_132 = arith.constant 0 : index
    %394 = vector.load %arg14[%c0_131, %c0_132] : memref<400x256xbf16, #tpu.memory_space<vmem>>, vector<400x256xbf16>
    %cst_133 = arith.constant dense<0.000000e+00> : vector<8x256xf32>
    %395 = tpu.matmul %5, %394, %cst_133 {dimension_numbers = #tpu.dot_dimension_numbers<[1], [0], [0], [1], [0, 0, 1, 1], [], []>} : vector<8x400xbf16>, vector<400x256xbf16>, vector<8x256xf32> -> vector<8x256xf32>
    %396 = vector.broadcast %6 : vector<8x1xf32> to vector<8x256xf32>
    %397 = arith.addf %395, %396 : vector<8x256xf32>
    %cst_134 = arith.constant dense<0.000000e+00> : vector<8xf32>
    %398 = vector.multi_reduction <add>, %397, %cst_134 [1] : vector<8x256xf32> to vector<8xf32>
    %399 = vector.shape_cast %398 : vector<8xf32> to vector<8x1xf32>
    %400 = arith.mulf %397, %397 : vector<8x256xf32>
    %cst_135 = arith.constant dense<0.000000e+00> : vector<8xf32>
    %401 = vector.multi_reduction <add>, %400, %cst_135 [1] : vector<8x256xf32> to vector<8xf32>
    %402 = vector.shape_cast %401 : vector<8xf32> to vector<8x1xf32>
    %cst_136 = arith.constant 3.906250e-03 : f32
    %403 = vector.broadcast %cst_136 : f32 to vector<8x1xf32>
    %404 = arith.mulf %399, %403 : vector<8x1xf32>
    %cst_137 = arith.constant 3.906250e-03 : f32
    %405 = vector.broadcast %cst_137 : f32 to vector<8x1xf32>
    %406 = arith.mulf %402, %405 : vector<8x1xf32>
    %407 = arith.mulf %404, %404 : vector<8x1xf32>
    %408 = arith.subf %406, %407 : vector<8x1xf32>
    %409 = vector.broadcast %404 : vector<8x1xf32> to vector<8x256xf32>
    %410 = arith.subf %397, %409 : vector<8x256xf32>
    %cst_138 = arith.constant 9.99999974E-6 : f32
    %411 = vector.broadcast %cst_138 : f32 to vector<8x1xf32>
    %412 = arith.addf %408, %411 : vector<8x1xf32>
    %413 = math.rsqrt %412 : vector<8x1xf32>
    %414 = vector.broadcast %413 : vector<8x1xf32> to vector<8x256xf32>
    %415 = arith.mulf %410, %414 : vector<8x256xf32>
    %cst_139 = arith.constant 0.000000e+00 : f32
    %416 = vector.broadcast %cst_139 : f32 to vector<8x256xf32>
    %417 = arith.cmpf oge, %415, %416 : vector<8x256xf32>
    %418 = vector.broadcast %0 : f32 to vector<8x256xf32>
    %419 = arith.mulf %418, %415 : vector<8x256xf32>
    %420 = arith.select %417, %415, %419 : vector<8x256xi1>, vector<8x256xf32>
    %c16_140 = arith.constant 16 : index
    %c0_141 = arith.constant 0 : index
    %421 = vector.load %arg13[%c16_140, %c0_141] : memref<24x256xf32, #tpu.memory_space<vmem>>, vector<8x256xf32>
    tpu.vector_store %arg13[%c16_140, %c0_141], %420 {strides = array<i32>} : memref<24x256xf32, #tpu.memory_space<vmem>>, vector<8x256xf32>,
    %c0_142 = arith.constant 0 : index
    %c0_143 = arith.constant 0 : index
    %422 = vector.load %arg13[%c0_142, %c0_143] : memref<24x256xf32, #tpu.memory_space<vmem>>, vector<24x256xf32>
    %cst_144 = arith.constant dense<0.000000e+00> : vector<8x256xf32>
    %423 = tpu.matmul %7, %422, %cst_144 {dimension_numbers = #tpu.dot_dimension_numbers<[1], [0], [0], [1], [0, 0, 1, 1], [], []>} : vector<8x24xf32>, vector<24x256xf32>, vector<8x256xf32> -> vector<8x256xf32>
    %424 = vector.broadcast %8 : vector<8x1xf32> to vector<8x256xf32>
    %425 = arith.addf %423, %424 : vector<8x256xf32>
    %c0_145 = arith.constant 0 : index
    %c0_146 = arith.constant 0 : index
    %c0_147 = arith.constant 0 : index
    %c0_148 = arith.constant 0 : index
    %426 = vector.load %arg12[%c0_145, %c0_146, %c0_147, %c0_148] : memref<1x1x8x256xf32, #tpu.memory_space<vmem>>, vector<1x1x8x256xf32>
    %427 = vector.shape_cast %426 : vector<1x1x8x256xf32> to vector<8x256xf32>
    %428 = vector.shape_cast %425 : vector<8x256xf32> to vector<1x1x8x256xf32>
    tpu.vector_store %arg12[%c0_145, %c0_146, %c0_147, %c0_148], %428 {strides = array<i32>} : memref<1x1x8x256xf32, #tpu.memory_space<vmem>>, vector<1x1x8x256xf32>,
    return
  }
  func.func @transform_0(%arg0: i32) -> (i32, i32, i32, i32) {
    %c0_i32 = arith.constant 0 : i32
    %c0_i32_0 = arith.constant 0 : i32
    %c0_i32_1 = arith.constant 0 : i32
    %c0_i32_2 = arith.constant 0 : i32
    return %arg0, %c0_i32, %c0_i32_0, %c0_i32_1 : i32, i32, i32, i32
  }
  func.func @transform_1(%arg0: i32) -> (i32, i32, i32, i32) {
    %c0_i32 = arith.constant 0 : i32
    %c0_i32_0 = arith.constant 0 : i32
    %c0_i32_1 = arith.constant 0 : i32
    %c0_i32_2 = arith.constant 0 : i32
    return %arg0, %c0_i32, %c0_i32_0, %c0_i32_1 : i32, i32, i32, i32
  }
  func.func @transform_2(%arg0: i32) -> (i32, i32, i32, i32) {
    %c0_i32 = arith.constant 0 : i32
    %c0_i32_0 = arith.constant 0 : i32
    %c0_i32_1 = arith.constant 0 : i32
    %c0_i32_2 = arith.constant 0 : i32
    return %arg0, %c0_i32, %c0_i32_0, %c0_i32_1 : i32, i32, i32, i32
  }
  func.func @transform_3(%arg0: i32) -> (i32, i32) {
    %c0_i32 = arith.constant 0 : i32
    %c0_i32_0 = arith.constant 0 : i32
    %c0_i32_1 = arith.constant 0 : i32
    return %c0_i32, %c0_i32_0 : i32, i32
  }
  func.func @transform_4(%arg0: i32) -> (i32, i32) {
    %c0_i32 = arith.constant 0 : i32
    %c0_i32_0 = arith.constant 0 : i32
    %c0_i32_1 = arith.constant 0 : i32
    return %c0_i32, %c0_i32_0 : i32, i32
  }
  func.func @transform_5(%arg0: i32) -> (i32, i32) {
    %c0_i32 = arith.constant 0 : i32
    %c0_i32_0 = arith.constant 0 : i32
    %c0_i32_1 = arith.constant 0 : i32
    return %c0_i32, %c0_i32_0 : i32, i32
  }
  func.func @transform_6(%arg0: i32) -> (i32, i32) {
    %c0_i32 = arith.constant 0 : i32
    %c0_i32_0 = arith.constant 0 : i32
    %c0_i32_1 = arith.constant 0 : i32
    return %c0_i32, %c0_i32_0 : i32, i32
  }
  func.func @transform_7(%arg0: i32) -> (i32, i32) {
    %c0_i32 = arith.constant 0 : i32
    %c0_i32_0 = arith.constant 0 : i32
    %c0_i32_1 = arith.constant 0 : i32
    return %c0_i32, %c0_i32_0 : i32, i32
  }
  func.func @transform_8(%arg0: i32) -> (i32, i32) {
    %c0_i32 = arith.constant 0 : i32
    %c0_i32_0 = arith.constant 0 : i32
    %c0_i32_1 = arith.constant 0 : i32
    return %c0_i32, %c0_i32_0 : i32, i32
  }
  func.func @transform_9(%arg0: i32) -> (i32, i32) {
    %c0_i32 = arith.constant 0 : i32
    %c0_i32_0 = arith.constant 0 : i32
    %c0_i32_1 = arith.constant 0 : i32
    return %c0_i32, %c0_i32_0 : i32, i32
  }
  func.func @transform_10(%arg0: i32) -> i32 {
    %c0_i32 = arith.constant 0 : i32
    %c0_i32_0 = arith.constant 0 : i32
    return %c0_i32 : i32
  }
  func.func @transform_11(%arg0: i32) -> (i32, i32, i32, i32) {
    %c0_i32 = arith.constant 0 : i32
    %c0_i32_0 = arith.constant 0 : i32
    %c0_i32_1 = arith.constant 0 : i32
    %c0_i32_2 = arith.constant 0 : i32
    return %arg0, %c0_i32, %c0_i32_0, %c0_i32_1 : i32, i32, i32, i32
  }
}

</mosaic_0001>

<bundles_post_ra>
// kernel: decoder_block_forward.1
= control target key start
LH: loop header
LB: loop body
LE: loop exit
PB: predicated region body
PF: predicated region fallthrough
CT: control target
= control target key end

     0   :  { %s2546_s19 = smov 0   ;;  %s3394_s0 = inlined_call_operand.vmem [shape: f32[2,1,4,256], index: 0, kind: input, shape index: {}]   ;;  %s3395_s1 = inlined_call_operand.vmem [shape: s32[2,1,4,256], index: 1, kind: input, shape index: {}]   ;;  %s3396_s2 = inlined_call_operand.vmem [shape: f32[2,1,4,256], index: 2, kind: input, shape index: {}]   ;;  %s3397_s3 = inlined_call_operand.vmem [shape: f32[25,256], index: 3, kind: input, shape index: {}]   ;;  %s3398_s4 = inlined_call_operand.vmem [shape: bf16[8,200], index: 4, kind: input, shape index: {}]   ;;  %s3399_s5 = inlined_call_operand.vmem [shape: f32[8,1], index: 5, kind: input, shape index: {}]   ;;  %s3400_s6 = inlined_call_operand.vmem [shape: bf16[8,400], index: 6, kind: input, shape index: {}]   ;;  %s3401_s7 = inlined_call_operand.vmem [shape: f32[8,1], index: 7, kind: input, shape index: {}]   ;;  %s3402_s8 = inlined_call_operand.vmem [shape: f32[8,24], index: 8, kind: input, shape index: {}]   ;;  %s3403_s9 = inlined_call_operand.vmem [shape: f32[8,1], index: 9, kind: input, shape index: {}]   ;;  %s3404_s10 = inlined_call_operand.<no memory space> [shape: f32[1], index: 10, kind: input, shape index: {}]   ;;  %s3405_s11 = inlined_call_operand.vmem [shape: f32[2,1,8,256], index: 11, kind: output, shape index: {}]  }
   0x1   :  { %16 = sst [smem:[#allocation4]] %s3404_s10 }
   0x2 LB: > { %s2005_s20 = sadd.s32 4294967295, %s2455_s19   ;;  %p2009_p0 = scmp.ge.s32.totalorder %s2455_s19, 1  ;;  %s2455_s19 = sphi %s2546_s19, %s22_s19  }
   0x3   : > { %p358_p1 = scmp.lt.s32.totalorder %s2455_s19, 3 }
   0x5   : > { %p359_p2 = pnand %p2009_p0, %p358_p1 }
   0x6   : > { %p408_p3 = scmp.lt.s32.totalorder (!%p359_p2), %s2005_s20, 1  ;;  %s429_s24 = sld [smem:[#allocation4]] (!%p359_p2) }
   0x7   : > { %362 = sbr.rel (%p359_p2) target bundleno = 1637 (0x665), region = 64  ;;  %s2458_s16 = smov (!%p359_p2), 114  }
   0x8   : > { %s3420_s17 = smov (!%p359_p2), 126   ;;  %s3412_s18 = smov (!%p359_p2), 2  }
   0x9   : > { %s3418_s21 = smov (!%p359_p2), 94   ;;  %s3422_s22 = smov (!%p359_p2), 127  }
   0xa   : > { %s2466_s25 = smov (!%p359_p2), 17   ;;  %s3408_s26 = smov (!%p359_p2), 16  }
   0xb   : > { %s3416_s28 = smov (!%p359_p2), 95   ;;  %s2470_s29 = smov (!%p359_p2), 30  }
   0xc   : > { %s3502_s20 = smov (!%p408_p3, %s2005_s20), 1  ;;  %vm450_vm0 = vcmask 1043456   ;;  %v2457_v20 = vmov 839922192   ;;  %v438_v23 = vlaneseq  ;;  %v2574_v35 = vstv %s429_s24  ;;  %s3410_s24 = smov 14  }
   0xd   : > { %s2557_s10 = sshll.u32 %s3502_s20, 3  ;;  %v485_v21 = vunpack.c.l.s4 %v2457_v20  ;;  %s2472_s12 = smov 98  }
   0xe   : > { %s422_s23 = scalar_lea.vmem %s3396_s2, %s2557_s10  ;;  %v2569_v27 = vand.u32 127, %v438_v23  ;;  %s417_s27 = scalar_lea.vmem %s3395_s1, %s2557_s10 }
   0xf   : > { %v455_v0 = vld [vmem:[%s422_s23] sm:$0xff]  ;;  %v2567_v25 = vunpack.c.0.s8 %v485_v21  ;;  %s412_s30 = scalar_lea.vmem %s3394_s0, %s2557_s10  ;;  %s3414_s10 = smov 1  }
  0x10   : > { %457 = vst [vmem:[#allocation1] ss:$2 sm:$0xff] %v455_v0  ;;  %v467_v1 = vmul.f32 %v455_v0, %v455_v0  ;;  %v440_v31 = vadd.s32 128, %v2569_v27  ;;  %v448_v41 = vld [vmem:[%s417_s27] sm:$0xff]  ;;  %s3406_s23 = smov 15   ;;  %s2468_s27 = smov 96  }
  0x11   : > { %v453_v42 = vld [vmem:[%s412_s30] sm:$0xff]  ;;  %s2471_s30 = smov 18   ;;  %s2473_s13 = smov 97   ;;  %vm3431_vm10 = vcmp.lt.s32.totalorder %v2569_v27, 126  ;;  %vm752_vm11 = vcmp.lt.s32.totalorder %v2569_v27, 127  ;;  %vm3435_vm12 = vcmp.lt.s32.totalorder %v2569_v27, 114 }
  0x12   : > { %v449_v37 = vrot.slane %v440_v31, 4  ;;  %s2474_s14 = smov 32   ;;  %s2475_s15 = smov 31   ;;  %vm3438_vm13 = vcmp.lt.s32.totalorder %v2569_v27, 2  ;;  %vm3429_vm14 = vcmp.lt.s32.totalorder %v2569_v27, 1  ;;  %vm3426_vm15 = vcmp.lt.s32.totalorder %v2569_v27, 15 }
  0x14   : > { %v451_v40 = vsel %vm450_vm0, %v2569_v27, %v449_v37 }
  0x15   : > { %vm452_vm5 = vcmp.eq.s32.totalorder %v448_v41, %v451_v40 }
  0x16   : > { %v454_v43 = vsel %vm452_vm5, %v453_v42, 0.0  ;;  %vm642_vm5 = vcmp.lt.s32.totalorder %v2569_v27, 30 }
  0x17   : > { %v458_v2 = vld.sshfl [vmem:[#allocation1] sm:$0xff pattern:$0x75316420]  ;;  %v459_v3 = vld.sshfl [vmem:[#allocation1 + $0x8] sm:$0xff pattern:$0x75316420]  ;;  %v531_v46 = vmul.f32 %v454_v43, %v454_v43 }
  0x18   : > { %v462_v4 = vsel %vm450_vm0, %v458_v2, 0.0  ;;  %v463_v5 = vsel %vm450_vm0, %v459_v3, 0.0  ;;  %469 = vst [vmem:[#allocation1] ss:$2 sm:$0xff] %v467_v1 }
  0x19   : > { %v464_v6 = vadd.f32 %v463_v5, %v462_v4 }
  0x1b   : > { %465 = vadd.xlane.f32.xlu0 %v464_v6 }
  0x1f   : > { %v470_v7 = vld.sshfl [vmem:[#allocation1] sm:$0xff pattern:$0x75316420]  ;;  %v471_v8 = vld.sshfl [vmem:[#allocation1 + $0x8] sm:$0xff pattern:$0x75316420] }
  0x20   : > { %v474_v9 = vsel %vm450_vm0, %v470_v7, 0.0  ;;  %v475_v10 = vsel %vm450_vm0, %v471_v8, 0.0 }
  0x21   : > { %v476_v11 = vadd.f32 %v475_v10, %v474_v9 }
  0x23   : > { %477 = vadd.xlane.f32.xlu0 %v476_v11 }
  0x8e   : > { %v466_v12 = vpop.xlane.xlu0 %465 }
  0x8f   : > { %v479_v13 = vmul.f32 0.00390625, %v466_v12 }
  0x91   : > { %v481_v15 = vmul.f32 %v479_v13, %v479_v13  ;;  %v487_v29 = vperm.slane %v479_v13, %v2567_v25 }
  0x93   : > { %v489_v33 = vsub.f32 %v455_v0, %v487_v29 }
  0x96   : > { %v478_v14 = vpop.xlane.xlu0 %477 }
  0x97   : > { %v480_v16 = vmul.f32 0.00390625, %v478_v14 }
  0x99   : > { %v482_v17 = vsub.f32 %v480_v16, %v481_v15  ;;  %v2597_v15 = vld [vmem:[%s3397_s3 + $0x10] sm:$0xff]  ;;  %v2602_v16 = vld [vmem:[%s3397_s3 + $0x18] sm:$0xff] }
  0x9a   : > { %v756_v37 = vperm.slane %v2602_v16, 5 }
  0x9b   : > { %v490_v18 = vadd.f32 1e-05, %v482_v17  ;;  %v742_v17 = vperm.slane %v2597_v15, 4 }
  0x9d   : > { %2439 = vrsqrt.f32 %v490_v18  ;;  %vm497_vm2 = vweird.f32 %v490_v18 }
  0xa3   : > { %v2440_v19 = vpop.eup %2439 }
  0xa4   : > { %v492_v22 = vmul.f32 %v2440_v19, %v490_v18  ;;  %vm498_vm1 = vweird.f32 %v2440_v19  ;;  %v743_v18 = vperm.slane %v2602_v16, 4 }
  0xa5   : > { %vm499_vm3 = vmor %vm497_vm2, %vm498_vm1  ;;  %vm3451_vm1 = vcmp.lt.s32.totalorder %v2569_v27, 94  ;;  %vm3428_vm2 = vcmp.lt.s32.totalorder %v2569_v27, 14 }
  0xa6   : > { %v493_v24 = vmul.f32 %v2440_v19, %v492_v22 }
  0xa8   : > { %v494_v26 = vmul.f32 0.5, %v493_v24 }
  0xaa   : > { %v495_v28 = vsub.f32 1.5, %v494_v26  ;;  %v3444_v26 = vperm.slane %v2602_v16, 6 }
  0xac   : > { %v496_v30 = vmul.f32 %v2440_v19, %v495_v28 }
  0xae   : > { %v500_v32 = vsel %vm499_vm3, %v2440_v19, %v496_v30  ;;  %vm3427_vm3 = vcmp.lt.s32.totalorder %v2569_v27, 16 }
  0xaf   : > { %v505_v34 = vperm.slane %v500_v32, %v2567_v25 }
  0xb1   : > { %v507_v36 = vmul.f32 %v505_v34, %v489_v33 }
  0xb3   : > { %vm508_vm4 = vcmp.ge.f32.partialorder %v507_v36, 0.0  ;;  %v510_v38 = vmul.f32 %v2574_v35, %v507_v36 }
  0xb5   : > { %v511_v39 = vsel %vm508_vm4, %v507_v36, %v510_v38  ;;  %v755_v36 = vperm.slane %v2597_v15, 5  ;;  %v781_v38 = vperm.slane %v2597_v15, 7  ;;  %vm668_vm4 = vcmp.lt.s32.totalorder %v2569_v27, 17 }
  0xb6   : > { %513 = vst [vmem:[#allocation1] ss:$2 sm:$0xff] %v511_v39  ;;  %v782_v39 = vperm.slane %v2602_v16, 7 }
  0xbd   : > { %v514_v44 = vld.sshfl [vmem:[#allocation1] sm:$0xff pattern:$0x75316420]  ;;  %v515_v45 = vld.sshfl [vmem:[#allocation1 + $0x8] sm:$0xff pattern:$0x75316420] }
  0xbe   : > { %518 = vst [vmem:[#allocation2 + $0x28] sm:$0xf] %v514_v44 }
  0xbf   : > { %519 = vst [vmem:[#allocation2 + $0x10] sm:$0xf] %v515_v45 }
  0xc0   : > { %521 = vst [vmem:[#allocation1] ss:$2 sm:$0xff] %v454_v43 }
  0xc7   : > { %v522_v47 = vld.sshfl [vmem:[#allocation1] sm:$0xff pattern:$0x75316420]  ;;  %v523_v48 = vld.sshfl [vmem:[#allocation1 + $0x8] sm:$0xff pattern:$0x75316420] }
  0xc8   : > { %v526_v49 = vsel %vm450_vm0, %v522_v47, 0.0  ;;  %v527_v50 = vsel %vm450_vm0, %v523_v48, 0.0  ;;  %533 = vst [vmem:[#allocation1] ss:$2 sm:$0xff] %v531_v46 }
  0xc9   : > { %v528_v51 = vadd.f32 %v527_v50, %v526_v49 }
  0xcb   : > { %529 = vadd.xlane.f32.xlu1 %v528_v51 }
  0xcf   : > { %v534_v52 = vld.sshfl [vmem:[#allocation1] sm:$0xff pattern:$0x75316420]  ;;  %v535_v53 = vld.sshfl [vmem:[#allocation1 + $0x8] sm:$0xff pattern:$0x75316420] }
  0xd0   : > { %v538_v54 = vsel %vm450_vm0, %v534_v52, 0.0  ;;  %v539_v55 = vsel %vm450_vm0, %v535_v53, 0.0  ;;  %v723_v53 = vperm.slane %v2597_v15, 2 }
  0xd1   : > { %v540_v56 = vadd.f32 %v539_v55, %v538_v54  ;;  %v724_v54 = vperm.slane %v2602_v16, 2 }
  0xd3   : > { %541 = vadd.xlane.f32.xlu1 %v540_v56 }
 0x13e   : > { %v530_v57 = vpop.xlane.xlu1 %529 }
 0x13f   : > { %v543_v58 = vmul.f32 0.00390625, %v530_v57 }
 0x141   : > { %v545_v60 = vmul.f32 %v543_v58, %v543_v58  ;;  %v551_v5 = vperm.slane %v543_v58, %v2567_v25 }
 0x143   : > { %v553_v8 = vsub.f32 %v454_v43, %v551_v5 }
 0x146   : > { %v542_v59 = vpop.xlane.xlu1 %541 }
 0x147   : > { %v544_v61 = vmul.f32 0.00390625, %v542_v59 }
 0x149   : > { %v546_v62 = vsub.f32 %v544_v61, %v545_v60 }
 0x14b   : > { %v554_v63 = vadd.f32 1e-05, %v546_v62 }
 0x14d   : > { %2441 = vrsqrt.f32 %v554_v63  ;;  %vm561_vm7 = vweird.f32 %v554_v63 }
 0x153   : > { %v2442_v0 = vpop.eup %2441 }
 0x154   : > { %v556_v1 = vmul.f32 %v2442_v0, %v554_v63  ;;  %vm562_vm6 = vweird.f32 %v2442_v0 }
 0x155   : > { %vm563_vm8 = vmor %vm561_vm7, %vm562_vm6  ;;  %vm3430_vm6 = vcmp.lt.s32.totalorder %v2569_v27, 95  ;;  %vm655_vm7 = vcmp.lt.s32.totalorder %v2569_v27, 18 }
 0x156   : > { %v557_v2 = vmul.f32 %v2442_v0, %v556_v1  ;;  %v3441_v1 = vperm.slane %v2597_v15, 3 }
 0x158   : > { %v558_v3 = vmul.f32 0.5, %v557_v2 }
 0x15a   : > { %v559_v4 = vsub.f32 1.5, %v558_v3 }
 0x15c   : > { %v560_v6 = vmul.f32 %v2442_v0, %v559_v4  ;;  %v3440_v4 = vperm.slane %v2602_v16, 3 }
 0x15e   : > { %v564_v7 = vsel %vm563_vm8, %v2442_v0, %v560_v6  ;;  %vm856_vm8 = vcmp.lt.s32.totalorder %v2569_v27, 97 }
 0x15f   : > { %v569_v9 = vperm.slane %v564_v7, %v2567_v25  ;;  %v3446_v25 = vperm.slane %v2597_v15, 6 }
 0x161   : > { %v571_v10 = vmul.f32 %v569_v9, %v553_v8 }
 0x163   : > { %vm572_vm9 = vcmp.ge.f32.partialorder %v571_v10, 0.0  ;;  %v573_v11 = vmul.f32 %v571_v10, %v2574_v35 }
 0x165   : > { %v574_v12 = vsel %vm572_vm9, %v571_v10, %v573_v11  ;;  %vm3449_vm9 = vcmp.lt.s32.totalorder %v2569_v27, 98 }
 0x166   : > { %577 = vst [vmem:[#allocation1 + $0x1] ss:$2 sm:$0xff] %v574_v12 }
 0x16d   : > { %v578_v13 = vld.sshfl [vmem:[#allocation1] sm:$0xff pattern:$0x75316420]  ;;  %v579_v14 = vld.sshfl [vmem:[#allocation1 + $0x8] sm:$0xff pattern:$0x75316420] }
 0x16e   : > { %582 = vst [vmem:[#allocation2 + $0x28] sm:$0xf0] %v578_v13 }
 0x16f   : > { %583 = vst [vmem:[#allocation2 + $0x10] sm:$0xf0] %v579_v14 }
 0x175   : > { %v2606_v19 = vld [vmem:[#allocation2 + $0x28] sm:$0xff] }
 0x176   : > { %v2608_v20 = vld [vmem:[#allocation2 + $0x10] sm:$0xff]  ;;  %774 = vrot.lane.b32.xlu0 %v2606_v19, %s2458_s16  ;;  %761 = vrot.lane.b32.xlu2 %v2606_v19, %s3420_s17  ;;  %v744_v21 = vmul.f32 %v742_v17, %v2606_v19 }
 0x177   : > { %776 = vrot.lane.b32.xlu1 %v2608_v20, %s2458_s16  ;;  %v745_v22 = vmul.f32 %v743_v18, %v2608_v20 }
 0x179   : > { %v746_v23 = vpack.c.bf16 %v745_v22, %v744_v21 }
 0x17b   : > { %747 = vst [vmem:[#allocation3 + $0x60] sm:$0xff] %v746_v23 }
 0x17e   : > { %718 = vrot.lane.b32.xlu0 %v2608_v20, %s3412_s18  ;;  %763 = vrot.lane.b32.xlu2 %v2608_v20, %s3420_s17  ;;  %s3460_s17 = smov 16  }
 0x17f   : > { %731 = vrot.lane.b32.xlu1 %v2608_v20, %s3414_s10 }
 0x182   : > { %v2068_v22 = vld [vmem:[#allocation3 + $0x60] sm:$0xf]  ;;  %v2338_v23 = vld [vmem:[#allocation3 + $0x64] sm:$0xf] }
 0x186   : > { %891 = vrot.lane.b32.xlu0 %v2606_v19, %s3418_s21  ;;  %748 = vrot.lane.b32.xlu2 %v2606_v19, %s3422_s22 }
 0x187   : > { %690 = vrot.lane.b32.xlu1 %v2606_v19, %s3406_s23 }
 0x18e   : > { %692 = vrot.lane.b32.xlu0 %v2608_v20, %s3406_s23  ;;  %750 = vrot.lane.b32.xlu2 %v2608_v20, %s3422_s22  ;;  %s2476_s23 = smov 111  }
 0x18f   : > { %705 = vrot.lane.b32.xlu1 %v2608_v20, %s3410_s24 }
 0x196   : > { %664 = vrot.lane.b32.xlu0 %v2606_v19, %s2466_s25  ;;  %716 = vrot.lane.b32.xlu2 %v2606_v19, %s3412_s18  ;;  %s3424_s18 = smov 33  }
 0x197   : > { %677 = vrot.lane.b32.xlu1 %v2606_v19, %s3408_s26 }
 0x19e   : > { %679 = vrot.lane.b32.xlu0 %v2608_v20, %s3408_s26  ;;  %729 = vrot.lane.b32.xlu2 %v2606_v19, %s3414_s10  ;;  %s2477_s26 = smov 110   ;;  %s2480_s10 = smov 113  }
 0x19f   : > { %867 = vrot.lane.b32.xlu1 %v2608_v20, %s2468_s27 }
 0x1a6   : > { %878 = vrot.lane.b32.xlu0 %v2606_v19, %s3416_s28  ;;  %893 = vrot.lane.b32.xlu2 %v2608_v20, %s3418_s21 }
 0x1a7   : > { %638 = vrot.lane.b32.xlu1 %v2606_v19, %s2470_s29 }
 0x1ae   : > { %640 = vrot.lane.b32.xlu0 %v2608_v20, %s2470_s29  ;;  %703 = vrot.lane.b32.xlu2 %v2606_v19, %s3410_s24  ;;  %s2478_s24 = smov 34  }
 0x1af   : > { %653 = vrot.lane.b32.xlu1 %v2608_v20, %s2471_s30 }
 0x1b6   : > { %839 = vrot.lane.b32.xlu0 %v2606_v19, %s2472_s12  ;;  %666 = vrot.lane.b32.xlu2 %v2608_v20, %s2466_s25 }
 0x1b7   : > { %852 = vrot.lane.b32.xlu1 %v2606_v19, %s2473_s13 }
 0x1be   : > { %854 = vrot.lane.b32.xlu0 %v2608_v20, %s2473_s13  ;;  %865 = vrot.lane.b32.xlu2 %v2606_v19, %s2468_s27 }
 0x1bf   : > { %614 = vrot.lane.b32.xlu1 %v2608_v20, %s2474_s14 }
 0x1c6   : > { %625 = vrot.lane.b32.xlu0 %v2606_v19, %s2475_s15  ;;  %880 = vrot.lane.b32.xlu2 %v2608_v20, %s3416_s28  ;;  %s2481_s28 = smov 112  }
 0x1c7   : > { %813 = vrot.lane.b32.xlu1 %v2606_v19, %s2476_s23 }
 0x1ce   : > { %815 = vrot.lane.b32.xlu0 %v2608_v20, %s2476_s23  ;;  %651 = vrot.lane.b32.xlu2 %v2606_v19, %s2471_s30 }
 0x1cf   : > { %828 = vrot.lane.b32.xlu1 %v2608_v20, %s2477_s26 }
 0x1d0   : > { %v762_v24 = vpop.permute.xlu2 %761 }
 0x1d6   : > { %586 = vrot.lane.b32.xlu0 %v2606_v19, %s2478_s24  ;;  %841 = vrot.lane.b32.xlu2 %v2608_v20, %s2472_s12 }
 0x1d7   : > { %599 = vrot.lane.b32.xlu1 %v2606_v19, %s3424_s18 }
 0x1d8   : > { %v764_v28 = vpop.permute.xlu2 %763 }
 0x1d9   : > { %v766_v29 = vsel %vm3431_vm10, %v762_v24, %v764_v28  ;;  %v767_v30 = vsel %vm3431_vm10, %v764_v28, %v762_v24  ;;  %vm3450_vm10 = vcmp.lt.s32.totalorder %v2569_v27, 34 }
 0x1da   : > { %v770_v31 = vmul.f32 %v3446_v25, %v766_v29  ;;  %v771_v32 = vmul.f32 %v3444_v26, %v767_v30  ;;  %v3433_v30 = vperm.slane %v2597_v15, 0 }
 0x1dc   : > { %v772_v33 = vpack.c.bf16 %v771_v32, %v770_v31  ;;  %v3432_v31 = vperm.slane %v2602_v16, 0  ;;  %v2437_v32 = vld [vmem:[%s3397_s3 + $0x30] ss:$0 sm:$0xff] }
 0x1de   : > { %773 = vst [vmem:[#allocation3 + $0x70] sm:$0xff] %v772_v33  ;;  %601 = vrot.lane.b32.xlu0 %v2608_v20, %s3424_s18  ;;  %612 = vrot.lane.b32.xlu2 %v2606_v19, %s2474_s14  ;;  %v2438_v33 = vld [vmem:[%s3397_s3 + $0x38] ss:$0 sm:$0xff] }
 0x1df   : > { %789 = vrot.lane.b32.xlu1 %v2608_v20, %s2480_s10 }
 0x1e0   : > { %v749_v34 = vpop.permute.xlu2 %748 }
 0x1e5   : > { %v2076_v63 = vld [vmem:[#allocation3 + $0x70] sm:$0xf]  ;;  %v2340_v0 = vld [vmem:[#allocation3 + $0x74] sm:$0xf] }
 0x1e6   : > { %800 = vrot.lane.b32.xlu0 %v2606_v19, %s2481_s28  ;;  %627 = vrot.lane.b32.xlu2 %v2608_v20, %s2475_s15 }
 0x1e8   : > { %v775_v40 = vpop.permute.xlu0 %774  ;;  %v751_v41 = vpop.permute.xlu2 %750 }
 0x1e9   : > { %v777_v42 = vpop.permute.xlu1 %776  ;;  %v753_v43 = vsel %vm752_vm11, %v749_v34, %v751_v41  ;;  %v754_v44 = vsel %vm752_vm11, %v751_v41, %v749_v34 }
 0x1ea   : > { %v779_v45 = vsel %vm3435_vm12, %v775_v40, %v777_v42  ;;  %v780_v46 = vsel %vm3435_vm12, %v777_v42, %v775_v40  ;;  %v757_v47 = vmul.f32 %v755_v36, %v753_v43  ;;  %v758_v48 = vmul.f32 %v756_v37, %v754_v44 }
 0x1eb   : > { %v783_v49 = vmul.f32 %v781_v38, %v779_v45  ;;  %v784_v50 = vmul.f32 %v782_v39, %v780_v46  ;;  %vm3445_vm12 = vcmp.lt.s32.totalorder %v2569_v27, 113 }
 0x1ec   : > { %v759_v51 = vpack.c.bf16 %v758_v48, %v757_v47 }
 0x1ed   : > { %v785_v52 = vpack.c.bf16 %v784_v50, %v783_v49 }
 0x1ee   : > { %760 = vst [vmem:[#allocation3 + $0x68] sm:$0xff] %v759_v51  ;;  %826 = vrot.lane.b32.xlu2 %v2606_v19, %s2477_s26  ;;  %v3439_v51 = vperm.slane %v2597_v15, 1 }
 0x1ef   : > { %786 = vst [vmem:[#allocation3 + $0x78] sm:$0xff] %v785_v52  ;;  %v3437_v52 = vperm.slane %v2602_v16, 1 }
 0x1f0   : > { %v719_v55 = vpop.permute.xlu0 %718  ;;  %v717_v56 = vpop.permute.xlu2 %716 }
 0x1f1   : > { %v732_v57 = vpop.permute.xlu1 %731  ;;  %v721_v58 = vsel %vm3438_vm13, %v717_v56, %v719_v55  ;;  %v722_v59 = vsel %vm3438_vm13, %v719_v55, %v717_v56  ;;  %vm3448_vm13 = vcmp.lt.s32.totalorder %v2569_v27, 112 }
 0x1f2   : > { %v725_v60 = vmul.f32 %v723_v53, %v722_v59  ;;  %v726_v61 = vmul.f32 %v724_v54, %v721_v58 }
 0x1f4   : > { %v727_v62 = vpack.c.bf16 %v726_v61, %v725_v60 }
 0x1f5   : > { %v2339_v9 = vld [vmem:[#allocation3 + $0x64] sm:$0xf0]  ;;  %v2070_v10 = vld [vmem:[#allocation3 + $0x68] sm:$0xf0] }
 0x1f6   : > { %728 = vst [vmem:[#allocation3 + $0x50] sm:$0xff] %v727_v62  ;;  %588 = vrot.lane.b32.xlu2 %v2608_v20, %s2478_s24  ;;  %v2341_v2 = vld [vmem:[#allocation3 + $0x74] sm:$0xf0]  ;;  %v2078_v3 = vld [vmem:[#allocation3 + $0x78] sm:$0xf0]  ;;  %v2069_v24 = vor.u32 %v2339_v9, %v2068_v22  ;;  %v2073_v28 = vor.u32 %v2338_v23, %v2070_v10  ;;  %v2803_v9 = vld [vmem:[%s3397_s3] sm:$0xff] }
 0x1f7   : > { %v2077_v5 = vor.u32 %v2341_v2, %v2076_v63  ;;  %v2081_v6 = vor.u32 %v2340_v0, %v2078_v3  ;;  %v671_v22 = vperm.slane %v2803_v9, 6 }
 0x1f8   : > { %v892_v7 = vpop.permute.xlu0 %891  ;;  %v730_v8 = vpop.permute.xlu2 %729 }
 0x1f9   : > { %v691_v11 = vpop.permute.xlu1 %690  ;;  %1075 = vmatpush.bf16.msra.mxu0 %v2077_v5  ;;  %1101 = vmatpush.bf16.msra.mxu2 %v2081_v6  ;;  %v734_v12 = vsel %vm3429_vm14, %v730_v8, %v732_v57  ;;  %v735_v13 = vsel %vm3429_vm14, %v732_v57, %v730_v8  ;;  %vm830_vm14 = vcmp.lt.s32.totalorder %v2569_v27, 110 }
 0x1fa   : > { %v738_v14 = vmul.f32 %v3441_v1, %v735_v13  ;;  %v739_v21 = vmul.f32 %v3440_v4, %v734_v12  ;;  %v2810_v12 = vld [vmem:[%s3397_s3 + $0x8] sm:$0xff] }
 0x1fb   : > { %v672_v23 = vperm.slane %v2810_v12, 6 }
 0x1fc   : > { %v740_v29 = vpack.c.bf16 %v739_v21, %v738_v14  ;;  %v3436_v14 = vperm.slane %v2803_v9, 7  ;;  %v3434_v21 = vperm.slane %v2810_v12, 7 }
 0x1fd   : > { %1076 = vmatpush.bf16.msra.mxu0 %v2069_v24  ;;  %1102 = vmatpush.bf16.msra.mxu2 %v2073_v28  ;;  %v2060_v55 = vld [vmem:[#allocation3 + $0x50] sm:$0xf]  ;;  %v2336_v57 = vld [vmem:[#allocation3 + $0x54] sm:$0xf] }
 0x1fe   : > { %741 = vst [vmem:[#allocation3 + $0x58] sm:$0xff] %v740_v29  ;;  %787 = vrot.lane.b32.xlu2 %v2606_v19, %s2480_s10 }
 0x200   : > { %v693_v34 = vpop.permute.xlu0 %692  ;;  %v894_v40 = vpop.permute.xlu2 %893 }
 0x201   : > { %v706_v41 = vpop.permute.xlu1 %705  ;;  %v695_v42 = vsel %vm3426_vm15, %v691_v11, %v693_v34  ;;  %v696_v43 = vsel %vm3426_vm15, %v693_v34, %v691_v11  ;;  %v896_v19 = vsel %vm3451_vm1, %v892_v7, %v894_v40  ;;  %v897_v44 = vsel %vm3451_vm1, %v894_v40, %v892_v7 }
 0x202   : > { %v699_v45 = vmul.f32 %v3433_v30, %v696_v43  ;;  %v700_v46 = vmul.f32 %v3432_v31, %v695_v42  ;;  %v900_v47 = vmul.f32 %v2437_v32, %v896_v19  ;;  %v901_v48 = vmul.f32 %v2438_v33, %v897_v44  ;;  %v2837_v44 = vld [vmem:[%s3397_s3 + $0x20] sm:$0xff] }
 0x203   : > { %vm616_vm15 = vcmp.lt.s32.totalorder %v2569_v27, 32 }
 0x204   : > { %v701_v49 = vpack.c.bf16 %v700_v46, %v699_v45  ;;  %v902_v50 = vpack.c.bf16 %v901_v48, %v900_v47  ;;  %v2842_v45 = vld [vmem:[%s3397_s3 + $0x28] sm:$0xff] }
 0x205   : > { %v2337_v56 = vld [vmem:[#allocation3 + $0x54] sm:$0xf0]  ;;  %v2062_v58 = vld [vmem:[#allocation3 + $0x58] sm:$0xf0] }
 0x206   : > { %702 = vst [vmem:[#allocation3 + $0x40] sm:$0xff] %v701_v49  ;;  %802 = vrot.lane.b32.xlu2 %v2608_v20, %s2481_s28  ;;  %v2061_v59 = vor.u32 %v2337_v56, %v2060_v55  ;;  %v2065_v60 = vor.u32 %v2336_v57, %v2062_v58  ;;  %v1013_v61 = vunpack.c.l.b16 %v902_v50  ;;  %v1014_v62 = vunpack.c.h.b16 %v902_v50 }
 0x207   : > { %903 = vst [vmem:[#allocation3 + $0xc0] sm:$0xff] %v902_v50  ;;  %v872_v56 = vperm.slane %v2837_v44, 6  ;;  %v873_v57 = vperm.slane %v2842_v45, 6 }
 0x208   : > { %v665_v63 = vpop.permute.xlu0 %664  ;;  %v704_v0 = vpop.permute.xlu2 %703  ;;  %1077 = vmatpush.bf16.msra.mxu0 %v2061_v59  ;;  %1103 = vmatpush.bf16.msra.mxu2 %v2065_v60  ;;  %v1039_v2 = vpack.c.b16 %v1013_v61, %v1013_v61  ;;  %v1040_v3 = vpack.c.b16 %v1014_v62, %v1014_v62 }
 0x209   : > { %v678_v5 = vpop.permute.xlu1 %677  ;;  %v708_v6 = vsel %vm3428_vm2, %v704_v0, %v706_v41  ;;  %v709_v7 = vsel %vm3428_vm2, %v706_v41, %v704_v0  ;;  %vm629_vm2 = vcmp.lt.s32.totalorder %v2569_v27, 31 }
 0x20a   : > { %v712_v20 = vmul.f32 %v3439_v51, %v709_v7  ;;  %v713_v8 = vmul.f32 %v3437_v52, %v708_v6  ;;  %v1070_v10 = vsel %vm450_vm0, %v1039_v2, 0  ;;  %v1073_v11 = vsel %vm450_vm0, %v1040_v3, 0 }
 0x20b   : > { %1091 = vmatpush.bf16.msra.mxu1 %v1070_v10  ;;  %1117 = vmatpush.bf16.msra.mxu3 %v1073_v11  ;;  %vm869_vm0 = vcmp.lt.s32.totalorder %v2569_v27, 96  ;;  %v645_v6 = vperm.slane %v2803_v9, 4  ;;  %v646_v7 = vperm.slane %v2810_v12, 4  ;;  %v3442_v11 = vperm.slane %v2842_v45, 7 }
 0x20c   : > { %v714_v13 = vpack.c.bf16 %v713_v8, %v712_v20  ;;  %v3443_v20 = vperm.slane %v2837_v44, 7  ;;  %v3447_v52 = vperm.slane %v2842_v45, 0 }
 0x20d   : > { %v2052_v48 = vld [vmem:[#allocation3 + $0x40] sm:$0xf]  ;;  %v2334_v50 = vld [vmem:[#allocation3 + $0x44] sm:$0xf] }
 0x20e   : > { %715 = vst [vmem:[#allocation3 + $0x48] sm:$0xff] %v714_v13 }
 0x210   : > { %v680_v24 = vpop.permute.xlu0 %679  ;;  %v667_v28 = vpop.permute.xlu2 %666 }
 0x211   : > { %v868_v29 = vpop.permute.xlu1 %867  ;;  %v682_v32 = vsel %vm3427_vm3, %v678_v5, %v680_v24  ;;  %v683_v33 = vsel %vm3427_vm3, %v680_v24, %v678_v5  ;;  %v669_v34 = vsel %vm668_vm4, %v665_v63, %v667_v28  ;;  %v670_v40 = vsel %vm668_vm4, %v667_v28, %v665_v63 }
 0x212   : > { %v686_v41 = vmul.f32 %v3436_v14, %v683_v33  ;;  %v687_v42 = vmul.f32 %v3434_v21, %v682_v32  ;;  %v673_v43 = vmul.f32 %v671_v22, %v670_v40  ;;  %v674_v19 = vmul.f32 %v672_v23, %v669_v34 }
 0x213   : > { %vm817_vm3 = vcmp.lt.s32.totalorder %v2569_v27, 111 }
 0x214   : > { %v688_v46 = vpack.c.bf16 %v687_v42, %v686_v41  ;;  %v675_v47 = vpack.c.bf16 %v674_v19, %v673_v43 }
 0x215   : > { %v2335_v49 = vld [vmem:[#allocation3 + $0x44] sm:$0xf0]  ;;  %v2054_v55 = vld [vmem:[#allocation3 + $0x48] sm:$0xf0] }
 0x216   : > { %689 = vst [vmem:[#allocation3 + $0x38] sm:$0xff] %v688_v46  ;;  %v2053_v58 = vor.u32 %v2335_v49, %v2052_v48  ;;  %v2057_v59 = vor.u32 %v2334_v50, %v2054_v55  ;;  %v658_v55 = vperm.slane %v2803_v9, 5 }
 0x217   : > { %676 = vst [vmem:[#allocation3 + $0x30] sm:$0xff] %v675_v47 }
 0x218   : > { %v879_v60 = vpop.permute.xlu0 %878  ;;  %v866_v61 = vpop.permute.xlu2 %865  ;;  %1078 = vmatpush.bf16.msra.mxu0 %v2053_v58  ;;  %1104 = vmatpush.bf16.msra.mxu2 %v2057_v59  ;;  %v659_v58 = vperm.slane %v2810_v12, 5 }
 0x219   : > { %v639_v62 = vpop.permute.xlu1 %638  ;;  %v870_v63 = vsel %vm869_vm0, %v866_v61, %v868_v29  ;;  %v871_v0 = vsel %vm869_vm0, %v868_v29, %v866_v61 }
 0x21a   : > { %v874_v2 = vmul.f32 %v872_v56, %v870_v63  ;;  %v875_v3 = vmul.f32 %v873_v57, %v871_v0 }
 0x21c   : > { %v876_v5 = vpack.c.bf16 %v875_v3, %v874_v2 }
 0x21d   : > { %v2333_v8 = vld [vmem:[#allocation3 + $0x34] sm:$0xf0]  ;;  %v2046_v10 = vld [vmem:[#allocation3 + $0x38] sm:$0xf0] }
 0x21e   : > { %877 = vst [vmem:[#allocation3 + $0xb0] sm:$0xff] %v876_v5  ;;  %v2044_v13 = vld [vmem:[#allocation3 + $0x30] sm:$0xf]  ;;  %v2332_v24 = vld [vmem:[#allocation3 + $0x34] sm:$0xf]  ;;  %v859_v5 = vperm.slane %v2837_v44, 5 }
 0x21f   : > { %v2045_v28 = vor.u32 %v2333_v8, %v2044_v13  ;;  %v2049_v29 = vor.u32 %v2332_v24, %v2046_v10  ;;  %v860_v8 = vperm.slane %v2842_v45, 5 }
 0x220   : > { %v641_v32 = vpop.permute.xlu0 %640  ;;  %v881_v33 = vpop.permute.xlu2 %880 }
 0x221   : > { %v654_v34 = vpop.permute.xlu1 %653  ;;  %v643_v40 = vsel %vm642_vm5, %v639_v62, %v641_v32  ;;  %v644_v41 = vsel %vm642_vm5, %v641_v32, %v639_v62  ;;  %v883_v42 = vsel %vm3430_vm6, %v879_v60, %v881_v33  ;;  %v884_v43 = vsel %vm3430_vm6, %v881_v33, %v879_v60  ;;  %1079 = vmatpush.bf16.msra.mxu0 %v2045_v28 }
 0x222   : > { %v647_v19 = vmul.f32 %v645_v6, %v644_v41  ;;  %v648_v46 = vmul.f32 %v646_v7, %v643_v40  ;;  %v887_v47 = vmul.f32 %v3443_v20, %v883_v42  ;;  %v888_v48 = vmul.f32 %v3442_v11, %v884_v43  ;;  %1105 = vmatpush.bf16.msra.mxu2 %v2049_v29  ;;  %v2174_v11 = vld [vmem:[#allocation3 + $0x70] sm:$0xf] }
 0x223   : > { %v846_v29 = vperm.slane %v2837_v44, 4  ;;  %vm603_vm6 = vcmp.lt.s32.totalorder %v2569_v27, 33 }
 0x224   : > { %v649_v49 = vpack.c.bf16 %v648_v46, %v647_v19  ;;  %v889_v50 = vpack.c.bf16 %v888_v48, %v887_v47 }
 0x225   : > { %v2108_v10 = vld [vmem:[#allocation3 + $0xb0] sm:$0xf]  ;;  %v2348_v13 = vld [vmem:[#allocation3 + $0xb4] sm:$0xf] }
 0x226   : > { %650 = vst [vmem:[#allocation3 + $0x20] sm:$0xff] %v649_v49 }
 0x227   : > { %890 = vst [vmem:[#allocation3 + $0xb8] sm:$0xff] %v889_v50 }
 0x228   : > { %v840_v59 = vpop.permute.xlu0 %839  ;;  %v652_v60 = vpop.permute.xlu2 %651 }
 0x229   : > { %v853_v61 = vpop.permute.xlu1 %852  ;;  %v656_v62 = vsel %vm655_vm7, %v652_v60, %v654_v34  ;;  %v657_v63 = vsel %vm655_vm7, %v654_v34, %v652_v60  ;;  %v847_v34 = vperm.slane %v2842_v45, 4 }
 0x22a   : > { %v660_v0 = vmul.f32 %v658_v55, %v657_v63  ;;  %v661_v2 = vmul.f32 %v659_v58, %v656_v62 }
 0x22c   : > { %v662_v3 = vpack.c.bf16 %v661_v2, %v660_v0 }
 0x22d   : > { %v2036_v62 = vld [vmem:[#allocation3 + $0x20] sm:$0xf]  ;;  %v2330_v2 = vld [vmem:[#allocation3 + $0x24] sm:$0xf] }
 0x22e   : > { %663 = vst [vmem:[#allocation3 + $0x28] sm:$0xff] %v662_v3  ;;  %v2349_v24 = vld [vmem:[#allocation3 + $0xb4] sm:$0xf0]  ;;  %v2110_v28 = vld [vmem:[#allocation3 + $0xb8] sm:$0xf0] }
 0x22f   : > { %v2109_v32 = vor.u32 %v2349_v24, %v2108_v10  ;;  %v2113_v33 = vor.u32 %v2348_v13, %v2110_v28  ;;  %v619_v10 = vperm.slane %v2803_v9, 2  ;;  %v620_v13 = vperm.slane %v2810_v12, 2 }
 0x230   : > { %v855_v40 = vpop.permute.xlu0 %854  ;;  %v842_v41 = vpop.permute.xlu2 %841 }
 0x231   : > { %v615_v42 = vpop.permute.xlu1 %614  ;;  %v857_v43 = vsel %vm856_vm8, %v853_v61, %v855_v40  ;;  %v858_v19 = vsel %vm856_vm8, %v855_v40, %v853_v61  ;;  %1092 = vmatpush.bf16.msra.mxu1 %v2109_v32  ;;  %1118 = vmatpush.bf16.msra.mxu3 %v2113_v33  ;;  %v844_v46 = vsel %vm3449_vm9, %v840_v59, %v842_v41 }
 0x232   : > { %v861_v47 = vmul.f32 %v859_v5, %v857_v43  ;;  %v862_v48 = vmul.f32 %v860_v8, %v858_v19  ;;  %v845_v49 = vsel %vm3449_vm9, %v842_v41, %v840_v59  ;;  %v848_v50 = vmul.f32 %v846_v29, %v844_v46 }
 0x233   : > { %v849_v60 = vmul.f32 %v847_v34, %v845_v49 }
 0x234   : > { %v863_v61 = vpack.c.bf16 %v862_v48, %v861_v47  ;;  %v820_v47 = vperm.slane %v2837_v44, 2  ;;  %v821_v48 = vperm.slane %v2842_v45, 2 }
 0x235   : > { %v850_v63 = vpack.c.bf16 %v849_v60, %v848_v50  ;;  %v2331_v0 = vld [vmem:[#allocation3 + $0x24] sm:$0xf0]  ;;  %v2038_v3 = vld [vmem:[#allocation3 + $0x28] sm:$0xf0] }
 0x236   : > { %864 = vst [vmem:[#allocation3 + $0xa8] sm:$0xff] %v863_v61  ;;  %v2037_v59 = vor.u32 %v2331_v0, %v2036_v62  ;;  %v2041_v24 = vor.u32 %v2330_v2, %v2038_v3  ;;  %v633_v61 = vperm.slane %v2810_v12, 3  ;;  %v632_v0 = vperm.slane %v2803_v9, 3 }
 0x237   : > { %851 = vst [vmem:[#allocation3 + $0xa0] sm:$0xff] %v850_v63 }
 0x238   : > { %v626_v28 = vpop.permute.xlu0 %625  ;;  %v613_v32 = vpop.permute.xlu2 %612  ;;  %1080 = vmatpush.bf16.msra.mxu0 %v2037_v59  ;;  %1106 = vmatpush.bf16.msra.mxu2 %v2041_v24 }
 0x239   : > { %v617_v33 = vsel %vm616_vm15, %v613_v32, %v615_v42  ;;  %v618_v40 = vsel %vm616_vm15, %v615_v42, %v613_v32  ;;  %v814_v41 = vpop.permute.xlu1 %813 }
 0x23a   : > { %v621_v43 = vmul.f32 %v619_v10, %v618_v40  ;;  %v622_v19 = vmul.f32 %v620_v13, %v617_v33 }
 0x23c   : > { %v623_v46 = vpack.c.bf16 %v622_v19, %v621_v43 }
 0x23d   : > { %v2347_v49 = vld [vmem:[#allocation3 + $0xa4] sm:$0xf0]  ;;  %v2102_v50 = vld [vmem:[#allocation3 + $0xa8] sm:$0xf0] }
 0x23e   : > { %624 = vst [vmem:[#allocation3 + $0x10] sm:$0xff] %v623_v46  ;;  %v2100_v42 = vld [vmem:[#allocation3 + $0xa0] sm:$0xf]  ;;  %v2346_v60 = vld [vmem:[#allocation3 + $0xa4] sm:$0xf] }
 0x23f   : > { %v2101_v62 = vor.u32 %v2347_v49, %v2100_v42  ;;  %v2105_v63 = vor.u32 %v2346_v60, %v2102_v50  ;;  %v833_v42 = vperm.slane %v2837_v44, 3  ;;  %v834_v60 = vperm.slane %v2842_v45, 3 }
 0x240   : > { %v816_v2 = vpop.permute.xlu0 %815  ;;  %v628_v3 = vpop.permute.xlu2 %627 }
 0x241   : > { %v818_v59 = vsel %vm817_vm3, %v814_v41, %v816_v2  ;;  %v819_v24 = vsel %vm817_vm3, %v816_v2, %v814_v41  ;;  %1093 = vmatpush.bf16.msra.mxu1 %v2101_v62  ;;  %1119 = vmatpush.bf16.msra.mxu3 %v2105_v63  ;;  %v630_v32 = vsel %vm629_vm2, %v626_v28, %v628_v3  ;;  %v829_v46 = vpop.permute.xlu1 %828 }
 0x242   : > { %v822_v33 = vmul.f32 %v820_v47, %v818_v59  ;;  %v823_v40 = vmul.f32 %v821_v48, %v819_v24  ;;  %v631_v43 = vsel %vm629_vm2, %v628_v3, %v626_v28  ;;  %v635_v19 = vmul.f32 %v633_v61, %v630_v32 }
 0x243   : > { %v634_v41 = vmul.f32 %v632_v0, %v631_v43  ;;  %v606_v32 = vperm.slane %v2803_v9, 1 }
 0x244   : > { %v824_v49 = vpack.c.bf16 %v823_v40, %v822_v33  ;;  %v607_v33 = vperm.slane %v2810_v12, 1  ;;  %v593_v40 = vperm.slane %v2803_v9, 0 }
 0x245   : > { %v636_v50 = vpack.c.bf16 %v635_v19, %v634_v41  ;;  %v2028_v43 = vld [vmem:[#allocation3 + $0x10] sm:$0xf]  ;;  %v2328_v19 = vld [vmem:[#allocation3 + $0x14] sm:$0xf] }
 0x246   : > { %825 = vst [vmem:[#allocation3 + $0x90] sm:$0xff] %v824_v49 }
 0x247   : > { %637 = vst [vmem:[#allocation3 + $0x18] sm:$0xff] %v636_v50 }
 0x248   : > { %v587_v62 = vpop.permute.xlu0 %586  ;;  %v827_v63 = vpop.permute.xlu2 %826 }
 0x249   : > { %v831_v28 = vsel %vm830_vm14, %v827_v63, %v829_v46  ;;  %v832_v2 = vsel %vm830_vm14, %v829_v46, %v827_v63  ;;  %v600_v41 = vpop.permute.xlu1 %599  ;;  %v594_v46 = vperm.slane %v2810_v12, 0 }
 0x24a   : > { %v835_v3 = vmul.f32 %v833_v42, %v831_v28  ;;  %v836_v59 = vmul.f32 %v834_v60, %v832_v2 }
 0x24c   : > { %v837_v24 = vpack.c.bf16 %v836_v59, %v835_v3 }
 0x24e   : > { %838 = vst [vmem:[#allocation3 + $0x98] sm:$0xff] %v837_v24  ;;  %v2329_v49 = vld [vmem:[#allocation3 + $0x14] sm:$0xf0]  ;;  %v2030_v50 = vld [vmem:[#allocation3 + $0x18] sm:$0xf0] }
 0x24f   : > { %v2029_v63 = vor.u32 %v2329_v49, %v2028_v43  ;;  %v2033_v28 = vor.u32 %v2328_v19, %v2030_v50 }
 0x250   : > { %v602_v2 = vpop.permute.xlu0 %601  ;;  %v589_v3 = vpop.permute.xlu2 %588 }
 0x251   : > { %v604_v59 = vsel %vm603_vm6, %v600_v41, %v602_v2  ;;  %v605_v31 = vsel %vm603_vm6, %v602_v2, %v600_v41  ;;  %v591_v30 = vsel %vm3450_vm10, %v587_v62, %v589_v3  ;;  %v592_v24 = vsel %vm3450_vm10, %v589_v3, %v587_v62  ;;  %1081 = vmatpush.bf16.msra.mxu0 %v2029_v63  ;;  %v2092_v2 = vld [vmem:[#allocation3 + $0x90] sm:$0xf]  ;;  %v2344_v63 = vld [vmem:[#allocation3 + $0x94] sm:$0xf] }
 0x252   : > { %v608_v21 = vmul.f32 %v606_v32, %v605_v31  ;;  %v609_v43 = vmul.f32 %v607_v33, %v604_v59  ;;  %v595_v19 = vmul.f32 %v593_v40, %v592_v24  ;;  %v596_v49 = vmul.f32 %v594_v46, %v591_v30  ;;  %1107 = vmatpush.bf16.msra.mxu2 %v2033_v28  ;;  %v790_v24 = vpop.permute.xlu1 %789 }
 0x253   : > { %v794_v59 = vperm.slane %v2837_v44, 0 }
 0x254   : > { %v610_v41 = vpack.c.bf16 %v609_v43, %v608_v21  ;;  %v597_v50 = vpack.c.bf16 %v596_v49, %v595_v19  ;;  %v441_v43 = vld [vmem:[%s3398_s4] sm:$0xff] }
 0x255   : > { %v2345_v62 = vld [vmem:[#allocation3 + $0x94] sm:$0xf0]  ;;  %v2094_v3 = vld [vmem:[#allocation3 + $0x98] sm:$0xf0] }
 0x256   : > { %611 = vst [vmem:[#allocation3 + $0x8] sm:$0xff] %v610_v41  ;;  %v2093_v31 = vor.u32 %v2345_v62, %v2092_v2  ;;  %v2097_v14 = vor.u32 %v2344_v63, %v2094_v3  ;;  %v808_v63 = vperm.slane %v2842_v45, 1 }
 0x257   : > { %598 = vst [vmem:[#allocation3] sm:$0xff] %v597_v50  ;;  %v807_v50 = vperm.slane %v2837_v44, 1 }
 0x258   : > { %1094 = vmatpush.bf16.msra.mxu1 %v2093_v31  ;;  %1120 = vmatpush.bf16.msra.mxu3 %v2097_v14  ;;  %v788_v30 = vpop.permute.xlu2 %787  ;;  %v935_v14 = vunpack.c.l.b16 %v441_v43 }
 0x259   : > { %v792_v21 = vsel %vm3445_vm12, %v788_v30, %v790_v24  ;;  %v793_v28 = vsel %vm3445_vm12, %v790_v24, %v788_v30  ;;  %v2482_v24 = vmov 0   ;;  %vm1065_vm12 = vcmask 588800  }
 0x25a   : > { %v796_v19 = vmul.f32 %v794_v59, %v792_v21  ;;  %v797_v49 = vmul.f32 %v3447_v52, %v793_v28  ;;  %2434 = vset.pattern.permute.xlu1 %v2482_v24  ;;  %2435 = vset.pattern.permute.xlu2 %v2482_v24  ;;  %v801_v28 = vpop.permute.xlu0 %800 }
 0x25b   : > { %2436 = vset.pattern.permute.xlu0 %v2482_v24  ;;  %v2365_v24 = vld [vmem:[#allocation3 + $0x74] sm:$0xf0] }
 0x25c   : > { %v798_v41 = vpack.c.bf16 %v797_v49, %v796_v19  ;;  %v937_v49 = vpack.c.b16 %v935_v14, %v935_v14  ;;  %v2175_v20 = vor.u32 %v2365_v24, %v2174_v11  ;;  %v2357_v11 = vld [vmem:[#allocation3 + $0x34] sm:$0xf0]  ;;  %v2134_v24 = vld [vmem:[#allocation3 + $0x20] sm:$0xf] }
 0x25d   : > { %v2327_v2 = vld [vmem:[#allocation3 + $0x4] sm:$0xf0]  ;;  %v2022_v62 = vld [vmem:[#allocation3 + $0x8] sm:$0xf0] }
 0x25e   : > { %799 = vst [vmem:[#allocation3 + $0x80] sm:$0xff] %v798_v41  ;;  %v2020_v3 = vld [vmem:[#allocation3] sm:$0xf]  ;;  %v2326_v31 = vld [vmem:[#allocation3 + $0x4] sm:$0xf]  ;;  %v442_v41 = vld [vmem:[%s3399_s5] sm:$0xff] }
 0x25f   : > { %v2021_v30 = vor.u32 %v2327_v2, %v2020_v3  ;;  %v2025_v21 = vor.u32 %v2326_v31, %v2022_v62  ;;  %931 = vperm.xlu1 %2434, %v442_v41   ;;  %v936_v3 = vunpack.c.h.b16 %v441_v43  ;;  %v2361_v43 = vld [vmem:[#allocation3 + $0x54] sm:$0xf0]  ;;  %v2158_v41 = vld [vmem:[#allocation3 + $0x50] sm:$0xf] }
 0x260   : > { %v803_v19 = vpop.permute.xlu2 %802 }
 0x261   : > { %v805_v51 = vsel %vm3448_vm13, %v801_v28, %v803_v19  ;;  %v806_v4 = vsel %vm3448_vm13, %v803_v19, %v801_v28  ;;  %1082 = vmatpush.bf16.msra.mxu0 %v2021_v30  ;;  %1108 = vmatpush.bf16.msra.mxu2 %v2025_v21  ;;  %v938_v26 = vpack.c.b16 %v936_v3, %v936_v3 }
 0x262   : > { %v809_v2 = vmul.f32 %v807_v50, %v805_v51  ;;  %v810_v62 = vmul.f32 %v808_v63, %v806_v4  ;;  %v2363_v4 = vld [vmem:[#allocation3 + $0x64] sm:$0xf0]  ;;  %v2166_v51 = vld [vmem:[#allocation3 + $0x60] sm:$0xf] }
 0x264   : > { %v811_v14 = vpack.c.bf16 %v810_v62, %v809_v2  ;;  %1109 = vmatmul.bf16.vlgmr.msra.gmra.mxu2 %v937_v49  ;;  %1083 = vmatmul.bf16.vlgmr.msra.gmra.mxu0 %v937_v49  ;;  %v2167_v49 = vor.u32 %v2363_v4, %v2166_v51  ;;  %v2159_v2 = vor.u32 %v2361_v43, %v2158_v41  ;;  %v2359_v62 = vld [vmem:[#allocation3 + $0x44] sm:$0xf0] }
 0x265   : > { %v2084_v31 = vld [vmem:[#allocation3 + $0x80] sm:$0xf]  ;;  %v2342_v21 = vld [vmem:[#allocation3 + $0x84] sm:$0xf]  ;;  %v2351_v4 = vld [vmem:[#allocation3 + $0x4] sm:$0xf0] }
 0x266   : > { %812 = vst [vmem:[#allocation3 + $0x88] sm:$0xff] %v811_v14  ;;  %v2150_v14 = vld [vmem:[#allocation3 + $0x40] sm:$0xf] }
 0x26d   : > { %v2343_v30 = vld [vmem:[#allocation3 + $0x84] sm:$0xf0]  ;;  %v2086_v28 = vld [vmem:[#allocation3 + $0x88] sm:$0xf0] }
 0x26e   : > { %v2085_v19 = vor.u32 %v2343_v30, %v2084_v31  ;;  %v2089_v1 = vor.u32 %v2342_v21, %v2086_v28  ;;  %v2151_v31 = vor.u32 %v2359_v62, %v2150_v14  ;;  %v2142_v30 = vld [vmem:[#allocation3 + $0x30] sm:$0xf]  ;;  %v2353_v21 = vld [vmem:[#allocation3 + $0x14] sm:$0xf0] }
 0x26f   : > { %v2143_v3 = vor.u32 %v2357_v11, %v2142_v30 }
 0x270   : > { %1095 = vmatpush.bf16.msra.mxu1 %v2085_v19  ;;  %1121 = vmatpush.bf16.msra.mxu3 %v2089_v1  ;;  %v2355_v1 = vld [vmem:[#allocation3 + $0x24] sm:$0xf0]  ;;  %v2118_v19 = vld [vmem:[#allocation3] sm:$0xf] }
 0x271   : > { %v2119_v51 = vor.u32 %v2351_v4, %v2118_v19 }
 0x273   : > { %2114 = vmatmul.msk.bf16.vlgmr.msra.gmra.mxu1 %vm1065_vm12, %v938_v26  ;;  %2115 = vmatmul.msk.bf16.vlgmr.msra.gmra.mxu3 %vm1065_vm12, %v938_v26  ;;  %v2126_v26 = vld [vmem:[#allocation3 + $0x10] sm:$0xf] }
 0x274   : > { %1730 = vmatpush.bf16.msrb.mxu1 %v2175_v20  ;;  %v2135_v20 = vor.u32 %v2355_v1, %v2134_v24  ;;  %v2127_v28 = vor.u32 %v2353_v21, %v2126_v26 }
 0x278   : > { %1731 = vmatpush.bf16.msrb.mxu1 %v2167_v49 }
 0x27c   : > { %1732 = vmatpush.bf16.msrb.mxu1 %v2159_v2 }
 0x280   : > { %1733 = vmatpush.bf16.msrb.mxu1 %v2151_v31 }
 0x284   : > { %1734 = vmatpush.bf16.msrb.mxu1 %v2143_v3 }
 0x288   : > { %1735 = vmatpush.bf16.msrb.mxu1 %v2135_v20 }
 0x28c   : > { %1736 = vmatpush.bf16.msrb.mxu1 %v2127_v28 }
 0x290   : > { %1737 = vmatpush.bf16.msrb.mxu1 %v2119_v51 }
 0x2d1   : > { %v932_v2 = vpop.permute.xlu1 %931 }
 0x2e1   : > { %v1084_v49 = vpop.f32.mrf.mxu0 }
 0x2e2   : > { %v1085_v62 = vadd.f32 %v1084_v49, %v932_v2 }
 0x2e7   : > { %v1110_v43 = vpop.f32.mrf.mxu2 }
 0x2e8   : > { %v1111_v11 = vadd.f32 %v1110_v43, %v932_v2 }
 0x2e9   : > { %v1086_v41 = vpop.f32.mrf.mxu0 }
 0x2ef   : > { %v1112_v14 = vpop.f32.mrf.mxu2 }
 0x2f0   : > { %v1097_v31 = vpop.f32.mrf.mxu1 }
 0x2f1   : > { %v1098_v30 = vadd.f32 %v1097_v31, %v1085_v62 }
 0x2f3   : > { %v1130_v24 = vmul.f32 %v1098_v30, %v1098_v30 }
 0x2f6   : > { %v1123_v3 = vpop.f32.mrf.mxu3 }
 0x2f7   : > { %v1124_v1 = vadd.f32 %v1123_v3, %v1111_v11 }
 0x2f8   : > { %v1099_v20 = vpop.f32.mrf.mxu1 }
 0x2f9   : > { %v1127_v25 = vadd.f32 %v1124_v1, %v1098_v30  ;;  %v1131_v21 = vmul.f32 %v1124_v1, %v1124_v1 }
 0x2fb   : > { %1128 = vadd.xlane.f32.xlu0 %v1127_v25  ;;  %v1132_v26 = vadd.f32 %v1131_v21, %v1130_v24 }
 0x2fd   : > { %1133 = vadd.xlane.f32.xlu2 %v1132_v26 }
 0x2fe   : > { %v1125_v28 = vpop.f32.mrf.mxu3 }
 0x36e   : > { %v1129_v19 = vpop.xlane.xlu0 %1128 }
 0x36f   : > { %v1135_v4 = vmul.f32 0.00390625, %v1129_v19 }
 0x370   : > { %v1134_v51 = vpop.xlane.xlu2 %1133 }
 0x371   : > { %v1136_v41 = vmul.f32 0.00390625, %v1134_v51  ;;  %v1137_v52 = vmul.f32 %v1135_v4, %v1135_v4  ;;  %v1139_v25 = vsub.f32 %v1098_v30, %v1135_v4  ;;  %v1140_v24 = vsub.f32 %v1124_v1, %v1135_v4 }
 0x373   : > { %v1138_v49 = vsub.f32 %v1136_v41, %v1137_v52 }
 0x375   : > { %v1141_v14 = vadd.f32 1e-05, %v1138_v49 }
 0x377   : > { %2443 = vrsqrt.f32 %v1141_v14  ;;  %vm1148_vm13 = vweird.f32 %v1141_v14 }
 0x37d   : > { %v2444_v62 = vpop.eup %2443 }
 0x37e   : > { %v1143_v43 = vmul.f32 %v2444_v62, %v1141_v14  ;;  %vm1149_vm12 = vweird.f32 %v2444_v62 }
 0x37f   : > { %vm1150_vm9 = vmor %vm1148_vm13, %vm1149_vm12  ;;  %vm3464_vm13 = vcmp.lt.s32.totalorder %v2569_v27, 34 }
 0x380   : > { %v1144_v2 = vmul.f32 %v2444_v62, %v1143_v43 }
 0x382   : > { %v1145_v31 = vmul.f32 0.5, %v1144_v2 }
 0x384   : > { %v1146_v11 = vsub.f32 1.5, %v1145_v31 }
 0x386   : > { %v1147_v3 = vmul.f32 %v2444_v62, %v1146_v11 }
 0x388   : > { %v1151_v20 = vsel %vm1150_vm9, %v2444_v62, %v1147_v3  ;;  %vm3477_vm9 = vcmp.lt.s32.totalorder %v2569_v27, 126 }
 0x389   : > { %v1152_v21 = vmul.f32 %v1151_v20, %v1139_v25  ;;  %v1153_v26 = vmul.f32 %v1151_v20, %v1140_v24  ;;  %vm3478_vm12 = vmmov %vm3477_vm9 }
 0x38b   : > { %vm1154_vm10 = vcmp.ge.f32.partialorder %v1152_v21, 0.0  ;;  %vm1155_vm1 = vcmp.ge.f32.partialorder %v1153_v26, 0.0  ;;  %v1156_v52 = vmul.f32 %v1152_v21, %v2574_v35  ;;  %v1157_v28 = vmul.f32 %v1153_v26, %v2574_v35 }
 0x38d   : > { %v3006_v19 = vsel %vm1154_vm10, %v1152_v21, %v1156_v52  ;;  %v3008_v51 = vsel %vm1155_vm1, %v1153_v26, %v1157_v28  ;;  %vm3462_vm10 = vcmp.lt.s32.totalorder %v2569_v27, 94 }
 0x38e   : > { %1206 = vrot.lane.b32.xlu2 %v3008_v51, %s2470_s29  ;;  %1196 = vrot.lane.b32.xlu0 %v3008_v51, %s2475_s15  ;;  %v1284_v30 = vmul.f32 %v3006_v19, %v742_v17  ;;  %v1285_v1 = vmul.f32 %v3008_v51, %v743_v18 }
 0x38f   : > { %1214 = vrot.lane.b32.xlu1 %v3006_v19, %s2471_s30 }
 0x390   : > { %v1286_v4 = vpack.c.bf16 %v1285_v1, %v1284_v30 }
 0x392   : > { %1287 = vst [vmem:[#allocation3 + $0x128] sm:$0xff] %v1286_v4 }
 0x396   : > { %1368 = vrot.lane.b32.xlu2 %v3006_v19, %s2473_s13  ;;  %1184 = vrot.lane.b32.xlu0 %v3006_v19, %s2474_s14 }
 0x397   : > { %1216 = vrot.lane.b32.xlu1 %v3008_v51, %s2471_s30  ;;  %s3454_s30 = smov 126  }
 0x39e   : > { %1380 = vrot.lane.b32.xlu2 %v3008_v51, %s2468_s27  ;;  %1370 = vrot.lane.b32.xlu0 %v3008_v51, %s2473_s13  ;;  %s3457_s13 = smov 1  }
 0x39f   : > { %1224 = vrot.lane.b32.xlu1 %v3006_v19, %s2466_s25 }
 0x3a6   : > { %1348 = vrot.lane.b32.xlu2 %v3006_v19, %s2477_s26  ;;  %1164 = vrot.lane.b32.xlu0 %v3006_v19, %s2478_s24 }
 0x3a7   : > { %1226 = vrot.lane.b32.xlu1 %v3008_v51, %s2466_s25  ;;  %s3452_s25 = smov 33  }
 0x3ae   : > { %1360 = vrot.lane.b32.xlu2 %v3008_v51, %s2472_s12  ;;  %1350 = vrot.lane.b32.xlu0 %v3008_v51, %s2477_s26  ;;  %s3453_s26 = smov 127  }
 0x3af   : > { %1194 = vrot.lane.b32.xlu1 %v3006_v19, %s2475_s15  ;;  %s3458_s15 = smov 2  }
 0x3b6   : > { %1338 = vrot.lane.b32.xlu2 %v3006_v19, %s2476_s23  ;;  %1328 = vrot.lane.b32.xlu0 %v3006_v19, %s2481_s28 }
 0x3b7   : > { %1204 = vrot.lane.b32.xlu1 %v3006_v19, %s2470_s29  ;;  %s3456_s29 = smov 95  }
 0x3be   : > { %1310 = vrot.lane.b32.xlu2 %v3008_v51, %s2458_s16  ;;  %1340 = vrot.lane.b32.xlu0 %v3008_v51, %s2476_s23  ;;  %s3455_s23 = smov 94  }
 0x3bf   : > { %1174 = vrot.lane.b32.xlu1 %v3006_v19, %s3452_s25 }
 0x3c6   : > { %1288 = vrot.lane.b32.xlu2 %v3006_v19, %s3453_s26  ;;  %1318 = vrot.lane.b32.xlu0 %v3006_v19, %s2480_s10 }
 0x3c7   : > { %1176 = vrot.lane.b32.xlu1 %v3008_v51, %s3452_s25 }
 0x3ce   : > { %1300 = vrot.lane.b32.xlu2 %v3008_v51, %s3454_s30  ;;  %1290 = vrot.lane.b32.xlu0 %v3008_v51, %s3453_s26 }
 0x3cf   : > { %1186 = vrot.lane.b32.xlu1 %v3008_v51, %s2474_s14  ;;  %s3459_s14 = smov 14  }
 0x3d6   : > { %1398 = vrot.lane.b32.xlu2 %v3006_v19, %s3455_s23  ;;  %1388 = vrot.lane.b32.xlu0 %v3006_v19, %s3456_s29 }
 0x3d7   : > { %1378 = vrot.lane.b32.xlu1 %v3006_v19, %s2468_s27 }
 0x3de   : > { %1276 = vrot.lane.b32.xlu2 %v3008_v51, %s3457_s13  ;;  %1400 = vrot.lane.b32.xlu0 %v3008_v51, %s3455_s23 }
 0x3df   : > { %1166 = vrot.lane.b32.xlu1 %v3008_v51, %s2478_s24  ;;  %s3461_s24 = smov 15  }
 0x3e6   : > { %1264 = vrot.lane.b32.xlu2 %v3006_v19, %s3458_s15  ;;  %1254 = vrot.lane.b32.xlu0 %v3006_v19, %s3459_s14 }
 0x3e7   : > { %1358 = vrot.lane.b32.xlu1 %v3006_v19, %s2472_s12 }
 0x3e8   : > { %v3094_v17 = vpop.permute.xlu2 %1206 }
 0x3ee   : > { %1236 = vrot.lane.b32.xlu2 %v3008_v51, %s3460_s17  ;;  %1266 = vrot.lane.b32.xlu0 %v3008_v51, %s3458_s15  ;;  %s2325_s15 = sshll.u32 %s3502_s20, 4 }
 0x3ef   : > { %1330 = vrot.lane.b32.xlu1 %v3008_v51, %s2481_s28 }
 0x3f0   : > { %v1369_v18 = vpop.permute.xlu2 %1368 }
 0x3f6   : > { %1244 = vrot.lane.b32.xlu0 %v3006_v19, %s3461_s24 }
 0x3f7   : > { %1308 = vrot.lane.b32.xlu1 %v3006_v19, %s2458_s16 }
 0x3f8   : > { %v3102_v14 = vpop.permute.xlu2 %1380 }
 0x3ff   : > { %1320 = vrot.lane.b32.xlu1 %v3008_v51, %s2480_s10 }
 0x400   : > { %v1197_v41 = vpop.permute.xlu0 %1196  ;;  %v1349_v24 = vpop.permute.xlu2 %1348 }
 0x401   : > { %v1215_v49 = vpop.permute.xlu1 %1214 }
 0x407   : > { %1298 = vrot.lane.b32.xlu1 %v3006_v19, %s3454_s30 }
 0x408   : > { %v3106_v62 = vpop.permute.xlu0 %1184  ;;  %v3130_v4 = vpop.permute.xlu2 %1360 }
 0x409   : > { %v1217_v43 = vpop.permute.xlu1 %1216 }
 0x40a   : > { %v1218_v2 = vsel %vm655_vm7, %v1215_v49, %v1217_v43  ;;  %v1219_v31 = vsel %vm655_vm7, %v1217_v43, %v1215_v49  ;;  %vm3474_vm7 = vcmp.lt.s32.totalorder %v2569_v27, 113 }
 0x40b   : > { %v1220_v11 = vmul.f32 %v1219_v31, %v658_v55  ;;  %v1221_v3 = vmul.f32 %v1218_v2, %v659_v58 }
 0x40d   : > { %v1222_v25 = vpack.c.bf16 %v1221_v3, %v1220_v11 }
 0x40f   : > { %1223 = vst [vmem:[#allocation3 + $0xf0] sm:$0xff] %v1222_v25  ;;  %1390 = vrot.lane.b32.xlu1 %v3008_v51, %s3456_s29 }
 0x410   : > { %v1371_v20 = vpop.permute.xlu0 %1370 }
 0x411   : > { %v1372_v21 = vsel %vm856_vm8, %v1369_v18, %v1371_v20  ;;  %v1373_v26 = vsel %vm856_vm8, %v1371_v20, %v1369_v18  ;;  %v1225_v52 = vpop.permute.xlu1 %1224  ;;  %vm3475_vm8 = vmmov %vm3474_vm7 }
 0x412   : > { %v1374_v55 = vmul.f32 %v1372_v21, %v859_v5  ;;  %v1375_v58 = vmul.f32 %v1373_v26, %v860_v8 }
 0x414   : > { %v1376_v28 = vpack.c.bf16 %v1375_v58, %v1374_v55 }
 0x416   : > { %1377 = vst [vmem:[#allocation3 + $0x170] sm:$0xff] %v1376_v28  ;;  %v2238_v58 = vld [vmem:[#allocation3 + $0xf0] sm:$0xf] }
 0x417   : > { %1274 = vrot.lane.b32.xlu1 %v3006_v19, %s3457_s13 }
 0x418   : > { %v3128_v30 = vpop.permute.xlu0 %1164 }
 0x419   : > { %v1227_v1 = vpop.permute.xlu1 %1226 }
 0x41a   : > { %v1228_v18 = vsel %vm668_vm4, %v1225_v52, %v1227_v1  ;;  %v1229_v49 = vsel %vm668_vm4, %v1227_v1, %v1225_v52  ;;  %vm3470_vm4 = vcmp.lt.s32.totalorder %v2569_v27, 112 }
 0x41b   : > { %v1230_v5 = vmul.f32 %v1229_v49, %v671_v22  ;;  %v1231_v8 = vmul.f32 %v1228_v18, %v672_v23 }
 0x41d   : > { %v1232_v43 = vpack.c.bf16 %v1231_v8, %v1230_v5 }
 0x41f   : > { %1233 = vst [vmem:[#allocation3 + $0xf8] sm:$0xff] %v1232_v43  ;;  %1256 = vrot.lane.b32.xlu1 %v3008_v51, %s3459_s14 }
 0x420   : > { %v1351_v2 = vpop.permute.xlu0 %1350 }
 0x421   : > { %v1352_v31 = vsel %vm830_vm14, %v1349_v24, %v1351_v2  ;;  %v1353_v11 = vsel %vm830_vm14, %v1351_v2, %v1349_v24  ;;  %v1195_v3 = vpop.permute.xlu1 %1194  ;;  %v1339_v24 = vpop.permute.xlu2 %1338  ;;  %vm3465_vm14 = vmmov %vm3464_vm13 }
 0x422   : > { %v1354_v25 = vmul.f32 %v1352_v31, %v833_v42  ;;  %v1355_v22 = vmul.f32 %v1353_v11, %v834_v60  ;;  %v1198_v23 = vsel %vm629_vm2, %v1195_v3, %v1197_v41  ;;  %v1199_v20 = vsel %vm629_vm2, %v1197_v41, %v1195_v3  ;;  %v2380_v42 = vld [vmem:[#allocation3 + $0xf4] sm:$0xf] }
 0x423   : > { %v1200_v21 = vmul.f32 %v1199_v20, %v632_v0  ;;  %v1201_v26 = vmul.f32 %v1198_v23, %v633_v61  ;;  %vm3468_vm2 = vcmp.lt.s32.totalorder %v2569_v27, 2 }
 0x424   : > { %v1356_v52 = vpack.c.bf16 %v1355_v22, %v1354_v25 }
 0x425   : > { %v1202_v55 = vpack.c.bf16 %v1201_v26, %v1200_v21 }
 0x426   : > { %1357 = vst [vmem:[#allocation3 + $0x160] sm:$0xff] %v1356_v52  ;;  %v2381_v28 = vld [vmem:[#allocation3 + $0xf4] sm:$0xf0]  ;;  %v2240_v60 = vld [vmem:[#allocation3 + $0xf8] sm:$0xf0] }
 0x427   : > { %1203 = vst [vmem:[#allocation3 + $0xe0] sm:$0xff] %v1202_v55  ;;  %1234 = vrot.lane.b32.xlu1 %v3006_v19, %s3460_s17  ;;  %v2239_v1 = vor.u32 %v2381_v28, %v2238_v58  ;;  %v2243_v41 = vor.u32 %v2380_v42, %v2240_v60 }
 0x428   : > { %v3160_v18 = vpop.permute.xlu0 %1328 }
 0x429   : > { %1743 = vmatpush.bf16.msrb.mxu3 %v2239_v1  ;;  %1795 = vmatpush.bf16.msra.mxu1 %v2243_v41  ;;  %v1205_v0 = vpop.permute.xlu1 %1204  ;;  %v3172_v2 = vpop.permute.xlu2 %1310 }
 0x42a   : > { %v1208_v61 = vsel %vm642_vm5, %v1205_v0, %v3094_v17  ;;  %v1209_v49 = vsel %vm642_vm5, %v3094_v17, %v1205_v0  ;;  %vm3472_vm5 = vcmp.lt.s32.totalorder %v2569_v27, 114 }
 0x42b   : > { %v1210_v5 = vmul.f32 %v1209_v49, %v645_v6  ;;  %v1211_v8 = vmul.f32 %v1208_v61, %v646_v7 }
 0x42d   : > { %v1212_v43 = vpack.c.bf16 %v1211_v8, %v1210_v5 }
 0x42e   : > { %v2230_v22 = vld [vmem:[#allocation3 + $0xe0] sm:$0xf]  ;;  %v2378_v23 = vld [vmem:[#allocation3 + $0xe4] sm:$0xf] }
 0x42f   : > { %1213 = vst [vmem:[#allocation3 + $0xe8] sm:$0xff] %v1212_v43  ;;  %1246 = vrot.lane.b32.xlu1 %v3008_v51, %s3461_s24  ;;  %s427_s24 = scalar_lea.vmem %s3405_s11, %s2325_s15 }
 0x430   : > { %v1341_v31 = vpop.permute.xlu0 %1340 }
 0x431   : > { %v1342_v11 = vsel %vm817_vm3, %v1339_v24, %v1341_v31  ;;  %v1343_v17 = vsel %vm817_vm3, %v1341_v31, %v1339_v24  ;;  %v1175_v3 = vpop.permute.xlu1 %1174  ;;  %v1289_v55 = vpop.permute.xlu2 %1288  ;;  %vm3469_vm3 = vmmov %vm3468_vm2 }
 0x432   : > { %v1344_v6 = vmul.f32 %v1342_v11, %v820_v47  ;;  %v1345_v7 = vmul.f32 %v1343_v17, %v821_v48 }
 0x434   : > { %v1346_v25 = vpack.c.bf16 %v1345_v7, %v1344_v6 }
 0x436   : > { %1347 = vst [vmem:[#allocation3 + $0x158] sm:$0xff] %v1346_v25  ;;  %v2379_v20 = vld [vmem:[#allocation3 + $0xe4] sm:$0xf0]  ;;  %v2232_v21 = vld [vmem:[#allocation3 + $0xe8] sm:$0xf0] }
 0x437   : > { %v2231_v26 = vor.u32 %v2379_v20, %v2230_v22  ;;  %v2235_v52 = vor.u32 %v2378_v23, %v2232_v21 }
 0x438   : > { %v3184_v58 = vpop.permute.xlu0 %1318 }
 0x439   : > { %1744 = vmatpush.bf16.msrb.mxu3 %v2231_v26  ;;  %1796 = vmatpush.bf16.msra.mxu1 %v2235_v52  ;;  %v1177_v24 = vpop.permute.xlu1 %1176  ;;  %v3198_v49 = vpop.permute.xlu2 %1300 }
 0x43a   : > { %v1178_v47 = vsel %vm603_vm6, %v1175_v3, %v1177_v24  ;;  %v1179_v48 = vsel %vm603_vm6, %v1177_v24, %v1175_v3  ;;  %vm3473_vm6 = vmmov %vm3472_vm5 }
 0x43b   : > { %v1180_v42 = vmul.f32 %v1179_v48, %v606_v32  ;;  %v1181_v28 = vmul.f32 %v1178_v47, %v607_v33  ;;  %v2448_v47 = vld [vmem:[%s3397_s3 + $0x38] ss:$0 sm:$0xff] }
 0x43d   : > { %v1182_v60 = vpack.c.bf16 %v1181_v28, %v1180_v42 }
 0x43f   : > { %1183 = vst [vmem:[#allocation3 + $0xd0] sm:$0xff] %v1182_v60 }
 0x440   : > { %v1291_v1 = vpop.permute.xlu0 %1290 }
 0x441   : > { %v1292_v41 = vsel %vm752_vm11, %v1289_v55, %v1291_v1  ;;  %v1293_v0 = vsel %vm752_vm11, %v1291_v1, %v1289_v55  ;;  %v1187_v61 = vpop.permute.xlu1 %1186  ;;  %v1399_v6 = vpop.permute.xlu2 %1398  ;;  %vm3463_vm11 = vmmov %vm3462_vm10 }
 0x442   : > { %v1294_v5 = vmul.f32 %v1292_v41, %v755_v36  ;;  %v1295_v32 = vmul.f32 %v1293_v0, %v756_v37  ;;  %v1188_v33 = vsel %vm616_vm15, %v3106_v62, %v1187_v61  ;;  %v1189_v8 = vsel %vm616_vm15, %v1187_v61, %v3106_v62 }
 0x443   : > { %v1190_v43 = vmul.f32 %v1189_v8, %v619_v10  ;;  %v1191_v31 = vmul.f32 %v1188_v33, %v620_v13  ;;  %vm3466_vm15 = vcmp.lt.s32.totalorder %v2569_v27, 98 }
 0x444   : > { %v1296_v11 = vpack.c.bf16 %v1295_v32, %v1294_v5  ;;  %v2302_v5 = vld [vmem:[#allocation3 + $0x170] sm:$0xf]  ;;  %vm3467_vm1 = vmmov %vm3466_vm15 }
 0x445   : > { %v1192_v17 = vpack.c.bf16 %v1191_v31, %v1190_v43 }
 0x446   : > { %1297 = vst [vmem:[#allocation3 + $0x130] sm:$0xff] %v1296_v11  ;;  %v2222_v25 = vld [vmem:[#allocation3 + $0xd0] sm:$0xf]  ;;  %v2376_v23 = vld [vmem:[#allocation3 + $0xd4] sm:$0xf] }
 0x447   : > { %1193 = vst [vmem:[#allocation3 + $0xd8] sm:$0xff] %v1192_v17  ;;  %v2214_v17 = vld [vmem:[#allocation3 + $0xc0] sm:$0xf] }
 0x448   : > { %v3214_v36 = vpop.permute.xlu0 %1388 }
 0x449   : > { %v1379_v37 = vpop.permute.xlu1 %1378  ;;  %v3246_v61 = vpop.permute.xlu2 %1276 }
 0x44a   : > { %v1382_v3 = vsel %vm869_vm0, %v1379_v37, %v3102_v14  ;;  %v1383_v62 = vsel %vm869_vm0, %v3102_v14, %v1379_v37  ;;  %vm3471_vm0 = vmmov %vm3470_vm4 }
 0x44b   : > { %v1384_v10 = vmul.f32 %v1382_v3, %v872_v56  ;;  %v1385_v13 = vmul.f32 %v1383_v62, %v873_v57  ;;  %v2447_v57 = vld [vmem:[%s3397_s3 + $0x30] ss:$0 sm:$0xff]  ;;  %v2374_v3 = vld [vmem:[#allocation3 + $0xc4] sm:$0xf] }
 0x44d   : > { %v1386_v7 = vpack.c.bf16 %v1385_v13, %v1384_v10 }
 0x44e   : > { %v2377_v22 = vld [vmem:[#allocation3 + $0xd4] sm:$0xf0]  ;;  %v2224_v20 = vld [vmem:[#allocation3 + $0xd8] sm:$0xf0] }
 0x44f   : > { %1387 = vst [vmem:[#allocation3 + $0x178] sm:$0xff] %v1386_v7  ;;  %v2223_v21 = vor.u32 %v2377_v22, %v2222_v25  ;;  %v2227_v26 = vor.u32 %v2376_v23, %v2224_v20  ;;  %v2373_v25 = vld [vmem:[#allocation3 + $0xb4] sm:$0xf0]  ;;  %v2208_v22 = vld [vmem:[#allocation3 + $0xb8] sm:$0xf0] }
 0x450   : > { %v1401_v52 = vpop.permute.xlu0 %1400 }
 0x451   : > { %v1402_v55 = vsel %vm3462_vm10, %v1399_v6, %v1401_v52  ;;  %v1403_v14 = vsel %vm3463_vm11, %v1401_v52, %v1399_v6  ;;  %1745 = vmatpush.bf16.msrb.mxu3 %v2223_v21  ;;  %1797 = vmatpush.bf16.msra.mxu1 %v2227_v26  ;;  %v1167_v56 = vpop.permute.xlu1 %1166  ;;  %v1265_v6 = vpop.permute.xlu2 %1264  ;;  %v2206_v52 = vld [vmem:[#allocation3 + $0xb0] sm:$0xf]  ;;  %vm3481_vm10 = vcmp.lt.s32.totalorder %v2569_v27, 95 }
 0x452   : > { %v1404_v24 = vmul.f32 %v2447_v57, %v1402_v55  ;;  %v1405_v48 = vmul.f32 %v2448_v47, %v1403_v14  ;;  %v1168_v42 = vsel %vm3464_vm13, %v3128_v30, %v1167_v56  ;;  %v1169_v28 = vsel %vm3465_vm14, %v1167_v56, %v3128_v30  ;;  %v2372_v55 = vld [vmem:[#allocation3 + $0xb4] sm:$0xf]  ;;  %v2371_v47 = vld [vmem:[#allocation3 + $0xa4] sm:$0xf0]  ;;  %vm3482_vm11 = vmmov %vm3481_vm10 }
 0x453   : > { %v1170_v60 = vmul.f32 %v1169_v28, %v593_v40  ;;  %v1171_v1 = vmul.f32 %v1168_v42, %v594_v46  ;;  %v2211_v57 = vor.u32 %v2372_v55, %v2208_v22  ;;  %v2370_v42 = vld [vmem:[#allocation3 + $0xa4] sm:$0xf]  ;;  %v2200_v28 = vld [vmem:[#allocation3 + $0xa8] sm:$0xf0]  ;;  %vm3485_vm13 = vcmp.lt.s32.totalorder %v2569_v27, 1 }
 0x454   : > { %v1406_v41 = vpack.c.bf16 %v1405_v48, %v1404_v24  ;;  %vm3486_vm14 = vmmov %vm3485_vm13 }
 0x455   : > { %v1172_v0 = vpack.c.bf16 %v1171_v1, %v1170_v60 }
 0x456   : > { %1407 = vst [vmem:[#allocation3 + $0x188] sm:$0xff] %v1406_v41  ;;  %v2397_v32 = vld [vmem:[#allocation3 + $0x174] sm:$0xf0] }
 0x457   : > { %1173 = vst [vmem:[#allocation3 + $0xc8] sm:$0xff] %v1172_v0  ;;  %v2303_v33 = vor.u32 %v2397_v32, %v2302_v5  ;;  %v2369_v0 = vld [vmem:[#allocation3 + $0x94] sm:$0xf0]  ;;  %v2192_v5 = vld [vmem:[#allocation3 + $0x98] sm:$0xf0] }
 0x458   : > { %v3248_v8 = vpop.permute.xlu0 %1254 }
 0x459   : > { %1756 = vmatpush.bf16.msrb.mxu0 %v2303_v33  ;;  %v1359_v43 = vpop.permute.xlu1 %1358 }
 0x45a   : > { %v1362_v40 = vsel %vm3466_vm15, %v1359_v43, %v3130_v4  ;;  %v1363_v46 = vsel %vm3467_vm1, %v3130_v4, %v1359_v43  ;;  %v2190_v43 = vld [vmem:[#allocation3 + $0x90] sm:$0xf]  ;;  %vm1726_vm15 = vcmask 130048   ;;  %vm3489_vm1 = vcmp.lt.s32.totalorder %v2569_v27, 14 }
 0x45b   : > { %v1364_v30 = vmul.f32 %v1362_v40, %v846_v29  ;;  %v1365_v31 = vmul.f32 %v1363_v46, %v847_v34 }
 0x45d   : > { %v1366_v11 = vpack.c.bf16 %v1365_v31, %v1364_v30  ;;  %v2191_v30 = vor.u32 %v2369_v0, %v2190_v43  ;;  %v2368_v31 = vld [vmem:[#allocation3 + $0x94] sm:$0xf]  ;;  %v3484_v43 = vperm.slane %v2842_v45, 7 }
 0x45e   : > { %v2375_v37 = vld [vmem:[#allocation3 + $0xc4] sm:$0xf0]  ;;  %v2216_v62 = vld [vmem:[#allocation3 + $0xc8] sm:$0xf0] }
 0x45f   : > { %1367 = vst [vmem:[#allocation3 + $0x168] sm:$0xff] %v1366_v11  ;;  %v2215_v10 = vor.u32 %v2375_v37, %v2214_v17  ;;  %v2219_v13 = vor.u32 %v2374_v3, %v2216_v62  ;;  %v2195_v11 = vor.u32 %v2368_v31, %v2192_v5  ;;  %v2367_v17 = vld [vmem:[#allocation3 + $0x84] sm:$0xf0]  ;;  %v2184_v3 = vld [vmem:[#allocation3 + $0x88] sm:$0xf0] }
 0x460   : > { %v1267_v7 = vpop.permute.xlu0 %1266  ;;  %v2304_v62 = vld [vmem:[#allocation3 + $0x178] sm:$0xf0] }
 0x461   : > { %v1268_v4 = vsel %vm3468_vm2, %v1265_v6, %v1267_v7  ;;  %v1269_v29 = vsel %vm3469_vm3, %v1267_v7, %v1265_v6  ;;  %1746 = vmatpush.bf16.msrb.mxu3 %v2215_v10  ;;  %1798 = vmatpush.bf16.msra.mxu1 %v2219_v13  ;;  %v1331_v34 = vpop.permute.xlu1 %1330  ;;  %v2182_v10 = vld [vmem:[#allocation3 + $0x80] sm:$0xf]  ;;  %v2393_v6 = vld [vmem:[#allocation3 + $0x154] sm:$0xf0]  ;;  %vm3490_vm2 = vmmov %vm3489_vm1  ;;  %vm3493_vm3 = vcmp.lt.s32.totalorder %v2569_v27, 16 }
 0x462   : > { %v1270_v23 = vmul.f32 %v1269_v29, %v723_v53  ;;  %v1271_v20 = vmul.f32 %v1268_v4, %v724_v54  ;;  %v1332_v21 = vsel %vm3470_vm4, %v3160_v18, %v1331_v34  ;;  %v1333_v26 = vsel %vm3471_vm0, %v1331_v34, %v3160_v18  ;;  %v2198_v54 = vld [vmem:[#allocation3 + $0xa0] sm:$0xf]  ;;  %vm3494_vm4 = vmmov %vm3493_vm3 }
 0x463   : > { %v1334_v14 = vmul.f32 %v1332_v21, %v807_v50  ;;  %v1335_v56 = vmul.f32 %v1333_v26, %v808_v63  ;;  %v2207_v53 = vor.u32 %v2373_v25, %v2206_v52  ;;  %v2294_v18 = vld [vmem:[#allocation3 + $0x160] sm:$0xf]  ;;  %v2199_v1 = vor.u32 %v2371_v47, %v2198_v54  ;;  %v2366_v25 = vld [vmem:[#allocation3 + $0x84] sm:$0xf] }
 0x464   : > { %v1272_v24 = vpack.c.bf16 %v1271_v20, %v1270_v23  ;;  %v2203_v50 = vor.u32 %v2370_v42, %v2200_v28  ;;  %v2187_v22 = vor.u32 %v2366_v25, %v2184_v3  ;;  %v3476_v21 = vperm.slane %v2842_v45, 0  ;;  %v2394_v52 = vld [vmem:[#allocation3 + $0x164] sm:$0xf]  ;;  %v3324_v45 = vld [vmem:[%s3400_s6 + $0x8] sm:$0xff] }
 0x465   : > { %v1336_v48 = vpack.c.bf16 %v1335_v56, %v1334_v14  ;;  %1747 = vmatpush.bf16.msrb.mxu3 %v2207_v53  ;;  %1799 = vmatpush.bf16.msra.mxu1 %v2211_v57  ;;  %v2288_v53 = vld [vmem:[#allocation3 + $0x158] sm:$0xf0]  ;;  %v3479_v54 = vperm.slane %v2597_v15, 6  ;;  %v3487_v25 = vperm.slane %v2597_v15, 3  ;;  %vm3497_vm0 = vcmp.lt.s32.totalorder %v2569_v27, 15 }
 0x466   : > { %1273 = vst [vmem:[#allocation3 + $0x118] sm:$0xff] %v1272_v24  ;;  %v2395_v60 = vld [vmem:[#allocation3 + $0x164] sm:$0xf0]  ;;  %v2296_v29 = vld [vmem:[#allocation3 + $0x168] sm:$0xf0] }
 0x467   : > { %1337 = vst [vmem:[#allocation3 + $0x150] sm:$0xff] %v1336_v48  ;;  %v2295_v41 = vor.u32 %v2395_v60, %v2294_v18  ;;  %v2299_v55 = vor.u32 %v2394_v52, %v2296_v29  ;;  %v3480_v48 = vperm.slane %v2602_v16, 6  ;;  %v2352_v27 = vld [vmem:[#allocation3 + $0x14] sm:$0xf] }
 0x469   : > { %1748 = vmatpush.bf16.msrb.mxu3 %v2199_v1  ;;  %1757 = vmatpush.bf16.msrb.mxu0 %v2295_v41  ;;  %v1309_v63 = vpop.permute.xlu1 %1308 }
 0x46a   : > { %1800 = vmatpush.bf16.msra.mxu1 %v2203_v50  ;;  %v1312_v32 = vsel %vm3472_vm5, %v1309_v63, %v3172_v2  ;;  %v1313_v33 = vsel %vm3473_vm6, %v3172_v2, %v1309_v63  ;;  %v2183_v2 = vor.u32 %v2367_v17, %v2182_v10  ;;  %vm3498_vm5 = vmmov %vm3497_vm0 }
 0x46b   : > { %v1314_v40 = vmul.f32 %v1312_v32, %v781_v38  ;;  %v1315_v46 = vmul.f32 %v1313_v33, %v782_v39  ;;  %v2396_v38 = vld [vmem:[#allocation3 + $0x174] sm:$0xf]  ;;  %v3483_v32 = vperm.slane %v2837_v44, 7 }
 0x46c   : > { %v2307_v4 = vor.u32 %v2396_v38, %v2304_v62 }
 0x46d   : > { %v1316_v37 = vpack.c.bf16 %v1315_v46, %v1314_v40  ;;  %1749 = vmatpush.bf16.msrb.mxu3 %v2191_v30  ;;  %v443_v46 = vld [vmem:[%s3400_s6] sm:$0xff] }
 0x46e   : > { %1801 = vmatpush.bf16.msra.mxu1 %v2195_v11  ;;  %v2286_v13 = vld [vmem:[#allocation3 + $0x150] sm:$0xf]  ;;  %v2392_v56 = vld [vmem:[#allocation3 + $0x154] sm:$0xf]  ;;  %v1466_v30 = vunpack.c.h.b16 %v443_v46 }
 0x46f   : > { %1317 = vst [vmem:[#allocation3 + $0x140] sm:$0xff] %v1316_v37  ;;  %v2287_v7 = vor.u32 %v2393_v6, %v2286_v13  ;;  %v2291_v57 = vor.u32 %v2392_v56, %v2288_v53  ;;  %v2270_v11 = vld [vmem:[#allocation3 + $0x130] sm:$0xf]  ;;  %v2388_v37 = vld [vmem:[#allocation3 + $0x134] sm:$0xf]  ;;  %v1465_v13 = vunpack.c.l.b16 %v443_v46  ;;  %v3496_v46 = vperm.slane %v2810_v12, 7 }
 0x470   : > { %v1470_v62 = vpack.c.b16 %v1466_v30, %v1466_v30  ;;  %v2136_v12 = vld [vmem:[#allocation3 + $0x28] sm:$0xf0] }
 0x471   : > { %1750 = vmatpush.bf16.msrb.mxu3 %v2183_v2  ;;  %1758 = vmatpush.bf16.msrb.mxu0 %v2287_v7  ;;  %v1321_v39 = vpop.permute.xlu1 %1320  ;;  %v3326_v6 = vpack.c.b16 %v1465_v13, %v1465_v13 }
 0x472   : > { %1802 = vmatpush.bf16.msra.mxu1 %v2187_v22  ;;  %v1322_v34 = vsel %vm3474_vm7, %v3184_v58, %v1321_v39  ;;  %v1323_v23 = vsel %vm3475_vm8, %v1321_v39, %v3184_v58  ;;  %v3488_v22 = vperm.slane %v2602_v16, 3  ;;  %v1468_v39 = vunpack.c.h.b16 %v3324_v45 }
 0x473   : > { %v1324_v20 = vmul.f32 %v1322_v34, %v794_v59  ;;  %v1325_v26 = vmul.f32 %v1323_v23, %v3476_v21  ;;  %1738 = vmatmul.bf16.vlgmr.msrb.gmra.mxu1 %v3326_v6  ;;  %v2176_v34 = vld [vmem:[#allocation3 + $0x78] sm:$0xf0] }
 0x474   : > { %1751 = vmatmul.bf16.vlgmr.msrb.gmra.mxu3 %v1470_v62 }
 0x475   : > { %1808 = vmatpush.bf16.msra.mxu3 %v2307_v4  ;;  %v1326_v14 = vpack.c.bf16 %v1325_v26, %v1324_v20  ;;  %v2399_v20 = vld [vmem:[#allocation3 + $0x184] sm:$0xf0]  ;;  %v2364_v26 = vld [vmem:[#allocation3 + $0x74] sm:$0xf] }
 0x476   : > { %v2278_v18 = vld [vmem:[#allocation3 + $0x140] sm:$0xf]  ;;  %v2390_v1 = vld [vmem:[#allocation3 + $0x144] sm:$0xf]  ;;  %v2179_v52 = vor.u32 %v2364_v26, %v2176_v34 }
 0x477   : > { %1327 = vst [vmem:[#allocation3 + $0x148] sm:$0xff] %v1326_v14  ;;  %v2168_v14 = vld [vmem:[#allocation3 + $0x68] sm:$0xf0] }
 0x479   : > { %1809 = vmatpush.bf16.msra.mxu3 %v2299_v55  ;;  %v1299_v24 = vpop.permute.xlu1 %1298  ;;  %v3340_v55 = vpack.c.b16 %v1468_v39, %v1468_v39 }
 0x47a   : > { %v1302_v58 = vsel %vm3477_vm9, %v1299_v24, %v3198_v49  ;;  %v1303_v59 = vsel %vm3478_vm12, %v3198_v49, %v1299_v24 }
 0x47b   : > { %v1304_v47 = vmul.f32 %v1302_v58, %v3479_v54  ;;  %v1305_v42 = vmul.f32 %v1303_v59, %v3480_v48  ;;  %v3492_v58 = vperm.slane %v2602_v16, 1  ;;  %v2362_v54 = vld [vmem:[#allocation3 + $0x64] sm:$0xf] }
 0x47d   : > { %1810 = vmatpush.bf16.msra.mxu3 %v2291_v57  ;;  %v1306_v28 = vpack.c.bf16 %v1305_v42, %v1304_v47  ;;  %v3491_v57 = vperm.slane %v2597_v15, 1  ;;  %v2171_v47 = vor.u32 %v2362_v54, %v2168_v14  ;;  %v2387_v42 = vld [vmem:[#allocation3 + $0x124] sm:$0xf0]  ;;  %v2350_v14 = vld [vmem:[#allocation3 + $0x4] sm:$0xf] }
 0x47e   : > { %v2391_v60 = vld [vmem:[#allocation3 + $0x144] sm:$0xf0]  ;;  %v2280_v41 = vld [vmem:[#allocation3 + $0x148] sm:$0xf0] }
 0x47f   : > { %1307 = vst [vmem:[#allocation3 + $0x138] sm:$0xff] %v1306_v28  ;;  %v2279_v50 = vor.u32 %v2391_v60, %v2278_v18  ;;  %v2283_v0 = vor.u32 %v2390_v1, %v2280_v41  ;;  %v2160_v28 = vld [vmem:[#allocation3 + $0x58] sm:$0xf0]  ;;  %v2264_v1 = vld [vmem:[#allocation3 + $0x128] sm:$0xf0] }
 0x481   : > { %1759 = vmatpush.bf16.msrb.mxu0 %v2279_v50  ;;  %1811 = vmatpush.bf16.msra.mxu3 %v2283_v0  ;;  %v1391_v63 = vpop.permute.xlu1 %1390  ;;  %v2360_v50 = vld [vmem:[#allocation3 + $0x54] sm:$0xf] }
 0x482   : > { %v1392_v49 = vsel %vm3481_vm10, %v3214_v36, %v1391_v63  ;;  %v1393_v5 = vsel %vm3482_vm11, %v1391_v63, %v3214_v36  ;;  %v2163_v0 = vor.u32 %v2360_v50, %v2160_v28  ;;  %v1237_v63 = vpop.permute.xlu2 %1236  ;;  %vm1880_vm10 = vcmask 195584  }
 0x483   : > { %v1394_v33 = vmul.f32 %v1392_v49, %v3483_v32  ;;  %v1395_v40 = vmul.f32 %v1393_v5, %v3484_v43  ;;  %v2152_v5 = vld [vmem:[#allocation3 + $0x48] sm:$0xf0]  ;;  %v3495_v43 = vperm.slane %v2803_v9, 7  ;;  %1803 = vmatmul.bf16.vlgmr.msra.gmra.mxu1 %v1470_v62  ;;  %v1245_v9 = vpop.permute.xlu0 %1244 }
 0x485   : > { %v1396_v31 = vpack.c.bf16 %v1395_v40, %v1394_v33 }
 0x486   : > { %v2389_v17 = vld [vmem:[#allocation3 + $0x134] sm:$0xf0]  ;;  %v2272_v3 = vld [vmem:[#allocation3 + $0x138] sm:$0xf0] }
 0x487   : > { %1397 = vst [vmem:[#allocation3 + $0x180] sm:$0xff] %v1396_v31  ;;  %v2271_v10 = vor.u32 %v2389_v17, %v2270_v11  ;;  %v2275_v36 = vor.u32 %v2388_v37, %v2272_v3  ;;  %v2358_v31 = vld [vmem:[#allocation3 + $0x44] sm:$0xf]  ;;  %v2385_v37 = vld [vmem:[#allocation3 + $0x114] sm:$0xf0] }
 0x488   : > { %v2155_v11 = vor.u32 %v2358_v31, %v2152_v5  ;;  %v2356_v3 = vld [vmem:[#allocation3 + $0x34] sm:$0xf] }
 0x489   : > { %1760 = vmatpush.bf16.msrb.mxu0 %v2271_v10  ;;  %1812 = vmatpush.bf16.msra.mxu3 %v2275_v36  ;;  %v1275_v44 = vpop.permute.xlu1 %1274  ;;  %v2144_v10 = vld [vmem:[#allocation3 + $0x38] sm:$0xf0] }
 0x48a   : > { %v1278_v2 = vsel %vm3485_vm13, %v1275_v44, %v3246_v61  ;;  %v1279_v7 = vsel %vm3486_vm14, %v3246_v61, %v1275_v44  ;;  %v2256_v44 = vld [vmem:[#allocation3 + $0x118] sm:$0xf0] }
 0x48b   : > { %v1280_v38 = vmul.f32 %v1279_v7, %v3487_v25  ;;  %v1281_v4 = vmul.f32 %v1278_v2, %v3488_v22  ;;  %v2147_v25 = vor.u32 %v2356_v3, %v2144_v10 }
 0x48d   : > { %v1282_v29 = vpack.c.bf16 %v1281_v4, %v1280_v38  ;;  %v3499_v4 = vperm.slane %v2597_v15, 0  ;;  %v447_v15 = vld [vmem:[%s3403_s9] sm:$0xff] }
 0x48e   : > { %v2310_v23 = vld [vmem:[#allocation3 + $0x180] sm:$0xf] }
 0x48f   : > { %1283 = vst [vmem:[#allocation3 + $0x120] sm:$0xff] %v1282_v29  ;;  %v2311_v21 = vor.u32 %v2399_v20, %v2310_v23  ;;  %v3500_v29 = vperm.slane %v2602_v16, 0  ;;  %v2354_v23 = vld [vmem:[#allocation3 + $0x24] sm:$0xf] }
 0x490   : > { %v2139_v20 = vor.u32 %v2354_v23, %v2136_v12 }
 0x491   : > { %1776 = vmatpush.bf16.msrb.mxu2 %v2311_v21  ;;  %v1257_v61 = vpop.permute.xlu1 %1256  ;;  %v445_v21 = vld [vmem:[%s3401_s7] sm:$0xff] }
 0x492   : > { %v1258_v56 = vsel %vm3489_vm1, %v3248_v8, %v1257_v61  ;;  %v1259_v53 = vsel %vm3490_vm2, %v1257_v61, %v3248_v8  ;;  %1460 = vperm.xlu2 %2435, %v445_v21  }
 0x493   : > { %v1260_v24 = vmul.f32 %v1259_v53, %v3491_v57  ;;  %v1261_v59 = vmul.f32 %v1258_v56, %v3492_v58  ;;  %v2120_v56 = vld [vmem:[#allocation3 + $0x8] sm:$0xf0]  ;;  %v1467_v53 = vunpack.c.l.b16 %v3324_v45 }
 0x494   : > { %2316 = vmatmul.msk.bf16.vlgmr.msrb.gmra.mxu2 %vm1726_vm15, %v3340_v55  ;;  %v2123_v16 = vor.u32 %v2350_v14, %v2120_v56 }
 0x495   : > { %1782 = vmatpush.bf16.msra.mxu2 %v2179_v52  ;;  %v1262_v48 = vpack.c.bf16 %v1261_v59, %v1260_v24  ;;  %v2128_v52 = vld [vmem:[#allocation3 + $0x18] sm:$0xf0]  ;;  %v2398_v24 = vld [vmem:[#allocation3 + $0x184] sm:$0xf] }
 0x496   : > { %v2262_v18 = vld [vmem:[#allocation3 + $0x120] sm:$0xf]  ;;  %v2386_v60 = vld [vmem:[#allocation3 + $0x124] sm:$0xf]  ;;  %v2131_v61 = vor.u32 %v2352_v27, %v2128_v52 }
 0x497   : > { %1263 = vst [vmem:[#allocation3 + $0x110] sm:$0xff] %v1262_v48  ;;  %v2263_v8 = vor.u32 %v2387_v42, %v2262_v18  ;;  %v2267_v41 = vor.u32 %v2386_v60, %v2264_v1  ;;  %v2312_v42 = vld [vmem:[#allocation3 + $0x188] sm:$0xf0]  ;;  %v1471_v18 = vpack.c.b16 %v1467_v53, %v1467_v53 }
 0x498   : > { %v2315_v28 = vor.u32 %v2398_v24, %v2312_v42  ;;  %v1869_v24 = vld [vmem:[#allocation2 + $0x28] sm:$0xff] }
 0x499   : > { %1783 = vmatpush.bf16.msra.mxu2 %v2171_v47  ;;  %v1235_v49 = vpop.permute.xlu1 %1234  ;;  %1761 = vmatpush.bf16.msrb.mxu0 %v2263_v8 }
 0x49a   : > { %1813 = vmatpush.bf16.msra.mxu3 %v2267_v41  ;;  %v1238_v32 = vsel %vm3493_vm3, %v1235_v49, %v1237_v63  ;;  %v1239_v33 = vsel %vm3494_vm4, %v1237_v63, %v1235_v49  ;;  %1877 = vperm.xlu2 %2435, %v447_v15  }
 0x49b   : > { %v1240_v40 = vmul.f32 %v1239_v33, %v3495_v43  ;;  %v1241_v30 = vmul.f32 %v1238_v32, %v3496_v46 }
 0x49d   : > { %1784 = vmatpush.bf16.msra.mxu2 %v2163_v0  ;;  %v1242_v17 = vpack.c.bf16 %v1241_v30, %v1240_v40 }
 0x49e   : > { %v2254_v36 = vld [vmem:[#allocation3 + $0x110] sm:$0xf]  ;;  %v2384_v13 = vld [vmem:[#allocation3 + $0x114] sm:$0xf] }
 0x49f   : > { %1243 = vst [vmem:[#allocation3 + $0x100] sm:$0xff] %v1242_v17  ;;  %v2255_v2 = vor.u32 %v2385_v37, %v2254_v36  ;;  %v2259_v7 = vor.u32 %v2384_v13, %v2256_v44 }
 0x4a1   : > { %1785 = vmatpush.bf16.msra.mxu2 %v2155_v11  ;;  %v1247_v38 = vpop.permute.xlu1 %1246  ;;  %1762 = vmatpush.bf16.msrb.mxu0 %v2255_v2 }
 0x4a2   : > { %1814 = vmatpush.bf16.msra.mxu3 %v2259_v7  ;;  %v1248_v62 = vsel %vm3497_vm0, %v1245_v9, %v1247_v38  ;;  %v1249_v22 = vsel %vm3498_vm5, %v1247_v38, %v1245_v9 }
 0x4a3   : > { %v1250_v39 = vmul.f32 %v1249_v22, %v3499_v4  ;;  %v1251_v34 = vmul.f32 %v1248_v62, %v3500_v29 }
 0x4a5   : > { %1786 = vmatpush.bf16.msra.mxu2 %v2147_v25  ;;  %v1252_v26 = vpack.c.bf16 %v1251_v34, %v1250_v39 }
 0x4a6   : > { %v2246_v57 = vld [vmem:[#allocation3 + $0x100] sm:$0xf]  ;;  %v2382_v59 = vld [vmem:[#allocation3 + $0x104] sm:$0xf] }
 0x4a7   : > { %1253 = vst [vmem:[#allocation3 + $0x108] sm:$0xff] %v1252_v26 }
 0x4a9   : > { %1787 = vmatpush.bf16.msra.mxu2 %v2139_v20 }
 0x4ad   : > { %1788 = vmatpush.bf16.msra.mxu2 %v2131_v61 }
 0x4ae   : > { %v2383_v58 = vld [vmem:[#allocation3 + $0x104] sm:$0xf0]  ;;  %v2248_v54 = vld [vmem:[#allocation3 + $0x108] sm:$0xf0] }
 0x4af   : > { %v2247_v47 = vor.u32 %v2383_v58, %v2246_v57  ;;  %v2251_v48 = vor.u32 %v2382_v59, %v2248_v54  ;;  %v446_v57 = vld [vmem:[%s3402_s8] sm:$0xff]  ;;  %v1870_v58 = vld [vmem:[#allocation2 + $0x10] sm:$0xff] }
 0x4b1   : > { %1789 = vmatpush.bf16.msra.mxu2 %v2123_v16  ;;  %1763 = vmatpush.bf16.msrb.mxu0 %v2247_v47 }
 0x4b2   : > { %1815 = vmatpush.bf16.msra.mxu3 %v2251_v48 }
 0x4b4   : > { %1790 = vmatmul.bf16.vlgmr.msra.gmra.mxu2 %v3326_v6  ;;  %1764 = vmatmul.bf16.vlgmr.msrb.gmra.mxu0 %v1471_v18 }
 0x4b5   : > { %1828 = vmatpush.bf16.msra.mxu0 %v2315_v28  ;;  %1816 = vmatmul.bf16.vlgmr.msra.gmra.mxu3 %v1471_v18 }
 0x4c4   : > { %2317 = vmatmul.msk.bf16.vlgmr.msra.gmra.mxu0 %vm1726_vm15, %v3340_v55 }
 0x4ec   : > { %v1461_v49 = vpop.permute.xlu2 %1460 }
 0x4f0   : > { %v1739_v45 = vpop.f32.mrf.mxu1 }
 0x4f1   : > { %v1740_v32 = vadd.f32 %v1739_v45, %v1461_v49 }
 0x4f7   : > { %v1752_v60 = vpop.f32.mrf.mxu3 }
 0x4f8   : > { %v1741_v1 = vpop.f32.mrf.mxu1  ;;  %v1753_v43 = vadd.f32 %v1752_v60, %v1740_v32 }
 0x4ff   : > { %v1754_v8 = vpop.f32.mrf.mxu3 }
 0x500   : > { %v1804_v50 = vpop.f32.mrf.mxu1 }
 0x508   : > { %v1806_v63 = vpop.f32.mrf.mxu1 }
 0x517   : > { %v1778_v41 = vpop.f32.mrf.mxu2 }
 0x51f   : > { %v1780_v0 = vpop.f32.mrf.mxu2 }
 0x531   : > { %v1765_v5 = vpop.f32.mrf.mxu0 }
 0x532   : > { %v1766_v31 = vadd.f32 %v1765_v5, %v1753_v43 }
 0x534   : > { %v1779_v17 = vadd.f32 %v1778_v41, %v1766_v31 }
 0x536   : > { %v1837_v13 = vmul.f32 %v1779_v17, %v1779_v17 }
 0x537   : > { %v1791_v33 = vpop.f32.mrf.mxu2 }
 0x538   : > { %v1792_v6 = vadd.f32 %v1791_v33, %v1461_v49  ;;  %v1817_v40 = vpop.f32.mrf.mxu3 }
 0x539   : > { %v1767_v46 = vpop.f32.mrf.mxu0 }
 0x53a   : > { %v1805_v30 = vadd.f32 %v1804_v50, %v1792_v6 }
 0x53c   : > { %v1818_v55 = vadd.f32 %v1817_v40, %v1805_v30 }
 0x53f   : > { %v1793_v11 = vpop.f32.mrf.mxu2 }
 0x540   : > { %v1819_v37 = vpop.f32.mrf.mxu3 }
 0x541   : > { %v1830_v3 = vpop.f32.mrf.mxu0 }
 0x542   : > { %v1831_v10 = vadd.f32 %v1830_v3, %v1818_v55 }
 0x544   : > { %v1834_v36 = vadd.f32 %v1831_v10, %v1779_v17  ;;  %v1838_v44 = vmul.f32 %v1831_v10, %v1831_v10 }
 0x546   : > { %1835 = vadd.xlane.f32.xlu0 %v1834_v36  ;;  %v1839_v2 = vadd.f32 %v1838_v44, %v1837_v13 }
 0x548   : > { %1840 = vadd.xlane.f32.xlu1 %v1839_v2 }
 0x549   : > { %v1832_v7 = vpop.f32.mrf.mxu0 }
 0x5b9   : > { %v1836_v25 = vpop.xlane.xlu0 %1835 }
 0x5ba   : > { %v1842_v9 = vmul.f32 0.00390625, %v1836_v25 }
 0x5bb   : > { %v1841_v38 = vpop.xlane.xlu1 %1840 }
 0x5bc   : > { %v1843_v12 = vmul.f32 0.00390625, %v1841_v38  ;;  %v1844_v62 = vmul.f32 %v1842_v9, %v1842_v9  ;;  %v1846_v26 = vsub.f32 %v1779_v17, %v1842_v9  ;;  %v1847_v52 = vsub.f32 %v1831_v10, %v1842_v9 }
 0x5be   : > { %v1845_v22 = vsub.f32 %v1843_v12, %v1844_v62 }
 0x5c0   : > { %v1848_v4 = vadd.f32 1e-05, %v1845_v22 }
 0x5c2   : > { %2445 = vrsqrt.f32 %v1848_v4  ;;  %vm1855_vm7 = vweird.f32 %v1848_v4 }
 0x5c8   : > { %v2446_v39 = vpop.eup %2445 }
 0x5c9   : > { %v1850_v29 = vmul.f32 %v2446_v39, %v1848_v4  ;;  %vm1856_vm6 = vweird.f32 %v2446_v39 }
 0x5ca   : > { %vm1857_vm8 = vmor %vm1855_vm7, %vm1856_vm6 }
 0x5cb   : > { %v1851_v34 = vmul.f32 %v2446_v39, %v1850_v29 }
 0x5cd   : > { %v1852_v23 = vmul.f32 0.5, %v1851_v34 }
 0x5cf   : > { %v1853_v20 = vsub.f32 1.5, %v1852_v23 }
 0x5d1   : > { %v1854_v21 = vmul.f32 %v2446_v39, %v1853_v20 }
 0x5d3   : > { %v1858_v27 = vsel %vm1857_vm8, %v2446_v39, %v1854_v21 }
 0x5d4   : > { %v1859_v61 = vmul.f32 %v1858_v27, %v1846_v26  ;;  %v1860_v14 = vmul.f32 %v1858_v27, %v1847_v52 }
 0x5d6   : > { %vm1861_vm9 = vcmp.ge.f32.partialorder %v1859_v61, 0.0  ;;  %vm1862_vm12 = vcmp.ge.f32.partialorder %v1860_v14, 0.0  ;;  %v1863_v56 = vmul.f32 %v1859_v61, %v2574_v35  ;;  %v1864_v15 = vmul.f32 %v1860_v14, %v2574_v35  ;;  %v1878_v35 = vpop.permute.xlu2 %1877 }
 0x5d8   : > { %v1865_v16 = vsel %vm1861_vm9, %v1859_v61, %v1863_v56  ;;  %v1866_v53 = vsel %vm1862_vm12, %v1860_v14, %v1864_v15 }
 0x5d9   : > { %1897 = vmatpush.msrb.mxu0 %v1865_v16  ;;  %1917 = vmatpush.msrb.mxu2 %v1866_v53 }
 0x5db   : > { %1898 = vmatpush.msrb.mxu0 %v3006_v19  ;;  %1918 = vmatpush.msrb.mxu2 %v3008_v51 }
 0x5dd   : > { %1899 = vmatpush.msrb.mxu0 %v1869_v24  ;;  %1919 = vmatpush.msrb.mxu2 %v1870_v58 }
 0x5de   : > { %2318 = vmatmul.msk.f32.vlgmr.msrb.gmra.mxu0 %vm1880_vm10, %v446_v57  ;;  %2319 = vmatmul.msk.f32.vlgmr.msrb.gmra.mxu2 %vm1880_vm10, %v446_v57 }
 0x65b   : > { %v1901_v19 = vpop.f32.mrf.mxu0 }
 0x65c   : > { %v1902_v59 = vadd.f32 %v1901_v19, %v1878_v35 }
 0x65e   : > { %1924 = vst [vmem:[%s427_s24] sm:$0xff] %v1902_v59 }
 0x661   : > { %v1921_v51 = vpop.f32.mrf.mxu2 }
 0x662   : > { %v1922_v54 = vadd.f32 %v1921_v51, %v1878_v35 }
 0x664   : > { %1925 = vst [vmem:[%s427_s24 + $0x8] sm:$0xff] %v1922_v54 }
 0x665 PF: > { %s22_s19 = sadd.s32 1, %s2455_s19  }
 0x666   : > { %p19_p4 = scmp.ge.s32.totalorder %s22_s19, 4  }
 0x668   :  { %21 = sbr.rel (!%p19_p4) target bundleno = 2 (0x2), region = 101 }

</bundles_post_ra>
